<compile_context>
chip_gen: v5e
topology: v5e:2x2
jax: 0.10.0
libtpu: 0.0.40
codegen_flags: <defaults>
</compile_context>

<pallas_src>
import jax
import jax.numpy as jnp
from jax import lax
from jax.experimental import pallas as pl
from jax.experimental.pallas import tpu as pltpu


def mult_filters(filters, width):
    return max(3, int(filters * width))


# ----------------------------------------------------------------------------
# Pallas kernel: one (batch image, output row-block) per grid step.
# ----------------------------------------------------------------------------
def _block17_kernel(x_ref,
                    w0_ref, b0_ref,          # branch0 1x1 conv (BN folded)
                    w1a_ref, b1a_ref,        # branch1[0] 1x1 conv
                    w1b_ref, b1b_ref,        # branch1[1] (1,7) conv, (7,K,N)
                    w1c_ref, b1c_ref,        # branch1[2] (7,1) conv, (7,K,N)
                    w2a_ref, w2b_ref, b2_ref,  # final 1x1 conv (scale folded)
                    o_ref):
    H, W, Cin = x_ref.shape                  # full image (resident per n)
    TH = o_ref.shape[0]                      # output row-block height
    HP = TH + 6                              # row-block + (7,1) halo
    m128 = w1a_ref.shape[1]
    m160 = w1b_ref.shape[2]
    f32, bf16 = jnp.float32, jnp.bfloat16

    h0 = pl.program_id(1) * TH               # first output row of this block

    # --- halo window of x: rows [h0-3, h0+TH+3).  Starts are clamped; rows
    #     that fall outside the image are masked to zero later (after the
    #     row-independent stages), so the clamped reads only need to be
    #     finite, not correct.  Requires TH >= 3 (enforced by the wrapper).
    top = x_ref[pl.ds(jnp.maximum(h0 - 3, 0), 3)]
    mid = x_ref[pl.ds(h0, TH)]
    bot = x_ref[pl.ds(jnp.minimum(h0 + TH, H - 3), 3)]
    xp = jnp.concatenate([top, mid, bot], axis=0)        # (HP, W, Cin) bf16
    mid_flat = mid.reshape(TH * W, Cin)                  # bf16

    # --- branch0: 1x1 conv -> +shift -> ReLU (output rows only) ---
    y0 = jnp.dot(mid_flat, w0_ref[...], preferred_element_type=f32)
    y0 = jnp.maximum(y0 + b0_ref[...], 0.0)              # (TH*W, m192)

    # --- branch1[0]: 1x1 conv on the halo window ---
    y1 = jnp.dot(xp.reshape(HP * W, Cin), w1a_ref[...],
                 preferred_element_type=f32)
    y1 = jnp.maximum(y1 + b1a_ref[...], 0.0)
    y1 = y1.astype(bf16).reshape(HP, W, m128)

    # --- branch1[1]: (1,7) conv along W, pad 3 — 7 accumulating MXU dots ---
    zw = jnp.zeros((HP, 3, m128), bf16)
    y1p = jnp.concatenate([zw, y1, zw], axis=1)          # (HP, W+6, m128)
    acc = jnp.zeros((HP * W, m160), f32)
    for kw in range(7):
        tap = y1p[:, kw:kw + W, :].reshape(HP * W, m128)
        acc = acc + jnp.dot(tap, w1b_ref[kw], preferred_element_type=f32)
    y1 = jnp.maximum(acc + b1b_ref[...], 0.0)
    y1 = y1.astype(bf16).reshape(HP, W, m160)

    # Rows outside the image must be exactly zero before the cross-row (7,1)
    # conv (they are NOT pipeline(0): ReLU(BN shift) != 0).
    row = h0 - 3 + lax.broadcasted_iota(jnp.int32, (HP, W, 1), 0)
    inside = jnp.logical_and(row >= 0, row < H)
    y1 = jnp.where(inside, y1, jnp.zeros_like(y1))

    # --- branch1[2]: (7,1) conv along H — 7 accumulating dots over halo rows.
    #     Tap slices are leading-axis slices (free), no padded buffer needed.
    m192 = w1c_ref.shape[2]
    acc = jnp.zeros((TH * W, m192), f32)
    for kh in range(7):
        tap = y1[kh:kh + TH].reshape(TH * W, m160)
        acc = acc + jnp.dot(tap, w1c_ref[kh], preferred_element_type=f32)
    y1 = jnp.maximum(acc + b1c_ref[...], 0.0)            # (TH*W, m192)

    # --- final 1x1 conv (residual scale pre-folded), residual add, ReLU ---
    out = jnp.dot(y0.astype(bf16), w2a_ref[...], preferred_element_type=f32)
    out = out + jnp.dot(y1.astype(bf16), w2b_ref[...],
                        preferred_element_type=f32)
    out = jnp.maximum(out + b2_ref[...] + mid_flat.astype(f32), 0.0)
    o_ref[...] = out.reshape(TH, W, Cin).astype(o_ref.dtype)


# ----------------------------------------------------------------------------
# Host-side weight preparation: fold BN + residual scale, cast to bf16.
# ----------------------------------------------------------------------------
def _prepare_kernel_params(p, scale):
    bf16, f32 = jnp.bfloat16, jnp.float32
    m192 = p["w0"].shape[1]

    w0 = (p["w0"] * p["s0"]).astype(bf16)                       # (Cin, m192)
    b0 = p["b0"].astype(f32)
    w1a = (p["w1a"] * p["s1a"]).astype(bf16)                    # (Cin, m128)
    b1a = p["b1a"].astype(f32)
    w1b = (p["w1b"] * p["s1b"].reshape(1, 1, -1)).astype(bf16)  # (7, m128, m160)
    b1b = p["b1b"].astype(f32)
    w1c = (p["w1c"] * p["s1c"].reshape(1, 1, -1)).astype(bf16)  # (7, m160, m192)
    b1c = p["b1c"].astype(f32)

    w2s = p["w2"] * scale
    w2a = w2s[:m192].astype(bf16)                               # branch0 half
    w2b = w2s[m192:].astype(bf16)                               # branch1 half
    b2 = (p["b2"] * scale).astype(f32)
    return [w0, b0, w1a, b1a, w1b, b1b, w1c, b1c, w2a, w2b, b2]


# ----------------------------------------------------------------------------
# Wrappers.  NHWC entry point (no boundary transposes) + NCHW adapter.
# ----------------------------------------------------------------------------
def block17_pallas_nhwc(x_nhwc, params, scale, row_block=8):
    N, H, W, Cin = x_nhwc.shape
    assert H >= 3, "Block17 kernel needs at least 3 rows"
    # Row-block must divide H and be >= 3 (halo clamping assumes a fully
    # inside/outside 3-row halo); otherwise fall back to a single block.
    TH = row_block if (H % row_block == 0 and row_block >= 3) else H
    nH = H // TH

    x = x_nhwc.astype(jnp.bfloat16)                      # bf16 image I/O
    kparams = _prepare_kernel_params(params, scale)

    def const_spec(a):
        zeros = (0,) * a.ndim
        return pl.BlockSpec(a.shape, lambda n, h, _z=zeros: _z)

    # x block index ignores the row axis -> whole image stays resident and is
    # only re-DMA'd when n changes.
    in_specs = [pl.BlockSpec((None, H, W, Cin), lambda n, h: (n, 0, 0, 0))]
    in_specs += [const_spec(a) for a in kparams]

    out = pl.pallas_call(
        _block17_kernel,
        out_shape=jax.ShapeDtypeStruct((N, H, W, Cin), jnp.bfloat16),
        grid=(N, nH),
        in_specs=in_specs,
        out_specs=pl.BlockSpec((None, TH, W, Cin), lambda n, h: (n, h, 0, 0)),
        compiler_params=pltpu.CompilerParams(
            dimension_semantics=("parallel", "parallel"),
            vmem_limit_bytes=48 * 1024 * 1024),
    )(x, *kparams)
    return out


def block17_pallas(x_nchw, params, scale, row_block=8):
    x = jnp.transpose(x_nchw, (0, 2, 3, 1))              # NCHW -> NHWC
    out = block17_pallas_nhwc(x, params, scale, row_block=row_block)
    return jnp.transpose(out, (0, 3, 1, 2)).astype(x_nchw.dtype)


# ----------------------------------------------------------------------------
# Deterministic parameter init (eval-mode BN folded into scale/shift).
# ----------------------------------------------------------------------------
def init_params(key, in_features, width):
    m128 = mult_filters(128, width)
    m160 = mult_filters(160, width)
    m192 = mult_filters(192, width)
    ks = jax.random.split(key, 12)
    eps = 1e-3

    def conv_w(k, shape):
        return 0.1 * jax.random.normal(k, shape, jnp.float32)

    def bn(kg, kb, c):
        gamma = 1.0 + 0.1 * jax.random.normal(kg, (c,), jnp.float32)
        beta = 0.1 * jax.random.normal(kb, (c,), jnp.float32)
        run_mean = jnp.zeros((c,), jnp.float32)
        run_var = jnp.ones((c,), jnp.float32)
        s = gamma / jnp.sqrt(run_var + eps)
        b = beta - run_mean * s
        return s.reshape(1, c), b.reshape(1, c)

    p = {}
    p["w0"] = conv_w(ks[0], (in_features, m192))          # 1x1 conv (Cin, Cout)
    p["s0"], p["b0"] = bn(ks[1], ks[2], m192)
    p["w1a"] = conv_w(ks[3], (in_features, m128))         # 1x1 conv
    p["s1a"], p["b1a"] = bn(ks[4], ks[5], m128)
    p["w1b"] = conv_w(ks[6], (7, m128, m160))             # (1,7) conv taps
    p["s1b"], p["b1b"] = bn(ks[7], ks[8], m160)
    p["w1c"] = conv_w(ks[9], (7, m160, m192))             # (7,1) conv taps
    p["s1c"], p["b1c"] = bn(ks[10], ks[11], m192)
    k2w, k2b = jax.random.split(jax.random.fold_in(key, 99))
    p["w2"] = conv_w(k2w, (2 * m192, in_features))        # final 1x1 conv
    p["b2"] = (0.1 * jax.random.normal(k2b, (in_features,), jnp.float32)
               ).reshape(1, in_features)
    return p


# ----------------------------------------------------------------------------
# Pure-JAX (XLA, f32) reference in NHWC for the correctness check.
# ----------------------------------------------------------------------------
def block17_ref(x_nchw, p, scale):
    x = jnp.transpose(x_nchw, (0, 2, 3, 1))

    def conv1x1(v, w):
        return jnp.einsum("nhwc,cd->nhwd", v, w)

    def conv_spatial(v, w_hwio, pad):
        return lax.conv_general_dilated(
            v, w_hwio, window_strides=(1, 1), padding=pad,
            dimension_numbers=("NHWC", "HWIO", "NHWC"))

    relu = lambda v: jnp.maximum(v, 0.0)

    y0 = relu(conv1x1(x, p["w0"]) * p["s0"] + p["b0"])
    y1 = relu(conv1x1(x, p["w1a"]) * p["s1a"] + p["b1a"])
    w1b = p["w1b"].reshape(1, 7, p["w1b"].shape[1], p["w1b"].shape[2])   # HWIO
    y1 = relu(conv_spatial(y1, w1b, ((0, 0), (3, 3))) * p["s1b"] + p["b1b"])
    w1c = p["w1c"].reshape(7, 1, p["w1c"].shape[1], p["w1c"].shape[2])   # HWIO
    y1 = relu(conv_spatial(y1, w1c, ((3, 3), (0, 0))) * p["s1c"] + p["b1c"])
    cat = jnp.concatenate([y0, y1], axis=-1)
    out = conv1x1(cat, p["w2"]) + p["b2"]
    out = relu(out * scale + x)
    return jnp.transpose(out, (0, 3, 1, 2))


if __name__ == "__main__":
    key = jax.random.PRNGKey(0)
    kx, kp = jax.random.split(key)

    N, C, H, W = 2, 4, 16, 16          # in_features = 4
    width = 1.0 / 32                   # -> m128=4, m160=5, m192=6
    scale = 0.17

    x = jax.random.normal(kx, (N, C, H, W), jnp.float32)
    params = init_params(kp, C, width)

    # row_block=8 -> grid (N=2, H/8=2); exercises both real-halo and
    # image-edge (zero-padded) halo paths.
    out = block17_pallas(x, params, scale, row_block=8)
    out = jax.block_until_ready(out)

    ref = jax.block_until_ready(block17_ref(x, params, scale))
    assert out.shape == (N, C, H, W)
    max_err = float(jnp.max(jnp.abs(out - ref)))
    # bf16 image I/O + bf16 matmul operands (f32 accumulation) vs f32 ref.
    assert jnp.allclose(out, ref, atol=3e-2, rtol=5e-2), max_err

    print("KERNEL_OK")
</pallas_src>

<mosaic_0001>
module attributes {stable_mosaic.version = 11 : i64} {
  func.func @_block17_kernel(%arg0: i32, %arg1: i32, %arg2: memref<1x16x16x4xbf16, #tpu.memory_space<vmem>>, %arg3: memref<4x6xbf16, #tpu.memory_space<vmem>>, %arg4: memref<1x6xf32, #tpu.memory_space<vmem>>, %arg5: memref<4x4xbf16, #tpu.memory_space<vmem>>, %arg6: memref<1x4xf32, #tpu.memory_space<vmem>>, %arg7: memref<7x4x5xbf16, #tpu.memory_space<vmem>>, %arg8: memref<1x5xf32, #tpu.memory_space<vmem>>, %arg9: memref<7x5x6xbf16, #tpu.memory_space<vmem>>, %arg10: memref<1x6xf32, #tpu.memory_space<vmem>>, %arg11: memref<6x4xbf16, #tpu.memory_space<vmem>>, %arg12: memref<6x4xbf16, #tpu.memory_space<vmem>>, %arg13: memref<1x4xf32, #tpu.memory_space<vmem>>, %arg14: memref<1x8x16x4xbf16, #tpu.memory_space<vmem>>) attributes {dimension_semantics = [#tpu.dimension_semantics<parallel>, #tpu.dimension_semantics<parallel>], iteration_bounds = array<i64: 2, 2>, scalar_prefetch = 0 : i64, scratch_operands = 0 : i64, tpu.core_type = #tpu.core_type<tc>, window_params = [{transform_indices = @transform_0, window_bounds = array<i64: 1, 16, 16, 4>}, {pipeline_mode = #tpu.pipeline_mode<synchronous>, transform_indices = @transform_1, window_bounds = array<i64: 4, 6>}, {pipeline_mode = #tpu.pipeline_mode<synchronous>, transform_indices = @transform_2, window_bounds = array<i64: 1, 6>}, {pipeline_mode = #tpu.pipeline_mode<synchronous>, transform_indices = @transform_3, window_bounds = array<i64: 4, 4>}, {pipeline_mode = #tpu.pipeline_mode<synchronous>, transform_indices = @transform_4, window_bounds = array<i64: 1, 4>}, {pipeline_mode = #tpu.pipeline_mode<synchronous>, transform_indices = @transform_5, window_bounds = array<i64: 7, 4, 5>}, {pipeline_mode = #tpu.pipeline_mode<synchronous>, transform_indices = @transform_6, window_bounds = array<i64: 1, 5>}, {pipeline_mode = #tpu.pipeline_mode<synchronous>, transform_indices = @transform_7, window_bounds = array<i64: 7, 5, 6>}, {pipeline_mode = #tpu.pipeline_mode<synchronous>, transform_indices = @transform_8, window_bounds = array<i64: 1, 6>}, {pipeline_mode = #tpu.pipeline_mode<synchronous>, transform_indices = @transform_9, window_bounds = array<i64: 6, 4>}, {pipeline_mode = #tpu.pipeline_mode<synchronous>, transform_indices = @transform_10, window_bounds = array<i64: 6, 4>}, {pipeline_mode = #tpu.pipeline_mode<synchronous>, transform_indices = @transform_11, window_bounds = array<i64: 1, 4>}, {transform_indices = @transform_12, window_bounds = array<i64: 1, 8, 16, 4>}]} {
    %c8_i32 = arith.constant 8 : i32
    %0 = arith.muli %arg1, %c8_i32 : i32
    %c3_i32 = arith.constant 3 : i32
    %1 = arith.subi %0, %c3_i32 : i32
    %c0_i32 = arith.constant 0 : i32
    %2 = arith.maxsi %1, %c0_i32 : i32
    %c0 = arith.constant 0 : index
    %3 = arith.index_cast %2 : i32 to index
    %c0_0 = arith.constant 0 : index
    %c0_1 = arith.constant 0 : index
    %4 = vector.load %arg2[%c0, %3, %c0_0, %c0_1] : memref<1x16x16x4xbf16, #tpu.memory_space<vmem>>, vector<1x3x16x4xbf16>
    %5 = vector.shape_cast %4 : vector<1x3x16x4xbf16> to vector<3x16x4xbf16>
    %c0_2 = arith.constant 0 : index
    %6 = arith.index_cast %0 : i32 to index
    %c0_3 = arith.constant 0 : index
    %c0_4 = arith.constant 0 : index
    %7 = vector.load %arg2[%c0_2, %6, %c0_3, %c0_4] : memref<1x16x16x4xbf16, #tpu.memory_space<vmem>>, vector<1x8x16x4xbf16>
    %8 = vector.shape_cast %7 : vector<1x8x16x4xbf16> to vector<8x16x4xbf16>
    %c8_i32_5 = arith.constant 8 : i32
    %9 = arith.addi %0, %c8_i32_5 : i32
    %c13_i32 = arith.constant 13 : i32
    %10 = arith.minsi %9, %c13_i32 : i32
    %c0_6 = arith.constant 0 : index
    %11 = arith.index_cast %10 : i32 to index
    %c0_7 = arith.constant 0 : index
    %c0_8 = arith.constant 0 : index
    %12 = vector.load %arg2[%c0_6, %11, %c0_7, %c0_8] : memref<1x16x16x4xbf16, #tpu.memory_space<vmem>>, vector<1x3x16x4xbf16>
    %13 = vector.shape_cast %12 : vector<1x3x16x4xbf16> to vector<3x16x4xbf16>
    %14 = tpu.concatenate %5, %8, %13 in 0 : vector<3x16x4xbf16>, vector<8x16x4xbf16>, vector<3x16x4xbf16> -> vector<14x16x4xbf16>
    %15 = vector.shape_cast %8 : vector<8x16x4xbf16> to vector<128x4xbf16>
    %c0_9 = arith.constant 0 : index
    %c0_10 = arith.constant 0 : index
    %16 = vector.load %arg3[%c0_9, %c0_10] : memref<4x6xbf16, #tpu.memory_space<vmem>>, vector<4x6xbf16>
    %cst = arith.constant dense<0.000000e+00> : vector<128x6xf32>
    %17 = tpu.matmul %15, %16, %cst {dimension_numbers = #tpu.dot_dimension_numbers<[1], [0], [0], [1], [0, 0, 1, 1], [], []>} : vector<128x4xbf16>, vector<4x6xbf16>, vector<128x6xf32> -> vector<128x6xf32>
    %c0_11 = arith.constant 0 : index
    %c0_12 = arith.constant 0 : index
    %18 = vector.load %arg4[%c0_11, %c0_12] : memref<1x6xf32, #tpu.memory_space<vmem>>, vector<1x6xf32>
    %19 = vector.broadcast %18 : vector<1x6xf32> to vector<128x6xf32>
    %20 = arith.addf %17, %19 : vector<128x6xf32>
    %cst_13 = arith.constant 0.000000e+00 : f32
    %21 = vector.broadcast %cst_13 : f32 to vector<128x6xf32>
    %22 = arith.maximumf %20, %21 : vector<128x6xf32>
    %23 = vector.shape_cast %14 : vector<14x16x4xbf16> to vector<224x4xbf16>
    %c0_14 = arith.constant 0 : index
    %c0_15 = arith.constant 0 : index
    %24 = vector.load %arg5[%c0_14, %c0_15] : memref<4x4xbf16, #tpu.memory_space<vmem>>, vector<4x4xbf16>
    %cst_16 = arith.constant dense<0.000000e+00> : vector<224x4xf32>
    %25 = tpu.matmul %23, %24, %cst_16 {dimension_numbers = #tpu.dot_dimension_numbers<[1], [0], [0], [1], [0, 0, 1, 1], [], []>} : vector<224x4xbf16>, vector<4x4xbf16>, vector<224x4xf32> -> vector<224x4xf32>
    %c0_17 = arith.constant 0 : index
    %c0_18 = arith.constant 0 : index
    %26 = vector.load %arg6[%c0_17, %c0_18] : memref<1x4xf32, #tpu.memory_space<vmem>>, vector<1x4xf32>
    %27 = vector.broadcast %26 : vector<1x4xf32> to vector<224x4xf32>
    %28 = arith.addf %25, %27 : vector<224x4xf32>
    %cst_19 = arith.constant 0.000000e+00 : f32
    %29 = vector.broadcast %cst_19 : f32 to vector<224x4xf32>
    %30 = arith.maximumf %28, %29 : vector<224x4xf32>
    %31 = arith.truncf %30 : vector<224x4xf32> to vector<224x4xbf16>
    %32 = vector.shape_cast %31 : vector<224x4xbf16> to vector<14x16x4xbf16>
    %cst_20 = arith.constant 0.000000e+00 : bf16
    %33 = vector.broadcast %cst_20 : bf16 to vector<14x3x4xbf16>
    %34 = tpu.concatenate %33, %32, %33 in 1 : vector<14x3x4xbf16>, vector<14x16x4xbf16>, vector<14x3x4xbf16> -> vector<14x22x4xbf16>
    %cst_21 = arith.constant 0.000000e+00 : f32
    %35 = vector.broadcast %cst_21 : f32 to vector<224x5xf32>
    %36 = vector.extract_strided_slice %34 {offsets = [0, 0, 0], sizes = [14, 16, 4], strides = [1, 1, 1]} : vector<14x22x4xbf16> to vector<14x16x4xbf16>
    %37 = vector.shape_cast %36 : vector<14x16x4xbf16> to vector<224x4xbf16>
    %c0_22 = arith.constant 0 : index
    %c0_23 = arith.constant 0 : index
    %c0_24 = arith.constant 0 : index
    %38 = vector.load %arg7[%c0_22, %c0_23, %c0_24] : memref<7x4x5xbf16, #tpu.memory_space<vmem>>, vector<1x4x5xbf16>
    %39 = vector.shape_cast %38 : vector<1x4x5xbf16> to vector<4x5xbf16>
    %cst_25 = arith.constant dense<0.000000e+00> : vector<224x5xf32>
    %40 = tpu.matmul %37, %39, %cst_25 {dimension_numbers = #tpu.dot_dimension_numbers<[1], [0], [0], [1], [0, 0, 1, 1], [], []>} : vector<224x4xbf16>, vector<4x5xbf16>, vector<224x5xf32> -> vector<224x5xf32>
    %41 = arith.addf %35, %40 : vector<224x5xf32>
    %42 = vector.extract_strided_slice %34 {offsets = [0, 1, 0], sizes = [14, 16, 4], strides = [1, 1, 1]} : vector<14x22x4xbf16> to vector<14x16x4xbf16>
    %43 = vector.shape_cast %42 : vector<14x16x4xbf16> to vector<224x4xbf16>
    %c1 = arith.constant 1 : index
    %c0_26 = arith.constant 0 : index
    %c0_27 = arith.constant 0 : index
    %44 = vector.load %arg7[%c1, %c0_26, %c0_27] : memref<7x4x5xbf16, #tpu.memory_space<vmem>>, vector<1x4x5xbf16>
    %45 = vector.shape_cast %44 : vector<1x4x5xbf16> to vector<4x5xbf16>
    %cst_28 = arith.constant dense<0.000000e+00> : vector<224x5xf32>
    %46 = tpu.matmul %43, %45, %cst_28 {dimension_numbers = #tpu.dot_dimension_numbers<[1], [0], [0], [1], [0, 0, 1, 1], [], []>} : vector<224x4xbf16>, vector<4x5xbf16>, vector<224x5xf32> -> vector<224x5xf32>
    %47 = arith.addf %41, %46 : vector<224x5xf32>
    %48 = vector.extract_strided_slice %34 {offsets = [0, 2, 0], sizes = [14, 16, 4], strides = [1, 1, 1]} : vector<14x22x4xbf16> to vector<14x16x4xbf16>
    %49 = vector.shape_cast %48 : vector<14x16x4xbf16> to vector<224x4xbf16>
    %c2 = arith.constant 2 : index
    %c0_29 = arith.constant 0 : index
    %c0_30 = arith.constant 0 : index
    %50 = vector.load %arg7[%c2, %c0_29, %c0_30] : memref<7x4x5xbf16, #tpu.memory_space<vmem>>, vector<1x4x5xbf16>
    %51 = vector.shape_cast %50 : vector<1x4x5xbf16> to vector<4x5xbf16>
    %cst_31 = arith.constant dense<0.000000e+00> : vector<224x5xf32>
    %52 = tpu.matmul %49, %51, %cst_31 {dimension_numbers = #tpu.dot_dimension_numbers<[1], [0], [0], [1], [0, 0, 1, 1], [], []>} : vector<224x4xbf16>, vector<4x5xbf16>, vector<224x5xf32> -> vector<224x5xf32>
    %53 = arith.addf %47, %52 : vector<224x5xf32>
    %54 = vector.extract_strided_slice %34 {offsets = [0, 3, 0], sizes = [14, 16, 4], strides = [1, 1, 1]} : vector<14x22x4xbf16> to vector<14x16x4xbf16>
    %55 = vector.shape_cast %54 : vector<14x16x4xbf16> to vector<224x4xbf16>
    %c3 = arith.constant 3 : index
    %c0_32 = arith.constant 0 : index
    %c0_33 = arith.constant 0 : index
    %56 = vector.load %arg7[%c3, %c0_32, %c0_33] : memref<7x4x5xbf16, #tpu.memory_space<vmem>>, vector<1x4x5xbf16>
    %57 = vector.shape_cast %56 : vector<1x4x5xbf16> to vector<4x5xbf16>
    %cst_34 = arith.constant dense<0.000000e+00> : vector<224x5xf32>
    %58 = tpu.matmul %55, %57, %cst_34 {dimension_numbers = #tpu.dot_dimension_numbers<[1], [0], [0], [1], [0, 0, 1, 1], [], []>} : vector<224x4xbf16>, vector<4x5xbf16>, vector<224x5xf32> -> vector<224x5xf32>
    %59 = arith.addf %53, %58 : vector<224x5xf32>
    %60 = vector.extract_strided_slice %34 {offsets = [0, 4, 0], sizes = [14, 16, 4], strides = [1, 1, 1]} : vector<14x22x4xbf16> to vector<14x16x4xbf16>
    %61 = vector.shape_cast %60 : vector<14x16x4xbf16> to vector<224x4xbf16>
    %c4 = arith.constant 4 : index
    %c0_35 = arith.constant 0 : index
    %c0_36 = arith.constant 0 : index
    %62 = vector.load %arg7[%c4, %c0_35, %c0_36] : memref<7x4x5xbf16, #tpu.memory_space<vmem>>, vector<1x4x5xbf16>
    %63 = vector.shape_cast %62 : vector<1x4x5xbf16> to vector<4x5xbf16>
    %cst_37 = arith.constant dense<0.000000e+00> : vector<224x5xf32>
    %64 = tpu.matmul %61, %63, %cst_37 {dimension_numbers = #tpu.dot_dimension_numbers<[1], [0], [0], [1], [0, 0, 1, 1], [], []>} : vector<224x4xbf16>, vector<4x5xbf16>, vector<224x5xf32> -> vector<224x5xf32>
    %65 = arith.addf %59, %64 : vector<224x5xf32>
    %66 = vector.extract_strided_slice %34 {offsets = [0, 5, 0], sizes = [14, 16, 4], strides = [1, 1, 1]} : vector<14x22x4xbf16> to vector<14x16x4xbf16>
    %67 = vector.shape_cast %66 : vector<14x16x4xbf16> to vector<224x4xbf16>
    %c5 = arith.constant 5 : index
    %c0_38 = arith.constant 0 : index
    %c0_39 = arith.constant 0 : index
    %68 = vector.load %arg7[%c5, %c0_38, %c0_39] : memref<7x4x5xbf16, #tpu.memory_space<vmem>>, vector<1x4x5xbf16>
    %69 = vector.shape_cast %68 : vector<1x4x5xbf16> to vector<4x5xbf16>
    %cst_40 = arith.constant dense<0.000000e+00> : vector<224x5xf32>
    %70 = tpu.matmul %67, %69, %cst_40 {dimension_numbers = #tpu.dot_dimension_numbers<[1], [0], [0], [1], [0, 0, 1, 1], [], []>} : vector<224x4xbf16>, vector<4x5xbf16>, vector<224x5xf32> -> vector<224x5xf32>
    %71 = arith.addf %65, %70 : vector<224x5xf32>
    %72 = vector.extract_strided_slice %34 {offsets = [0, 6, 0], sizes = [14, 16, 4], strides = [1, 1, 1]} : vector<14x22x4xbf16> to vector<14x16x4xbf16>
    %73 = vector.shape_cast %72 : vector<14x16x4xbf16> to vector<224x4xbf16>
    %c6 = arith.constant 6 : index
    %c0_41 = arith.constant 0 : index
    %c0_42 = arith.constant 0 : index
    %74 = vector.load %arg7[%c6, %c0_41, %c0_42] : memref<7x4x5xbf16, #tpu.memory_space<vmem>>, vector<1x4x5xbf16>
    %75 = vector.shape_cast %74 : vector<1x4x5xbf16> to vector<4x5xbf16>
    %cst_43 = arith.constant dense<0.000000e+00> : vector<224x5xf32>
    %76 = tpu.matmul %73, %75, %cst_43 {dimension_numbers = #tpu.dot_dimension_numbers<[1], [0], [0], [1], [0, 0, 1, 1], [], []>} : vector<224x4xbf16>, vector<4x5xbf16>, vector<224x5xf32> -> vector<224x5xf32>
    %77 = arith.addf %71, %76 : vector<224x5xf32>
    %c0_44 = arith.constant 0 : index
    %c0_45 = arith.constant 0 : index
    %78 = vector.load %arg8[%c0_44, %c0_45] : memref<1x5xf32, #tpu.memory_space<vmem>>, vector<1x5xf32>
    %79 = vector.broadcast %78 : vector<1x5xf32> to vector<224x5xf32>
    %80 = arith.addf %77, %79 : vector<224x5xf32>
    %cst_46 = arith.constant 0.000000e+00 : f32
    %81 = vector.broadcast %cst_46 : f32 to vector<224x5xf32>
    %82 = arith.maximumf %80, %81 : vector<224x5xf32>
    %83 = arith.truncf %82 : vector<224x5xf32> to vector<224x5xbf16>
    %84 = vector.shape_cast %83 : vector<224x5xbf16> to vector<14x16x5xbf16>
    %c3_i32_47 = arith.constant 3 : i32
    %85 = arith.subi %0, %c3_i32_47 : i32
    %86 = tpu.iota {dimensions = array<i32: 0>} : vector<14x16x1xi32>
    %87 = vector.broadcast %85 : i32 to vector<14x16x1xi32>
    %88 = arith.addi %87, %86 : vector<14x16x1xi32>
    %c0_i32_48 = arith.constant 0 : i32
    %89 = vector.broadcast %c0_i32_48 : i32 to vector<14x16x1xi32>
    %90 = arith.cmpi sge, %88, %89 : vector<14x16x1xi32>
    %c16_i32 = arith.constant 16 : i32
    %91 = vector.broadcast %c16_i32 : i32 to vector<14x16x1xi32>
    %92 = arith.cmpi slt, %88, %91 : vector<14x16x1xi32>
    %93 = arith.andi %90, %92 : vector<14x16x1xi1>
    %cst_49 = arith.constant 0.000000e+00 : bf16
    %94 = vector.broadcast %cst_49 : bf16 to vector<14x16x5xbf16>
    %95 = vector.shape_cast %93 : vector<14x16x1xi1> to vector<14x16x1xi1>
    %96 = vector.broadcast %95 : vector<14x16x1xi1> to vector<14x16x5xi1>
    %97 = arith.select %96, %84, %94 : vector<14x16x5xi1>, vector<14x16x5xbf16>
    %cst_50 = arith.constant 0.000000e+00 : f32
    %98 = vector.broadcast %cst_50 : f32 to vector<128x6xf32>
    %99 = vector.extract_strided_slice %97 {offsets = [0, 0, 0], sizes = [8, 16, 5], strides = [1, 1, 1]} : vector<14x16x5xbf16> to vector<8x16x5xbf16>
    %100 = vector.shape_cast %99 : vector<8x16x5xbf16> to vector<128x5xbf16>
    %c0_51 = arith.constant 0 : index
    %c0_52 = arith.constant 0 : index
    %c0_53 = arith.constant 0 : index
    %101 = vector.load %arg9[%c0_51, %c0_52, %c0_53] : memref<7x5x6xbf16, #tpu.memory_space<vmem>>, vector<1x5x6xbf16>
    %102 = vector.shape_cast %101 : vector<1x5x6xbf16> to vector<5x6xbf16>
    %cst_54 = arith.constant dense<0.000000e+00> : vector<128x6xf32>
    %103 = tpu.matmul %100, %102, %cst_54 {dimension_numbers = #tpu.dot_dimension_numbers<[1], [0], [0], [1], [0, 0, 1, 1], [], []>} : vector<128x5xbf16>, vector<5x6xbf16>, vector<128x6xf32> -> vector<128x6xf32>
    %104 = arith.addf %98, %103 : vector<128x6xf32>
    %105 = vector.extract_strided_slice %97 {offsets = [1, 0, 0], sizes = [8, 16, 5], strides = [1, 1, 1]} : vector<14x16x5xbf16> to vector<8x16x5xbf16>
    %106 = vector.shape_cast %105 : vector<8x16x5xbf16> to vector<128x5xbf16>
    %c1_55 = arith.constant 1 : index
    %c0_56 = arith.constant 0 : index
    %c0_57 = arith.constant 0 : index
    %107 = vector.load %arg9[%c1_55, %c0_56, %c0_57] : memref<7x5x6xbf16, #tpu.memory_space<vmem>>, vector<1x5x6xbf16>
    %108 = vector.shape_cast %107 : vector<1x5x6xbf16> to vector<5x6xbf16>
    %cst_58 = arith.constant dense<0.000000e+00> : vector<128x6xf32>
    %109 = tpu.matmul %106, %108, %cst_58 {dimension_numbers = #tpu.dot_dimension_numbers<[1], [0], [0], [1], [0, 0, 1, 1], [], []>} : vector<128x5xbf16>, vector<5x6xbf16>, vector<128x6xf32> -> vector<128x6xf32>
    %110 = arith.addf %104, %109 : vector<128x6xf32>
    %111 = vector.extract_strided_slice %97 {offsets = [2, 0, 0], sizes = [8, 16, 5], strides = [1, 1, 1]} : vector<14x16x5xbf16> to vector<8x16x5xbf16>
    %112 = vector.shape_cast %111 : vector<8x16x5xbf16> to vector<128x5xbf16>
    %c2_59 = arith.constant 2 : index
    %c0_60 = arith.constant 0 : index
    %c0_61 = arith.constant 0 : index
    %113 = vector.load %arg9[%c2_59, %c0_60, %c0_61] : memref<7x5x6xbf16, #tpu.memory_space<vmem>>, vector<1x5x6xbf16>
    %114 = vector.shape_cast %113 : vector<1x5x6xbf16> to vector<5x6xbf16>
    %cst_62 = arith.constant dense<0.000000e+00> : vector<128x6xf32>
    %115 = tpu.matmul %112, %114, %cst_62 {dimension_numbers = #tpu.dot_dimension_numbers<[1], [0], [0], [1], [0, 0, 1, 1], [], []>} : vector<128x5xbf16>, vector<5x6xbf16>, vector<128x6xf32> -> vector<128x6xf32>
    %116 = arith.addf %110, %115 : vector<128x6xf32>
    %117 = vector.extract_strided_slice %97 {offsets = [3, 0, 0], sizes = [8, 16, 5], strides = [1, 1, 1]} : vector<14x16x5xbf16> to vector<8x16x5xbf16>
    %118 = vector.shape_cast %117 : vector<8x16x5xbf16> to vector<128x5xbf16>
    %c3_63 = arith.constant 3 : index
    %c0_64 = arith.constant 0 : index
    %c0_65 = arith.constant 0 : index
    %119 = vector.load %arg9[%c3_63, %c0_64, %c0_65] : memref<7x5x6xbf16, #tpu.memory_space<vmem>>, vector<1x5x6xbf16>
    %120 = vector.shape_cast %119 : vector<1x5x6xbf16> to vector<5x6xbf16>
    %cst_66 = arith.constant dense<0.000000e+00> : vector<128x6xf32>
    %121 = tpu.matmul %118, %120, %cst_66 {dimension_numbers = #tpu.dot_dimension_numbers<[1], [0], [0], [1], [0, 0, 1, 1], [], []>} : vector<128x5xbf16>, vector<5x6xbf16>, vector<128x6xf32> -> vector<128x6xf32>
    %122 = arith.addf %116, %121 : vector<128x6xf32>
    %123 = vector.extract_strided_slice %97 {offsets = [4, 0, 0], sizes = [8, 16, 5], strides = [1, 1, 1]} : vector<14x16x5xbf16> to vector<8x16x5xbf16>
    %124 = vector.shape_cast %123 : vector<8x16x5xbf16> to vector<128x5xbf16>
    %c4_67 = arith.constant 4 : index
    %c0_68 = arith.constant 0 : index
    %c0_69 = arith.constant 0 : index
    %125 = vector.load %arg9[%c4_67, %c0_68, %c0_69] : memref<7x5x6xbf16, #tpu.memory_space<vmem>>, vector<1x5x6xbf16>
    %126 = vector.shape_cast %125 : vector<1x5x6xbf16> to vector<5x6xbf16>
    %cst_70 = arith.constant dense<0.000000e+00> : vector<128x6xf32>
    %127 = tpu.matmul %124, %126, %cst_70 {dimension_numbers = #tpu.dot_dimension_numbers<[1], [0], [0], [1], [0, 0, 1, 1], [], []>} : vector<128x5xbf16>, vector<5x6xbf16>, vector<128x6xf32> -> vector<128x6xf32>
    %128 = arith.addf %122, %127 : vector<128x6xf32>
    %129 = vector.extract_strided_slice %97 {offsets = [5, 0, 0], sizes = [8, 16, 5], strides = [1, 1, 1]} : vector<14x16x5xbf16> to vector<8x16x5xbf16>
    %130 = vector.shape_cast %129 : vector<8x16x5xbf16> to vector<128x5xbf16>
    %c5_71 = arith.constant 5 : index
    %c0_72 = arith.constant 0 : index
    %c0_73 = arith.constant 0 : index
    %131 = vector.load %arg9[%c5_71, %c0_72, %c0_73] : memref<7x5x6xbf16, #tpu.memory_space<vmem>>, vector<1x5x6xbf16>
    %132 = vector.shape_cast %131 : vector<1x5x6xbf16> to vector<5x6xbf16>
    %cst_74 = arith.constant dense<0.000000e+00> : vector<128x6xf32>
    %133 = tpu.matmul %130, %132, %cst_74 {dimension_numbers = #tpu.dot_dimension_numbers<[1], [0], [0], [1], [0, 0, 1, 1], [], []>} : vector<128x5xbf16>, vector<5x6xbf16>, vector<128x6xf32> -> vector<128x6xf32>
    %134 = arith.addf %128, %133 : vector<128x6xf32>
    %135 = vector.extract_strided_slice %97 {offsets = [6, 0, 0], sizes = [8, 16, 5], strides = [1, 1, 1]} : vector<14x16x5xbf16> to vector<8x16x5xbf16>
    %136 = vector.shape_cast %135 : vector<8x16x5xbf16> to vector<128x5xbf16>
    %c6_75 = arith.constant 6 : index
    %c0_76 = arith.constant 0 : index
    %c0_77 = arith.constant 0 : index
    %137 = vector.load %arg9[%c6_75, %c0_76, %c0_77] : memref<7x5x6xbf16, #tpu.memory_space<vmem>>, vector<1x5x6xbf16>
    %138 = vector.shape_cast %137 : vector<1x5x6xbf16> to vector<5x6xbf16>
    %cst_78 = arith.constant dense<0.000000e+00> : vector<128x6xf32>
    %139 = tpu.matmul %136, %138, %cst_78 {dimension_numbers = #tpu.dot_dimension_numbers<[1], [0], [0], [1], [0, 0, 1, 1], [], []>} : vector<128x5xbf16>, vector<5x6xbf16>, vector<128x6xf32> -> vector<128x6xf32>
    %140 = arith.addf %134, %139 : vector<128x6xf32>
    %c0_79 = arith.constant 0 : index
    %c0_80 = arith.constant 0 : index
    %141 = vector.load %arg10[%c0_79, %c0_80] : memref<1x6xf32, #tpu.memory_space<vmem>>, vector<1x6xf32>
    %142 = vector.broadcast %141 : vector<1x6xf32> to vector<128x6xf32>
    %143 = arith.addf %140, %142 : vector<128x6xf32>
    %cst_81 = arith.constant 0.000000e+00 : f32
    %144 = vector.broadcast %cst_81 : f32 to vector<128x6xf32>
    %145 = arith.maximumf %143, %144 : vector<128x6xf32>
    %146 = arith.truncf %22 : vector<128x6xf32> to vector<128x6xbf16>
    %c0_82 = arith.constant 0 : index
    %c0_83 = arith.constant 0 : index
    %147 = vector.load %arg11[%c0_82, %c0_83] : memref<6x4xbf16, #tpu.memory_space<vmem>>, vector<6x4xbf16>
    %cst_84 = arith.constant dense<0.000000e+00> : vector<128x4xf32>
    %148 = tpu.matmul %146, %147, %cst_84 {dimension_numbers = #tpu.dot_dimension_numbers<[1], [0], [0], [1], [0, 0, 1, 1], [], []>} : vector<128x6xbf16>, vector<6x4xbf16>, vector<128x4xf32> -> vector<128x4xf32>
    %149 = arith.truncf %145 : vector<128x6xf32> to vector<128x6xbf16>
    %c0_85 = arith.constant 0 : index
    %c0_86 = arith.constant 0 : index
    %150 = vector.load %arg12[%c0_85, %c0_86] : memref<6x4xbf16, #tpu.memory_space<vmem>>, vector<6x4xbf16>
    %cst_87 = arith.constant dense<0.000000e+00> : vector<128x4xf32>
    %151 = tpu.matmul %149, %150, %cst_87 {dimension_numbers = #tpu.dot_dimension_numbers<[1], [0], [0], [1], [0, 0, 1, 1], [], []>} : vector<128x6xbf16>, vector<6x4xbf16>, vector<128x4xf32> -> vector<128x4xf32>
    %152 = arith.addf %148, %151 : vector<128x4xf32>
    %c0_88 = arith.constant 0 : index
    %c0_89 = arith.constant 0 : index
    %153 = vector.load %arg13[%c0_88, %c0_89] : memref<1x4xf32, #tpu.memory_space<vmem>>, vector<1x4xf32>
    %154 = vector.broadcast %153 : vector<1x4xf32> to vector<128x4xf32>
    %155 = arith.addf %152, %154 : vector<128x4xf32>
    %156 = arith.extf %15 : vector<128x4xbf16> to vector<128x4xf32>
    %157 = arith.addf %155, %156 : vector<128x4xf32>
    %cst_90 = arith.constant 0.000000e+00 : f32
    %158 = vector.broadcast %cst_90 : f32 to vector<128x4xf32>
    %159 = arith.maximumf %157, %158 : vector<128x4xf32>
    %160 = vector.shape_cast %159 : vector<128x4xf32> to vector<8x16x4xf32>
    %161 = arith.truncf %160 : vector<8x16x4xf32> to vector<8x16x4xbf16>
    %c0_91 = arith.constant 0 : index
    %c0_92 = arith.constant 0 : index
    %c0_93 = arith.constant 0 : index
    %c0_94 = arith.constant 0 : index
    %162 = vector.load %arg14[%c0_91, %c0_92, %c0_93, %c0_94] : memref<1x8x16x4xbf16, #tpu.memory_space<vmem>>, vector<1x8x16x4xbf16>
    %163 = vector.shape_cast %162 : vector<1x8x16x4xbf16> to vector<8x16x4xbf16>
    %164 = vector.shape_cast %161 : vector<8x16x4xbf16> to vector<1x8x16x4xbf16>
    tpu.vector_store %arg14[%c0_91, %c0_92, %c0_93, %c0_94], %164 {strides = array<i32>} : memref<1x8x16x4xbf16, #tpu.memory_space<vmem>>, vector<1x8x16x4xbf16>,
    return
  }
  func.func @transform_0(%arg0: i32, %arg1: i32) -> (i32, i32, i32, i32) {
    %c0_i32 = arith.constant 0 : i32
    %c0_i32_0 = arith.constant 0 : i32
    %c0_i32_1 = arith.constant 0 : i32
    %c0_i32_2 = arith.constant 0 : i32
    return %arg0, %c0_i32, %c0_i32_0, %c0_i32_1 : i32, i32, i32, i32
  }
  func.func @transform_1(%arg0: i32, %arg1: i32) -> (i32, i32) {
    %c0_i32 = arith.constant 0 : i32
    %c0_i32_0 = arith.constant 0 : i32
    %c0_i32_1 = arith.constant 0 : i32
    return %c0_i32, %c0_i32_0 : i32, i32
  }
  func.func @transform_2(%arg0: i32, %arg1: i32) -> (i32, i32) {
    %c0_i32 = arith.constant 0 : i32
    %c0_i32_0 = arith.constant 0 : i32
    %c0_i32_1 = arith.constant 0 : i32
    return %c0_i32, %c0_i32_0 : i32, i32
  }
  func.func @transform_3(%arg0: i32, %arg1: i32) -> (i32, i32) {
    %c0_i32 = arith.constant 0 : i32
    %c0_i32_0 = arith.constant 0 : i32
    %c0_i32_1 = arith.constant 0 : i32
    return %c0_i32, %c0_i32_0 : i32, i32
  }
  func.func @transform_4(%arg0: i32, %arg1: i32) -> (i32, i32) {
    %c0_i32 = arith.constant 0 : i32
    %c0_i32_0 = arith.constant 0 : i32
    %c0_i32_1 = arith.constant 0 : i32
    return %c0_i32, %c0_i32_0 : i32, i32
  }
  func.func @transform_5(%arg0: i32, %arg1: i32) -> (i32, i32, i32) {
    %c0_i32 = arith.constant 0 : i32
    %c0_i32_0 = arith.constant 0 : i32
    %c0_i32_1 = arith.constant 0 : i32
    %c0_i32_2 = arith.constant 0 : i32
    return %c0_i32, %c0_i32_0, %c0_i32_1 : i32, i32, i32
  }
  func.func @transform_6(%arg0: i32, %arg1: i32) -> (i32, i32) {
    %c0_i32 = arith.constant 0 : i32
    %c0_i32_0 = arith.constant 0 : i32
    %c0_i32_1 = arith.constant 0 : i32
    return %c0_i32, %c0_i32_0 : i32, i32
  }
  func.func @transform_7(%arg0: i32, %arg1: i32) -> (i32, i32, i32) {
    %c0_i32 = arith.constant 0 : i32
    %c0_i32_0 = arith.constant 0 : i32
    %c0_i32_1 = arith.constant 0 : i32
    %c0_i32_2 = arith.constant 0 : i32
    return %c0_i32, %c0_i32_0, %c0_i32_1 : i32, i32, i32
  }
  func.func @transform_8(%arg0: i32, %arg1: i32) -> (i32, i32) {
    %c0_i32 = arith.constant 0 : i32
    %c0_i32_0 = arith.constant 0 : i32
    %c0_i32_1 = arith.constant 0 : i32
    return %c0_i32, %c0_i32_0 : i32, i32
  }
  func.func @transform_9(%arg0: i32, %arg1: i32) -> (i32, i32) {
    %c0_i32 = arith.constant 0 : i32
    %c0_i32_0 = arith.constant 0 : i32
    %c0_i32_1 = arith.constant 0 : i32
    return %c0_i32, %c0_i32_0 : i32, i32
  }
  func.func @transform_10(%arg0: i32, %arg1: i32) -> (i32, i32) {
    %c0_i32 = arith.constant 0 : i32
    %c0_i32_0 = arith.constant 0 : i32
    %c0_i32_1 = arith.constant 0 : i32
    return %c0_i32, %c0_i32_0 : i32, i32
  }
  func.func @transform_11(%arg0: i32, %arg1: i32) -> (i32, i32) {
    %c0_i32 = arith.constant 0 : i32
    %c0_i32_0 = arith.constant 0 : i32
    %c0_i32_1 = arith.constant 0 : i32
    return %c0_i32, %c0_i32_0 : i32, i32
  }
  func.func @transform_12(%arg0: i32, %arg1: i32) -> (i32, i32, i32, i32) {
    %c0_i32 = arith.constant 0 : i32
    %c0_i32_0 = arith.constant 0 : i32
    %c0_i32_1 = arith.constant 0 : i32
    return %arg0, %arg1, %c0_i32, %c0_i32_0 : i32, i32, i32, i32
  }
}

</mosaic_0001>

<bundles_post_ra>
// kernel: tpu_custom_call.1
= control target key start
LH: loop header
LB: loop body
LE: loop exit
PB: predicated region body
PF: predicated region fallthrough
CT: control target
= control target key end

     0   :  { %s4234_s21 = smov 0   ;;  %s4236_s22 = smov 0   ;;  %s5735_s0 = inlined_call_operand.vmem [shape: bf16[2,16,16,4], index: 0, kind: input, shape index: {}]   ;;  %s5736_s1 = inlined_call_operand.vmem [shape: bf16[4,6], index: 1, kind: input, shape index: {}]   ;;  %s5737_s2 = inlined_call_operand.vmem [shape: f32[1,6], index: 2, kind: input, shape index: {}]   ;;  %s5738_s3 = inlined_call_operand.vmem [shape: bf16[4,4], index: 3, kind: input, shape index: {}]   ;;  %s5739_s4 = inlined_call_operand.vmem [shape: f32[1,4], index: 4, kind: input, shape index: {}]   ;;  %s5740_s5 = inlined_call_operand.vmem [shape: bf16[7,4,5], index: 5, kind: input, shape index: {}]   ;;  %s5741_s6 = inlined_call_operand.vmem [shape: f32[1,5], index: 6, kind: input, shape index: {}]   ;;  %s5742_s7 = inlined_call_operand.vmem [shape: bf16[7,5,6], index: 7, kind: input, shape index: {}]   ;;  %s5743_s8 = inlined_call_operand.vmem [shape: f32[1,6], index: 8, kind: input, shape index: {}]   ;;  %s5744_s9 = inlined_call_operand.vmem [shape: bf16[6,4], index: 9, kind: input, shape index: {}]   ;;  %s5745_s10 = inlined_call_operand.vmem [shape: bf16[6,4], index: 10, kind: input, shape index: {}]   ;;  %s5746_s11 = inlined_call_operand.vmem [shape: f32[1,4], index: 11, kind: input, shape index: {}]   ;;  %s5747_s12 = inlined_call_operand.vmem [shape: bf16[2,16,16,4], index: 12, kind: output, shape index: {}]  }
   0x1   :  { %5793 = sst [smem:[#allocation49_spill]] %s5738_s3  ;;  %s4238_s23 = smov 0  }
   0x2   :  { %s4240_s24 = smov 0   ;;  %s4242_s25 = smov 0  }
   0x3 LB: > { %5794 = sst [smem:[#allocation2_spill]] %s4162_s24  ;;  %s31_s26 = sadd.s32 1, %s4158_s23  ;;  %s4166_s25 = sphi %s4242_s25, %s22_s25   ;;  %s4162_s24 = sphi %s4240_s24, %s5914_s24   ;;  %s4158_s23 = sphi %s4238_s23, %s5916_s23   ;;  %s4154_s22 = sphi %s4236_s22, %s5912_s22   ;;  %s4150_s21 = sphi %s4234_s21, %s5915_s21  }
   0x4   : > { %s34_s27 = sadd.s32 1, %s4162_s24  ;;  %p32_p0 = scmp.ge.s32.totalorder %s31_s26, 2 }
   0x5   : > { %p3781_p1 = scmp.ge.s32.totalorder %s4166_s25, 1  ;;  %p376_p2 = scmp.lt.s32.totalorder %s4166_s25, 5 }
   0x6   : > { %s5918_s26 = smov (%p32_p0, %s31_s26), 0  ;;  %s5920_s27 = smov (!%p32_p0, %s34_s27), %s4162_s24 }
   0x7   : > { %5795 = sst [smem:[#allocation3_spill]] %s5918_s26  ;;  %p377_p3 = pnand %p3781_p1, %p376_p2 }
   0x8   : > { %p36_p4 = scmp.ge.s32.totalorder %s5920_s27, 2 }
   0x9   : > { %380 = sbr.rel (%p377_p3) target bundleno = 1167 (0x48f), region = 68 }
   0xa   : > { %s5922_s27 = smov (%p36_p4, %s5920_s27), 0 }
   0xb   : > { %5796 = sst [smem:[#allocation4_spill]] %s5922_s27 }
   0xe   : > { %vm554_vm0 = vcmask 1041408   ;;  %s5797_s3 = sld [smem:[#allocation49_spill]]  ;;  %p423_p5 = scmp.lt.s32.totalorder %s4154_s22, 1  ;;  %vm529_vm1 = vcmask 31744   ;;  %v484_v6 = vld [vmem:[%s5736_s1] sm:$0x3] }
   0xf   : > { %s3784_s30 = sshll.u32 %s4150_s21, 3  ;;  %v556_v8 = vsel %vm554_vm0, %v484_v6, 0  ;;  %v3874_v10 = vld [vmem:[%s5740_s5 + $0x2] sm:$0x3]  ;;  %v1041_v13 = vld [vmem:[%s5740_s5] sm:$0x3] }
  0x10   : > { %s5924_s22 = smov (!%p423_p5, %s4154_s22), 1  ;;  %p431_p6 = scmp.lt.s32.totalorder %s3784_s30, 15  ;;  %4077 = vmatpush.bf16.msra.mxu2 %v556_v8  ;;  %v1256_v11 = vsel %vm554_vm0, %v3874_v10, 0  ;;  %565 = vmatpush.bf16.msra.mxu0 %v556_v8  ;;  %v1366_v15 = vsel %vm554_vm0, %v1041_v13, 0  ;;  %v3903_v22 = vld [vmem:[%s5740_s5 + $0x4] sm:$0x3] }
  0x11   : > { %s4271_s13 = sadd.s32 4294967293, %s3784_s30  ;;  %s4058_s14 = sshll.u32 %s5924_s22, 7  ;;  %v1563_v23 = vsel %vm554_vm0, %v3903_v22, 0  ;;  %v3918_v24 = vld [vmem:[%s5740_s5 + $0x6] sm:$0x3]  ;;  %vm1475_vm4 = vcmask 1046528  }
  0x12   : > { %s3786_s15 = sshll.u32 %s5924_s22, 5  ;;  %s427_s18 = scalar_lea.vmem %s5735_s0, %s4058_s14  ;;  %v4338_v25 = vld [vmem:[%s5739_s4] ss:$0 sm:$0xff]  ;;  %v1844_v26 = vsel %vm554_vm0, %v3918_v24, 0  ;;  %v3933_v32 = vld [vmem:[%s5740_s5 + $0x8] sm:$0x3] }
  0x13   : > { %p442_p7 = scmp.gt.s32.totalorder %s4271_s13, 0  ;;  %s472_s26 = sadd.s32 8, %s3784_s30  ;;  %v3948_v33 = vld [vmem:[%s5740_s5 + $0xa] sm:$0x3]  ;;  %v2041_v34 = vsel %vm554_vm0, %v3933_v32, 0  ;;  %vm2403_vm7 = vcmask 1044480  }
  0x14   : > { %v623_v0 = vld [vmem:[%s5797_s3] sm:$0x3]  ;;  %s432_s19 = scalar_select %p431_p6, %s3784_s30, 15  ;;  %1265 = vmatpush.bf16.msrb.mxu2 %v1256_v11  ;;  %1572 = vmatpush.bf16.msrb.mxu0 %v1563_v23  ;;  %v2294_v35 = vsel %vm554_vm0, %v3948_v33, 0  ;;  %vm1011_vm2 = vsmask.f32 1280 }
  0x15   : > { %v677_v1 = vsel %vm554_vm0, %v623_v0, 0  ;;  %s443_s20 = scalar_select %p442_p7, %s4271_s13, 0  ;;  %vm4355_vm3 = vmand %vm554_vm0, %vm1011_vm2  ;;  %vm1042_vm5 = vsmask.f32 7424  ;;  %vm1672_vm6 = vsmask.f32 6400 }
  0x16   : > { %686 = vmatpush.bf16.msra.mxu1 %v677_v1  ;;  %4078 = vmatpush.bf16.msra.mxu3 %v677_v1  ;;  %s3785_s28 = sshll.u32 %s432_s19, 1  ;;  %p473_p8 = scmp.lt.s32.totalorder %s472_s26, 13  ;;  %vm1953_vm8 = vcmask 1045504   ;;  %vm2150_vm9 = vsmask.f32 5376  ;;  %vm2868_vm10 = vcmask 1042432  }
  0x17   : > { %s4278_s29 = sadd.s32 %s3786_s15, %s3785_s28  ;;  %s4059_s3 = sshll.u32 %s443_s20, 3  ;;  %vm2843_vm2 = vcmask 39936  }
  0x18   : > { %s446_s27 = scalar_lea.vmem %s427_s18, %s4059_s3  ;;  %s5926_s26 = smov (!%p473_p8, %s472_s26), 13 }
  0x19   : > { %v4060_v2 = vld [vmem:[%s446_s27] sm:$0xff]  ;;  %s4073_s22 = sshll.u32 %s5926_s26, 3  ;;  %v4061_v3 = vld [vmem:[%s446_s27 + $0x8] sm:$0xff]  ;;  %v4062_v4 = vld [vmem:[%s446_s27 + $0x10] sm:$0xff]  ;;  %s4064_s14 = sshll.u32 %s4150_s21, 6 }
  0x1a   : > { %3860 = vmatmul.msk.bf16.vlgmr.msra.gmra.mxu1 %vm529_vm1, %v4060_v2  ;;  %s4281_s24 = scalar_lea.vmem %s427_s18, %s4073_s22  ;;  %s4286_s15 = scalar_lea.vmem %s427_s18, %s4064_s14  ;;  %1375 = vmatpush.bf16.msrb.mxu3 %v1366_v15 }
  0x1b   : > { %v4065_v5 = vld [vmem:[%s4286_s15] sm:$0xff]  ;;  %v4072_v7 = vld [vmem:[%s4286_s15 + $0x38] sm:$0xff]  ;;  %v4066_v12 = vld [vmem:[%s4286_s15 + $0x8] sm:$0xff]  ;;  %1853 = vmatpush.bf16.msrb.mxu1 %v1844_v26  ;;  %s3787_s17 = sshll.u32 %s4278_s29, 2 }
  0x1c   : > { %v4069_v9 = vld [vmem:[%s4286_s15 + $0x20] sm:$0xff]  ;;  %3870 = vmatmul.msk.bf16.vlgmr.msra.gmra.mxu3 %vm529_vm1, %v4072_v7  ;;  %3828 = vmatmul.msk.bf16.vlgmr.msra.gmra.mxu0 %vm529_vm1, %v4065_v5  ;;  %v4070_v16 = vld [vmem:[%s4286_s15 + $0x28] sm:$0xff]  ;;  %v4067_v17 = vld [vmem:[%s4286_s15 + $0x10] sm:$0xff]  ;;  %s5664_s20 = scalar_lea.vmem %s5747_s12, %s3787_s17 }
  0x1d   : > { %3832 = vmatmul.msk.bf16.vlgmr.msra.gmra.mxu2 %vm529_vm1, %v4069_v9  ;;  %v4074_v14 = vld [vmem:[%s4281_s24] sm:$0xff]  ;;  %v4075_v18 = vld [vmem:[%s4281_s24 + $0x8] sm:$0xff]  ;;  %v4071_v19 = vld [vmem:[%s4286_s15 + $0x30] sm:$0xff] }
  0x1e   : > { %v4068_v20 = vld [vmem:[%s4286_s15 + $0x18] sm:$0xff]  ;;  %v4076_v21 = vld [vmem:[%s4281_s24 + $0x10] sm:$0xff]  ;;  %2050 = vmatpush.bf16.msra.mxu2 %v2041_v34  ;;  %2303 = vmatpush.bf16.msra.mxu3 %v2294_v35 }
  0x2a   : > { %3861 = vmatmul.msk.bf16.gmra.mxu1 %vm529_vm1, %v4061_v3 }
  0x2c   : > { %3871 = vmatmul.msk.bf16.gmra.mxu3 %vm529_vm1, %v4074_v14  ;;  %3829 = vmatmul.msk.bf16.gmra.mxu0 %vm529_vm1, %v4066_v12 }
  0x2d   : > { %3833 = vmatmul.msk.bf16.gmra.mxu2 %vm529_vm1, %v4070_v16 }
  0x3a   : > { %3862 = vmatmul.msk.bf16.gmra.mxu1 %vm529_vm1, %v4062_v4 }
  0x3c   : > { %3872 = vmatmul.msk.bf16.gmra.mxu3 %vm529_vm1, %v4075_v18  ;;  %3830 = vmatmul.msk.bf16.gmra.mxu0 %vm529_vm1, %v4067_v17 }
  0x3d   : > { %3834 = vmatmul.msk.bf16.gmra.mxu2 %vm529_vm1, %v4071_v19 }
  0x4a   : > { %3863 = vmatmul.msk.bf16.gmra.mxu1 %vm529_vm1, %v4065_v5 }
  0x4c   : > { %3873 = vmatmul.msk.bf16.gmra.mxu3 %vm529_vm1, %v4076_v21  ;;  %3831 = vmatmul.msk.bf16.gmra.mxu0 %vm529_vm1, %v4068_v20 }
  0x4d   : > { %3835 = vmatmul.msk.bf16.gmra.mxu2 %vm529_vm1, %v4072_v7 }
  0x5a   : > { %3864 = vmatmul.msk.bf16.gmra.mxu1 %vm529_vm1, %v4066_v12 }
  0x6a   : > { %3865 = vmatmul.msk.bf16.gmra.mxu1 %vm529_vm1, %v4067_v17 }
  0x7a   : > { %3866 = vmatmul.msk.bf16.gmra.mxu1 %vm529_vm1, %v4068_v20 }
  0x8a   : > { %3867 = vmatmul.msk.bf16.gmra.mxu1 %vm529_vm1, %v4069_v9 }
  0x97   : > { %v688_v27 = vpop.f32.mrf.mxu1 }
  0x98   : > { %v689_v28 = vadd.f32 %v4338_v25, %v688_v27 }
  0x9a   : > { %3868 = vmatmul.msk.bf16.gmra.mxu1 %vm529_vm1, %v4070_v16  ;;  %v758_v29 = vmax.f32 %v689_v28, 0.0 }
  0x9c   : > { %v786_v36 = vpack.c.bf16 %v758_v29, %v758_v29 }
  0x9e   : > { %v842_v39 = vunpack.c.l.b16 %v786_v36 }
  0x9f   : > { %v690_v30 = vpop.f32.mrf.mxu1 }
  0xa0   : > { %v691_v31 = vadd.f32 %v4338_v25, %v690_v30 }
  0xa2   : > { %v759_v37 = vmax.f32 %v691_v31, 0.0 }
  0xa4   : > { %v787_v38 = vpack.c.bf16 %v759_v37, %v759_v37 }
  0xa6   : > { %v843_v40 = vunpack.c.l.b16 %v787_v38 }
  0xa7   : > { %v693_v41 = vpop.f32.mrf.mxu1 }
  0xa8   : > { %v870_v42 = vpack.c.b16 %v843_v40, %v842_v39  ;;  %v694_v43 = vadd.f32 %v4338_v25, %v693_v41 }
  0xaa   : > { %v885_v44 = vshrl.u32 %v870_v42, 16  ;;  %v888_v45 = vshll.u32 %v870_v42, 16  ;;  %v760_v46 = vmax.f32 %v694_v43, 0.0  ;;  %3869 = vmatmul.msk.bf16.gmra.mxu1 %vm529_vm1, %v4071_v19 }
  0xac   : > { %v887_v47 = vrot.slane %v885_v44, 6  ;;  %v890_v48 = vrot.slane %v888_v45, 7  ;;  %v788_v49 = vpack.c.bf16 %v760_v46, %v760_v46 }
  0xae   : > { %v891_v51 = vor.u32 %v890_v48, %v887_v47  ;;  %v844_v54 = vunpack.c.l.b16 %v788_v49 }
  0xaf   : > { %v695_v52 = vpop.f32.mrf.mxu1 }
  0xb0   : > { %v1027_v53 = vsel %vm4355_vm3, %v891_v51, 0  ;;  %v696_v55 = vadd.f32 %v4338_v25, %v695_v52  ;;  %v1013_v56 = vsel %vm4355_vm3, 0, %v891_v51 }
  0xb1   : > { %3889 = vmatmul.msk.bf16.vlgmr.msrb.gmra.mxu3 %vm529_vm1, %v1013_v56  ;;  %v1476_v57 = vrot.slane %v1013_v56, 1  ;;  %v1477_v58 = vrot.slane %v1027_v53, 1  ;;  %v1044_v59 = vshrl.u32 %v1013_v56, 16  ;;  %v1046_v60 = vshll.u32 %v1013_v56, 16 }
  0xb2   : > { %v761_v61 = vmax.f32 %v696_v55, 0.0  ;;  %v1051_v62 = vshll.u32 %v1027_v53, 16  ;;  %v1676_v63 = vshrl.u32 %v1027_v53, 16  ;;  %v2404_v0 = vrot.slane %v1013_v56, 3 }
  0xb3   : > { %v1478_v1 = vsel %vm1475_vm4, %v1476_v57, %v1477_v58  ;;  %v1048_v2 = vrot.slane %v1046_v60, 1  ;;  %v1673_v3 = vrot.slane %v1044_v59, 1  ;;  %v1674_v4 = vrot.slane %v1046_v60, 2 }
  0xb4   : > { %v789_v5 = vpack.c.bf16 %v761_v61, %v761_v61  ;;  %3904 = vmatmul.msk.bf16.vlgmr.msrb.gmra.mxu0 %vm529_vm1, %v1478_v1  ;;  %v1053_v6 = vrot.slane %v1051_v62, 1  ;;  %v1678_v7 = vrot.slane %v1676_v63, 1  ;;  %v1679_v8 = vrot.slane %v1051_v62, 2 }
  0xb5   : > { %v1049_v9 = vor.u32 %v1048_v2, %v1044_v59  ;;  %v1675_v10 = vor.u32 %v1674_v4, %v1673_v3  ;;  %v2154_v11 = vrot.slane %v1676_v63, 2  ;;  %v2151_v12 = vrot.slane %v1044_v59, 2 }
  0xb6   : > { %v845_v13 = vunpack.c.l.b16 %v789_v5  ;;  %v1680_v14 = vor.u32 %v1679_v8, %v1678_v7  ;;  %v2152_v15 = vrot.slane %v1046_v60, 3  ;;  %v2155_v16 = vrot.slane %v1051_v62, 3 }
  0xb7   : > { %v698_v17 = vpop.f32.mrf.mxu1  ;;  %v1054_v18 = vsel %vm1042_vm5, %v1049_v9, %v1053_v6  ;;  %v2405_v19 = vrot.slane %v1027_v53, 3  ;;  %v1954_v20 = vrot.slane %v1013_v56, 2  ;;  %v1955_v21 = vrot.slane %v1027_v53, 2 }
  0xb8   : > { %v871_v22 = vpack.c.b16 %v845_v13, %v844_v54  ;;  %v699_v23 = vadd.f32 %v4338_v25, %v698_v17  ;;  %3875 = vmatmul.msk.bf16.vlgmr.msrb.gmra.mxu2 %vm529_vm1, %v1054_v18  ;;  %v2153_v24 = vor.u32 %v2152_v15, %v2151_v12  ;;  %v1681_v26 = vsel %vm1672_vm6, %v1675_v10, %v1680_v14 }
  0xb9   : > { %v2156_v27 = vor.u32 %v2155_v16, %v2154_v11  ;;  %v4372_v28 = vsel %vm2403_vm7, %v2404_v0, %v2405_v19  ;;  %v4375_v29 = vsel %vm1953_vm8, %v1954_v20, %v1955_v21 }
  0xba   : > { %v893_v30 = vshrl.u32 %v871_v22, 16  ;;  %v896_v31 = vshll.u32 %v871_v22, 16  ;;  %v762_v32 = vmax.f32 %v699_v23, 0.0  ;;  %3919 = vmatmul.msk.bf16.vlgmr.msrb.gmra.mxu1 %vm529_vm1, %v1681_v26 }
  0xbb   : > { %v4379_v33 = vsel %vm2150_vm9, %v2153_v24, %v2156_v27 }
  0xbc   : > { %v895_v34 = vrot.slane %v893_v30, 6  ;;  %v898_v35 = vrot.slane %v896_v31, 7  ;;  %v790_v36 = vpack.c.bf16 %v762_v32, %v762_v32  ;;  %v3963_v32 = vld [vmem:[%s5740_s5 + $0xc] sm:$0x3] }
  0xbe   : > { %v899_v37 = vor.u32 %v898_v35, %v895_v34  ;;  %v846_v40 = vunpack.c.l.b16 %v790_v36 }
  0xbf   : > { %v700_v38 = vpop.f32.mrf.mxu1 }
  0xc0   : > { %v1028_v39 = vsel %vm4355_vm3, %v899_v37, 0  ;;  %v701_v41 = vadd.f32 %v4338_v25, %v700_v38  ;;  %v1014_v42 = vsel %vm4355_vm3, 0, %v899_v37 }
  0xc1   : > { %3890 = vmatmul.msk.bf16.gmra.mxu3 %vm529_vm1, %v1014_v42  ;;  %v1479_v43 = vrot.slane %v1014_v42, 1  ;;  %v1480_v44 = vrot.slane %v1028_v39, 1  ;;  %v1056_v45 = vshrl.u32 %v1014_v42, 16  ;;  %v1058_v46 = vshll.u32 %v1014_v42, 16 }
  0xc2   : > { %v763_v47 = vmax.f32 %v701_v41, 0.0  ;;  %v1063_v48 = vshll.u32 %v1028_v39, 16  ;;  %v1685_v49 = vshrl.u32 %v1028_v39, 16  ;;  %v2407_v51 = vrot.slane %v1014_v42, 3 }
  0xc3   : > { %v1481_v52 = vsel %vm1475_vm4, %v1479_v43, %v1480_v44  ;;  %v1060_v53 = vrot.slane %v1058_v46, 1  ;;  %v1682_v54 = vrot.slane %v1056_v45, 1  ;;  %v1683_v55 = vrot.slane %v1058_v46, 2 }
  0xc4   : > { %v791_v56 = vpack.c.bf16 %v763_v47, %v763_v47  ;;  %3905 = vmatmul.msk.bf16.gmra.mxu0 %vm529_vm1, %v1481_v52  ;;  %v1065_v57 = vrot.slane %v1063_v48, 1  ;;  %v1687_v58 = vrot.slane %v1685_v49, 1  ;;  %v1688_v59 = vrot.slane %v1063_v48, 2 }
  0xc5   : > { %v1061_v60 = vor.u32 %v1060_v53, %v1056_v45  ;;  %v1684_v61 = vor.u32 %v1683_v55, %v1682_v54  ;;  %v2158_v62 = vrot.slane %v1056_v45, 2  ;;  %v2159_v63 = vrot.slane %v1058_v46, 3  ;;  %v587_v53 = vpop.f32.mrf.mxu2 }
  0xc6   : > { %v847_v0 = vunpack.c.l.b16 %v791_v56  ;;  %v1689_v1 = vor.u32 %v1688_v59, %v1687_v58  ;;  %v2161_v2 = vrot.slane %v1685_v49, 2  ;;  %v2162_v3 = vrot.slane %v1063_v48, 3 }
  0xc7   : > { %v703_v4 = vpop.f32.mrf.mxu1  ;;  %v1066_v5 = vsel %vm1042_vm5, %v1061_v60, %v1065_v57  ;;  %v2160_v6 = vor.u32 %v2159_v63, %v2158_v62  ;;  %v2408_v7 = vrot.slane %v1028_v39, 3  ;;  %v1957_v8 = vrot.slane %v1014_v42, 2 }
  0xc8   : > { %v872_v9 = vpack.c.b16 %v847_v0, %v846_v40  ;;  %v704_v10 = vadd.f32 %v4338_v25, %v703_v4  ;;  %3876 = vmatmul.msk.bf16.gmra.mxu2 %vm529_vm1, %v1066_v5  ;;  %v2163_v11 = vor.u32 %v2162_v3, %v2161_v2  ;;  %v1690_v12 = vsel %vm1672_vm6, %v1684_v61, %v1689_v1 }
  0xc9   : > { %v4394_v13 = vsel %vm2403_vm7, %v2407_v51, %v2408_v7  ;;  %v1958_v14 = vrot.slane %v1028_v39, 2  ;;  %v2491_v41 = vsel %vm554_vm0, %v3963_v32, 0 }
  0xca   : > { %v901_v15 = vshrl.u32 %v872_v9, 16  ;;  %v904_v16 = vshll.u32 %v872_v9, 16  ;;  %v764_v17 = vmax.f32 %v704_v10, 0.0  ;;  %3920 = vmatmul.msk.bf16.gmra.mxu1 %vm529_vm1, %v1690_v12  ;;  %v4398_v18 = vsel %vm2150_vm9, %v2160_v6, %v2163_v11  ;;  %2500 = vmatpush.bf16.msra.mxu0 %v2491_v41 }
  0xcb   : > { %v4401_v19 = vsel %vm1953_vm8, %v1957_v8, %v1958_v14 }
  0xcc   : > { %v903_v20 = vrot.slane %v901_v15, 6  ;;  %v906_v21 = vrot.slane %v904_v16, 7  ;;  %v792_v22 = vpack.c.bf16 %v764_v17, %v764_v17  ;;  %v4432_v16 = vld [vmem:[%s5737_s2] ss:$0 sm:$0xff] }
  0xcd   : > { %v589_v17 = vpop.f32.mrf.mxu2 }
  0xce   : > { %v907_v23 = vor.u32 %v906_v21, %v903_v20  ;;  %v848_v27 = vunpack.c.l.b16 %v792_v22  ;;  %v588_v21 = vadd.f32 %v4432_v16, %v587_v53 }
  0xcf   : > { %v705_v24 = vpop.f32.mrf.mxu1 }
  0xd0   : > { %v1029_v26 = vsel %vm4355_vm3, %v907_v23, 0  ;;  %v706_v30 = vadd.f32 %v4338_v25, %v705_v24  ;;  %v1015_v31 = vsel %vm4355_vm3, 0, %v907_v23 }
  0xd1   : > { %3891 = vmatmul.msk.bf16.gmra.mxu3 %vm529_vm1, %v1015_v31  ;;  %v1482_v34 = vrot.slane %v1015_v31, 1  ;;  %v1483_v35 = vrot.slane %v1029_v26, 1  ;;  %v1068_v36 = vshrl.u32 %v1015_v31, 16  ;;  %v1070_v37 = vshll.u32 %v1015_v31, 16 }
  0xd2   : > { %v765_v38 = vmax.f32 %v706_v30, 0.0  ;;  %v1075_v39 = vshll.u32 %v1029_v26, 16  ;;  %v1694_v40 = vshrl.u32 %v1029_v26, 16  ;;  %v2410_v63 = vrot.slane %v1015_v31, 3 }
  0xd3   : > { %v1484_v42 = vsel %vm1475_vm4, %v1482_v34, %v1483_v35  ;;  %v1072_v43 = vrot.slane %v1070_v37, 1  ;;  %v1691_v44 = vrot.slane %v1068_v36, 1  ;;  %v1692_v45 = vrot.slane %v1070_v37, 2  ;;  %v4450_v35 = vpop.f32.mrf.mxu0 }
  0xd4   : > { %v793_v46 = vpack.c.bf16 %v765_v38, %v765_v38  ;;  %3906 = vmatmul.msk.bf16.gmra.mxu0 %vm529_vm1, %v1484_v42  ;;  %v1077_v47 = vrot.slane %v1075_v39, 1  ;;  %v1696_v48 = vrot.slane %v1694_v40, 1  ;;  %v1697_v49 = vrot.slane %v1075_v39, 2  ;;  %5800 = vst [vmem:[#allocation5_spill] sm:$0xff] %v4450_v35 }
  0xd5   : > { %v1073_v51 = vor.u32 %v1072_v43, %v1068_v36  ;;  %v1693_v52 = vor.u32 %v1692_v45, %v1691_v44  ;;  %v2165_v54 = vrot.slane %v1068_v36, 2  ;;  %v2166_v55 = vrot.slane %v1070_v37, 3  ;;  %v592_v53 = vpop.f32.mrf.mxu2 }
  0xd6   : > { %v849_v56 = vunpack.c.l.b16 %v793_v46  ;;  %v1698_v57 = vor.u32 %v1697_v49, %v1696_v48  ;;  %v2168_v58 = vrot.slane %v1694_v40, 2  ;;  %v2169_v59 = vrot.slane %v1075_v39, 3 }
  0xd7   : > { %v708_v60 = vpop.f32.mrf.mxu1  ;;  %v1078_v61 = vsel %vm1042_vm5, %v1073_v51, %v1077_v47  ;;  %v2167_v62 = vor.u32 %v2166_v55, %v2165_v54  ;;  %v2411_v0 = vrot.slane %v1029_v26, 3  ;;  %v1960_v6 = vrot.slane %v1015_v31, 2  ;;  %v4457_v47 = vpop.f32.mrf.mxu3 }
  0xd8   : > { %v873_v1 = vpack.c.b16 %v849_v56, %v848_v27  ;;  %v709_v2 = vadd.f32 %v4338_v25, %v708_v60  ;;  %3877 = vmatmul.msk.bf16.gmra.mxu2 %vm529_vm1, %v1078_v61  ;;  %v2170_v3 = vor.u32 %v2169_v59, %v2168_v58  ;;  %v1699_v4 = vsel %vm1672_vm6, %v1693_v52, %v1698_v57 }
  0xd9   : > { %v4420_v5 = vsel %vm2403_vm7, %v2410_v63, %v2411_v0  ;;  %v1961_v7 = vrot.slane %v1029_v26, 2  ;;  %v590_v39 = vadd.f32 %v4432_v16, %v589_v17  ;;  %v615_v52 = vmax.f32 %v588_v21, 0.0 }
  0xda   : > { %v909_v8 = vshrl.u32 %v873_v1, 16  ;;  %v912_v9 = vshll.u32 %v873_v1, 16  ;;  %3921 = vmatmul.msk.bf16.gmra.mxu1 %vm529_vm1, %v1699_v4  ;;  %v4424_v10 = vsel %vm2150_vm9, %v2167_v62, %v2170_v3  ;;  %v766_v15 = vmax.f32 %v709_v2, 0.0 }
  0xdb   : > { %v4427_v11 = vsel %vm1953_vm8, %v1960_v6, %v1961_v7  ;;  %v616_v57 = vmax.f32 %v590_v39, 0.0  ;;  %v4466_v4 = vpop.f32.mrf.mxu0 }
  0xdc   : > { %v911_v12 = vrot.slane %v909_v8, 6  ;;  %v914_v14 = vrot.slane %v912_v9, 7  ;;  %v794_v24 = vpack.c.bf16 %v766_v15, %v766_v15  ;;  %5802 = vst [vmem:[#allocation7_spill] sm:$0xff] %v4466_v4 }
  0xdd   : > { %v4463_v0 = vpack.c.bf16 %v616_v57, %v615_v52  ;;  %v594_v15 = vpop.f32.mrf.mxu2 }
  0xde   : > { %v915_v20 = vor.u32 %v914_v14, %v911_v12  ;;  %v850_v54 = vunpack.c.l.b16 %v794_v24 }
  0xdf   : > { %v710_v22 = vpop.f32.mrf.mxu1  ;;  %5801 = vst [vmem:[#allocation6_spill] sm:$0xff] %v4463_v0  ;;  %v4472_v21 = vpop.f32.mrf.mxu3 }
  0xe0   : > { %v4437_v23 = vsel %vm4355_vm3, %v915_v20, 0  ;;  %v711_v26 = vadd.f32 %v4338_v25, %v710_v22  ;;  %v4442_v27 = vsel %vm4355_vm3, 0, %v915_v20  ;;  %v593_v22 = vadd.f32 %v4432_v16, %v592_v53 }
  0xe1   : > { %3892 = vmatmul.msk.bf16.gmra.mxu3 %vm529_vm1, %v4442_v27  ;;  %v1485_v30 = vrot.slane %v4442_v27, 1  ;;  %v1486_v31 = vrot.slane %v4437_v23, 1  ;;  %v1080_v32 = vshrl.u32 %v4442_v27, 16  ;;  %v1082_v34 = vshll.u32 %v4442_v27, 16 }
  0xe2   : > { %v767_v36 = vmax.f32 %v711_v26, 0.0  ;;  %v1087_v37 = vshll.u32 %v4437_v23, 16  ;;  %v1703_v38 = vshrl.u32 %v4437_v23, 16 }
  0xe3   : > { %v1487_v40 = vsel %vm1475_vm4, %v1485_v30, %v1486_v31  ;;  %v1084_v41 = vrot.slane %v1082_v34, 1  ;;  %v1700_v42 = vrot.slane %v1080_v32, 1  ;;  %v1701_v43 = vrot.slane %v1082_v34, 2 }
  0xe4   : > { %v795_v44 = vpack.c.bf16 %v767_v36, %v767_v36  ;;  %3907 = vmatmul.msk.bf16.gmra.mxu0 %vm529_vm1, %v1487_v40  ;;  %v1705_v45 = vrot.slane %v1703_v38, 1  ;;  %v1706_v46 = vrot.slane %v1087_v37, 2  ;;  %v1089_v49 = vrot.slane %v1087_v37, 1 }
  0xe5   : > { %v1085_v48 = vor.u32 %v1084_v41, %v1080_v32  ;;  %v1702_v51 = vor.u32 %v1701_v43, %v1700_v42  ;;  %v2172_v60 = vrot.slane %v1080_v32, 2  ;;  %v2173_v1 = vrot.slane %v1082_v34, 3 }
  0xe6   : > { %v851_v55 = vunpack.c.l.b16 %v795_v44  ;;  %v1707_v56 = vor.u32 %v1706_v46, %v1705_v45  ;;  %v2175_v7 = vrot.slane %v1703_v38, 2  ;;  %v2176_v8 = vrot.slane %v1087_v37, 3 }
  0xe7   : > { %v713_v58 = vpop.f32.mrf.mxu1  ;;  %v1090_v59 = vsel %vm1042_vm5, %v1085_v48, %v1089_v49  ;;  %v4468_v6 = vor.u32 %v2173_v1, %v2172_v60  ;;  %v595_v42 = vadd.f32 %v4432_v16, %v594_v15  ;;  %v617_v60 = vmax.f32 %v593_v22, 0.0 }
  0xe8   : > { %v874_v61 = vpack.c.b16 %v851_v55, %v850_v54  ;;  %v714_v62 = vadd.f32 %v4338_v25, %v713_v58  ;;  %3878 = vmatmul.msk.bf16.gmra.mxu2 %vm529_vm1, %v1090_v59  ;;  %v1708_v63 = vsel %vm1672_vm6, %v1702_v51, %v1707_v56  ;;  %v4470_v17 = vor.u32 %v2176_v8, %v2175_v7  ;;  %v4509_v55 = vpop.f32.mrf.mxu0  ;;  %v597_v56 = vpop.f32.mrf.mxu2 }
  0xe9   : > { %5803 = vst [vmem:[#allocation8_spill] sm:$0xff] %v4509_v55 }
  0xea   : > { %v917_v2 = vshrl.u32 %v874_v61, 16  ;;  %v920_v3 = vshll.u32 %v874_v61, 16  ;;  %3922 = vmatmul.msk.bf16.gmra.mxu1 %vm529_vm1, %v1708_v63  ;;  %v768_v14 = vmax.f32 %v714_v62, 0.0  ;;  %v618_v63 = vmax.f32 %v595_v42, 0.0 }
  0xec   : > { %v919_v9 = vrot.slane %v917_v2, 6  ;;  %v922_v12 = vrot.slane %v920_v3, 7  ;;  %v796_v30 = vpack.c.bf16 %v768_v14, %v768_v14  ;;  %v4513_v2 = vpop.f32.mrf.mxu3  ;;  %v4516_v7 = vpack.c.bf16 %v618_v63, %v617_v60 }
  0xee   : > { %v923_v20 = vor.u32 %v922_v12, %v919_v9  ;;  %v852_v57 = vunpack.c.l.b16 %v796_v30  ;;  %5804 = vst [vmem:[#allocation9_spill] sm:$0xff] %v4516_v7  ;;  %v598_v30 = vadd.f32 %v4432_v16, %v597_v56 }
  0xef   : > { %v715_v24 = vpop.f32.mrf.mxu1 }
  0xf0   : > { %v4477_v26 = vsel %vm4355_vm3, %v923_v20, 0  ;;  %v716_v31 = vadd.f32 %v4338_v25, %v715_v24  ;;  %v4482_v32 = vsel %vm4355_vm3, 0, %v923_v20  ;;  %v599_v20 = vpop.f32.mrf.mxu2 }
  0xf1   : > { %3893 = vmatmul.msk.bf16.gmra.mxu3 %vm529_vm1, %v4482_v32  ;;  %v1488_v34 = vrot.slane %v4482_v32, 1  ;;  %v1489_v36 = vrot.slane %v4477_v26, 1  ;;  %v4489_v37 = vshrl.u32 %v4482_v32, 16  ;;  %v4492_v38 = vshll.u32 %v4482_v32, 16 }
  0xf2   : > { %v769_v39 = vmax.f32 %v716_v31, 0.0  ;;  %v4495_v40 = vshll.u32 %v4477_v26, 16  ;;  %v5750_v41 = vshrl.u32 %v4477_v26, 16 }
  0xf3   : > { %v1490_v43 = vsel %vm1475_vm4, %v1488_v34, %v1489_v36  ;;  %v1096_v44 = vrot.slane %v4492_v38, 1  ;;  %v1709_v45 = vrot.slane %v4489_v37, 1  ;;  %v1710_v46 = vrot.slane %v4492_v38, 2  ;;  %v4521_v34 = vpop.f32.mrf.mxu0 }
  0xf4   : > { %v797_v48 = vpack.c.bf16 %v769_v39, %v769_v39  ;;  %3908 = vmatmul.msk.bf16.gmra.mxu0 %vm529_vm1, %v1490_v43  ;;  %v1714_v49 = vrot.slane %v5750_v41, 1  ;;  %v1715_v51 = vrot.slane %v4495_v40, 2  ;;  %v1101_v53 = vrot.slane %v4495_v40, 1  ;;  %5805 = vst [vmem:[#allocation10_spill] sm:$0xff] %v4521_v34 }
  0xf5   : > { %v1097_v52 = vor.u32 %v1096_v44, %v4489_v37  ;;  %v1711_v54 = vor.u32 %v1710_v46, %v1709_v45 }
  0xf6   : > { %v853_v58 = vunpack.c.l.b16 %v797_v48  ;;  %v1716_v59 = vor.u32 %v1715_v51, %v1714_v49 }
  0xf7   : > { %v718_v61 = vpop.f32.mrf.mxu1  ;;  %v1102_v62 = vsel %vm1042_vm5, %v1097_v52, %v1101_v53  ;;  %v4546_v53 = vpop.f32.mrf.mxu3 }
  0xf8   : > { %v875_v1 = vpack.c.b16 %v853_v58, %v852_v57  ;;  %3879 = vmatmul.msk.bf16.gmra.mxu2 %vm529_vm1, %v1102_v62  ;;  %v1717_v3 = vsel %vm1672_vm6, %v1711_v54, %v1716_v59  ;;  %v719_v12 = vadd.f32 %v4338_v25, %v718_v61  ;;  %v600_v62 = vadd.f32 %v4432_v16, %v599_v20 }
  0xfa   : > { %v925_v8 = vshrl.u32 %v875_v1, 16  ;;  %v928_v9 = vshll.u32 %v875_v1, 16  ;;  %3923 = vmatmul.msk.bf16.gmra.mxu1 %vm529_vm1, %v1717_v3  ;;  %v770_v24 = vmax.f32 %v719_v12, 0.0 }
  0xfb   : > { %v4562_v20 = vpop.f32.mrf.mxu0 }
  0xfc   : > { %v927_v14 = vrot.slane %v925_v8, 6  ;;  %v930_v15 = vrot.slane %v928_v9, 7  ;;  %v798_v48 = vpack.c.bf16 %v770_v24, %v770_v24  ;;  %v602_v24 = vpop.f32.mrf.mxu2  ;;  %5806 = vst [vmem:[#allocation11_spill] sm:$0xff] %v4562_v20 }
  0xfe   : > { %v931_v22 = vor.u32 %v930_v15, %v927_v14  ;;  %v854_v8 = vunpack.c.l.b16 %v798_v48  ;;  %v619_v14 = vmax.f32 %v598_v30, 0.0 }
  0xff   : > { %v720_v31 = vpop.f32.mrf.mxu1 }
 0x100   : > { %v4525_v36 = vsel %vm4355_vm3, %v931_v22, 0  ;;  %v721_v39 = vadd.f32 %v4338_v25, %v720_v31  ;;  %v4530_v42 = vsel %vm4355_vm3, 0, %v931_v22 }
 0x101   : > { %3894 = vmatmul.msk.bf16.gmra.mxu3 %vm529_vm1, %v4530_v42  ;;  %v1491_v43 = vrot.slane %v4530_v42, 1  ;;  %v1492_v44 = vrot.slane %v4525_v36, 1  ;;  %v4537_v45 = vshrl.u32 %v4530_v42, 16  ;;  %v4540_v46 = vshll.u32 %v4530_v42, 16 }
 0x102   : > { %v771_v49 = vmax.f32 %v721_v39, 0.0  ;;  %v4543_v51 = vshll.u32 %v4525_v36, 16  ;;  %v5749_v52 = vshrl.u32 %v4525_v36, 16  ;;  %v620_v39 = vmax.f32 %v600_v62, 0.0 }
 0x103   : > { %v1493_v54 = vsel %vm1475_vm4, %v1491_v43, %v1492_v44  ;;  %v1108_v56 = vrot.slane %v4540_v46, 1  ;;  %v1718_v57 = vrot.slane %v4537_v45, 1  ;;  %v1719_v58 = vrot.slane %v4540_v46, 2 }
 0x104   : > { %v799_v59 = vpack.c.bf16 %v771_v49, %v771_v49  ;;  %3909 = vmatmul.msk.bf16.gmra.mxu0 %vm529_vm1, %v1493_v54  ;;  %v1723_v60 = vrot.slane %v5749_v52, 1  ;;  %v1724_v61 = vrot.slane %v4543_v51, 2  ;;  %v1113_v1 = vrot.slane %v4543_v51, 1 }
 0x105   : > { %v1109_v63 = vor.u32 %v1108_v56, %v4537_v45  ;;  %v1720_v3 = vor.u32 %v1719_v58, %v1718_v57  ;;  %v4566_v48 = vpack.c.bf16 %v620_v39, %v619_v14  ;;  %v4568_v57 = vpop.f32.mrf.mxu3  ;;  %v604_v14 = vpop.f32.mrf.mxu2 }
 0x106   : > { %v855_v9 = vunpack.c.l.b16 %v799_v59  ;;  %v1725_v12 = vor.u32 %v1724_v61, %v1723_v60  ;;  %v603_v60 = vadd.f32 %v4432_v16, %v602_v24 }
 0x107   : > { %v723_v15 = vpop.f32.mrf.mxu1  ;;  %v1114_v22 = vsel %vm1042_vm5, %v1109_v63, %v1113_v1  ;;  %5807 = vst [vmem:[#allocation12_spill] sm:$0xff] %v4566_v48 }
 0x108   : > { %v876_v31 = vpack.c.b16 %v855_v9, %v854_v8  ;;  %3880 = vmatmul.msk.bf16.gmra.mxu2 %vm529_vm1, %v1114_v22  ;;  %v1726_v43 = vsel %vm1672_vm6, %v1720_v3, %v1725_v12  ;;  %v724_v54 = vadd.f32 %v4338_v25, %v723_v15 }
 0x10a   : > { %v933_v44 = vshrl.u32 %v876_v31, 16  ;;  %v936_v49 = vshll.u32 %v876_v31, 16  ;;  %3924 = vmatmul.msk.bf16.gmra.mxu1 %vm529_vm1, %v1726_v43  ;;  %v772_v59 = vmax.f32 %v724_v54, 0.0 }
 0x10c   : > { %v935_v30 = vrot.slane %v933_v44, 6  ;;  %v938_v56 = vrot.slane %v936_v49, 7  ;;  %v800_v15 = vpack.c.bf16 %v772_v59, %v772_v59  ;;  %v4596_v44 = vpop.f32.mrf.mxu0  ;;  %v605_v59 = vadd.f32 %v4432_v16, %v604_v14 }
 0x10d   : > { %5808 = vst [vmem:[#allocation13_spill] sm:$0xff] %v4596_v44  ;;  %v4607_v48 = vpop.f32.mrf.mxu3 }
 0x10e   : > { %v939_v58 = vor.u32 %v938_v56, %v935_v30 }
 0x10f   : > { %v725_v61 = vpop.f32.mrf.mxu1 }
 0x110   : > { %v4573_v62 = vsel %vm4355_vm3, %v939_v58, 0  ;;  %v726_v63 = vadd.f32 %v4338_v25, %v725_v61  ;;  %v4578_v1 = vsel %vm4355_vm3, 0, %v939_v58 }
 0x111   : > { %3895 = vmatmul.msk.bf16.gmra.mxu3 %vm529_vm1, %v4578_v1  ;;  %v1494_v3 = vrot.slane %v4578_v1, 1  ;;  %v1495_v8 = vrot.slane %v4573_v62, 1  ;;  %v4585_v9 = vshrl.u32 %v4578_v1, 16  ;;  %v4588_v12 = vshll.u32 %v4578_v1, 16 }
 0x112   : > { %v773_v22 = vmax.f32 %v726_v63, 0.0  ;;  %v4591_v24 = vshll.u32 %v4573_v62, 16  ;;  %v5751_v31 = vshrl.u32 %v4573_v62, 16 }
 0x113   : > { %v1496_v39 = vsel %vm1475_vm4, %v1494_v3, %v1495_v8  ;;  %v1120_v43 = vrot.slane %v4588_v12, 1  ;;  %v1727_v49 = vrot.slane %v4585_v9, 1  ;;  %v1728_v54 = vrot.slane %v4588_v12, 2 }
 0x114   : > { %v801_v30 = vpack.c.bf16 %v773_v22, %v773_v22  ;;  %3910 = vmatmul.msk.bf16.gmra.mxu0 %vm529_vm1, %v1496_v39  ;;  %v1732_v56 = vrot.slane %v5751_v31, 1  ;;  %v1733_v58 = vrot.slane %v4591_v24, 2  ;;  %v1125_v63 = vrot.slane %v4591_v24, 1 }
 0x115   : > { %v1121_v61 = vor.u32 %v1120_v43, %v4585_v9  ;;  %v1729_v3 = vor.u32 %v1728_v54, %v1727_v49  ;;  %v856_v8 = vunpack.c.l.b16 %v800_v15  ;;  %v621_v22 = vmax.f32 %v603_v60, 0.0  ;;  %v4616_v60 = vpop.f32.mrf.mxu0 }
 0x116   : > { %v857_v52 = vunpack.c.l.b16 %v801_v30  ;;  %v1734_v41 = vor.u32 %v1733_v58, %v1732_v56  ;;  %v622_v31 = vmax.f32 %v605_v59, 0.0  ;;  %5810 = vst [vmem:[#allocation15_spill] sm:$0xff] %v4616_v60  ;;  %v739_v58 = vadd.f32 %v4338_v25, %v4457_v47 }
 0x117   : > { %v728_v7 = vpop.f32.mrf.mxu1  ;;  %v1126_v39 = vsel %vm1042_vm5, %v1121_v61, %v1125_v63 }
 0x118   : > { %v877_v0 = vpack.c.b16 %v857_v52, %v856_v8  ;;  %3881 = vmatmul.msk.bf16.gmra.mxu2 %vm529_vm1, %v1126_v39  ;;  %v1735_v16 = vsel %vm1672_vm6, %v1729_v3, %v1734_v41  ;;  %v729_v44 = vadd.f32 %v4338_v25, %v728_v7  ;;  %v4614_v15 = vpack.c.bf16 %v622_v31, %v621_v22  ;;  %v4629_v31 = vpop.f32.mrf.mxu3 }
 0x119   : > { %v778_v20 = vmax.f32 %v739_v58, 0.0 }
 0x11a   : > { %v941_v14 = vshrl.u32 %v877_v0, 16  ;;  %v944_v43 = vshll.u32 %v877_v0, 16  ;;  %3925 = vmatmul.msk.bf16.gmra.mxu1 %vm529_vm1, %v1735_v16  ;;  %5809 = vst [vmem:[#allocation14_spill] sm:$0xff] %v4614_v15  ;;  %v774_v56 = vmax.f32 %v729_v44, 0.0 }
 0x11b   : > { %v806_v58 = vpack.c.bf16 %v778_v20, %v778_v20 }
 0x11c   : > { %v943_v49 = vrot.slane %v941_v14, 6  ;;  %v946_v54 = vrot.slane %v944_v43, 7  ;;  %v802_v63 = vpack.c.bf16 %v774_v56, %v774_v56 }
 0x11e   : > { %v947_v30 = vor.u32 %v946_v54, %v943_v49  ;;  %v741_v49 = vadd.f32 %v4338_v25, %v4472_v21 }
 0x11f   : > { %v730_v52 = vpop.f32.mrf.mxu1 }
 0x120   : > { %v4622_v41 = vsel %vm4355_vm3, %v947_v30, 0  ;;  %v731_v0 = vadd.f32 %v4338_v25, %v730_v52  ;;  %v4627_v7 = vsel %vm4355_vm3, 0, %v947_v30 }
 0x121   : > { %5811 = vst [vmem:[#allocation16_spill] sm:$0xff] %v4622_v41  ;;  %3896 = vmatmul.msk.bf16.gmra.mxu3 %vm529_vm1, %v4627_v7  ;;  %v1497_v44 = vrot.slane %v4627_v7, 1  ;;  %v1498_v59 = vrot.slane %v4622_v41, 1  ;;  %v4636_v47 = vshrl.u32 %v4627_v7, 16  ;;  %v4639_v61 = vshll.u32 %v4627_v7, 16 }
 0x122   : > { %5812 = vst [vmem:[#allocation17_spill] sm:$0xff] %v4627_v7  ;;  %v775_v3 = vmax.f32 %v731_v0, 0.0  ;;  %v4642_v8 = vshll.u32 %v4622_v41, 16  ;;  %v5752_v22 = vshrl.u32 %v4622_v41, 16 }
 0x123   : > { %5813 = vst [vmem:[#allocation18_spill] sm:$0xff] %v4639_v61  ;;  %v1499_v39 = vsel %vm1475_vm4, %v1497_v44, %v1498_v59  ;;  %v1132_v16 = vrot.slane %v4639_v61, 1  ;;  %v1736_v14 = vrot.slane %v4636_v47, 1  ;;  %v1737_v43 = vrot.slane %v4639_v61, 2 }
 0x124   : > { %5814 = vst [vmem:[#allocation19_spill] sm:$0xff] %v4642_v8  ;;  %v803_v54 = vpack.c.bf16 %v775_v3, %v775_v3  ;;  %3911 = vmatmul.msk.bf16.gmra.mxu0 %vm529_vm1, %v1499_v39  ;;  %v1741_v30 = vrot.slane %v5752_v22, 1  ;;  %v1742_v56 = vrot.slane %v4642_v8, 2  ;;  %v1137_v0 = vrot.slane %v4642_v8, 1  ;;  %v4658_v3 = vpop.f32.mrf.mxu0 }
 0x125   : > { %v1133_v52 = vor.u32 %v1132_v16, %v4636_v47  ;;  %v1738_v44 = vor.u32 %v1737_v43, %v1736_v14  ;;  %v858_v59 = vunpack.c.l.b16 %v802_v63  ;;  %5815 = vst [vmem:[#allocation20_spill] sm:$0xff] %v4658_v3  ;;  %v779_v39 = vmax.f32 %v741_v49, 0.0  ;;  %v4664_v63 = vpop.f32.mrf.mxu3 }
 0x126   : > { %v859_v15 = vunpack.c.l.b16 %v803_v54  ;;  %v1743_v60 = vor.u32 %v1742_v56, %v1741_v30  ;;  %v862_v49 = vunpack.c.l.b16 %v806_v58 }
 0x127   : > { %v733_v34 = vpop.f32.mrf.mxu1  ;;  %v1138_v21 = vsel %vm1042_vm5, %v1133_v52, %v1137_v0  ;;  %v807_v14 = vpack.c.bf16 %v779_v39, %v779_v39 }
 0x128   : > { %v878_v55 = vpack.c.b16 %v859_v15, %v858_v59  ;;  %3882 = vmatmul.msk.bf16.gmra.mxu2 %vm529_vm1, %v1138_v21  ;;  %v1744_v22 = vsel %vm1672_vm6, %v1738_v44, %v1743_v60  ;;  %v734_v35 = vadd.f32 %v4338_v25, %v733_v34 }
 0x129   : > { %v863_v52 = vunpack.c.l.b16 %v807_v14 }
 0x12a   : > { %v949_v4 = vshrl.u32 %v878_v55, 16  ;;  %v952_v16 = vshll.u32 %v878_v55, 16  ;;  %3926 = vmatmul.msk.bf16.gmra.mxu1 %vm529_vm1, %v1744_v22  ;;  %v776_v56 = vmax.f32 %v734_v35, 0.0 }
 0x12c   : > { %v951_v43 = vrot.slane %v949_v4, 6  ;;  %v954_v54 = vrot.slane %v952_v16, 7  ;;  %v804_v44 = vpack.c.bf16 %v776_v56, %v776_v56 }
 0x12e   : > { %v955_v30 = vor.u32 %v954_v54, %v951_v43  ;;  %v860_v7 = vunpack.c.l.b16 %v804_v44 }
 0x12f   : > { %v735_v15 = vpop.f32.mrf.mxu1 }
 0x130   : > { %v4668_v60 = vsel %vm4355_vm3, %v955_v30, 0  ;;  %v736_v55 = vadd.f32 %v4338_v25, %v735_v15  ;;  %v4673_v34 = vsel %vm4355_vm3, 0, %v955_v30 }
 0x131   : > { %5816 = vst [vmem:[#allocation21_spill] sm:$0xff] %v4668_v60  ;;  %3897 = vmatmul.msk.bf16.gmra.mxu3 %vm529_vm1, %v4673_v34  ;;  %v1574_v4 = vpop.f32.mrf.mxu0  ;;  %v1500_v20 = vrot.slane %v4673_v34, 1  ;;  %v1501_v35 = vrot.slane %v4668_v60, 1  ;;  %v4680_v22 = vshrl.u32 %v4673_v34, 16  ;;  %v4683_v0 = vshll.u32 %v4673_v34, 16 }
 0x132   : > { %5817 = vst [vmem:[#allocation22_spill] sm:$0xff] %v4673_v34  ;;  %v777_v59 = vmax.f32 %v736_v55, 0.0  ;;  %v4686_v21 = vshll.u32 %v4668_v60, 16  ;;  %v5759_v39 = vshrl.u32 %v4668_v60, 16  ;;  %v880_v55 = vpack.c.b16 %v863_v52, %v862_v49 }
 0x133   : > { %5818 = vst [vmem:[#allocation23_spill] sm:$0xff] %v4680_v22  ;;  %v1502_v16 = vsel %vm1475_vm4, %v1500_v20, %v1501_v35  ;;  %v1144_v58 = vrot.slane %v4683_v0, 1  ;;  %v1745_v14 = vrot.slane %v4680_v22, 1  ;;  %v1746_v43 = vrot.slane %v4683_v0, 2 }
 0x134   : > { %5819 = vst [vmem:[#allocation24_spill] sm:$0xff] %v4683_v0  ;;  %v805_v54 = vpack.c.bf16 %v777_v59, %v777_v59  ;;  %v1377_v30 = vpop.f32.mrf.mxu3  ;;  %3912 = vmatmul.msk.bf16.gmra.mxu0 %vm529_vm1, %v1502_v16  ;;  %v1750_v56 = vrot.slane %v5759_v39, 1  ;;  %v1751_v15 = vrot.slane %v4686_v21, 2  ;;  %v1149_v20 = vrot.slane %v4686_v21, 1 }
 0x135   : > { %5820 = vst [vmem:[#allocation25_spill] sm:$0xff] %v4686_v21  ;;  %v1145_v3 = vor.u32 %v1144_v58, %v4680_v22  ;;  %v1747_v35 = vor.u32 %v1746_v43, %v1745_v14  ;;  %v744_v34 = vadd.f32 %v4338_v25, %v4513_v2  ;;  %v746_v16 = vadd.f32 %v4338_v25, %v4546_v53 }
 0x136   : > { %v861_v0 = vunpack.c.l.b16 %v805_v54  ;;  %v1752_v59 = vor.u32 %v1751_v15, %v1750_v56  ;;  %v965_v49 = vshrl.u32 %v880_v55, 16  ;;  %v968_v52 = vshll.u32 %v880_v55, 16 }
 0x137   : > { %v1150_v8 = vsel %vm1042_vm5, %v1145_v3, %v1149_v20  ;;  %v780_v14 = vmax.f32 %v744_v34, 0.0  ;;  %v781_v44 = vmax.f32 %v746_v16, 0.0  ;;  %v4712_v34 = vsel %vm2150_vm9, %v4468_v6, %v4470_v17 }
 0x138   : > { %v879_v39 = vpack.c.b16 %v861_v0, %v860_v7  ;;  %3883 = vmatmul.msk.bf16.gmra.mxu2 %vm529_vm1, %v1150_v8  ;;  %v1753_v21 = vsel %vm1672_vm6, %v1747_v35, %v1752_v59  ;;  %v967_v25 = vrot.slane %v965_v49, 6  ;;  %v970_v53 = vrot.slane %v968_v52, 7 }
 0x139   : > { %v1576_v58 = vpop.f32.mrf.mxu0  ;;  %v808_v7 = vpack.c.bf16 %v780_v14, %v780_v14 }
 0x13a   : > { %v957_v43 = vshrl.u32 %v879_v39, 16  ;;  %v960_v60 = vshll.u32 %v879_v39, 16  ;;  %3927 = vmatmul.msk.bf16.gmra.mxu1 %vm529_vm1, %v1753_v21  ;;  %v809_v39 = vpack.c.bf16 %v781_v44, %v781_v44  ;;  %v971_v20 = vor.u32 %v970_v53, %v967_v25 }
 0x13b   : > { %v1267_v2 = vpop.f32.mrf.mxu2  ;;  %v864_v35 = vunpack.c.l.b16 %v808_v7 }
 0x13c   : > { %v959_v54 = vrot.slane %v957_v43, 6  ;;  %v962_v3 = vrot.slane %v960_v60, 7  ;;  %v1378_v56 = vadd.f32 %v1377_v30, %v1267_v2  ;;  %v1379_v15 = vpop.f32.mrf.mxu3  ;;  %v865_v44 = vunpack.c.l.b16 %v809_v39 }
 0x13e   : > { %v963_v8 = vor.u32 %v962_v3, %v959_v54  ;;  %v4707_v0 = vadd.f32 %v1574_v4, %v1378_v56 }
 0x140   : > { %5821 = vst [vmem:[#allocation26_spill] sm:$0xff] %v4707_v0  ;;  %v4716_v21 = vsel %vm4355_vm3, %v963_v8, 0  ;;  %v4720_v60 = vsel %vm4355_vm3, 0, %v963_v8 }
 0x141   : > { %5822 = vst [vmem:[#allocation27_spill] sm:$0xff] %v4716_v21  ;;  %3898 = vmatmul.msk.bf16.gmra.mxu3 %vm529_vm1, %v4720_v60  ;;  %v1579_v30 = vpop.f32.mrf.mxu0  ;;  %v1503_v4 = vrot.slane %v4720_v60, 1  ;;  %v1504_v55 = vrot.slane %v4716_v21, 1  ;;  %v4727_v6 = vshrl.u32 %v4720_v60, 16  ;;  %v4730_v17 = vshll.u32 %v4720_v60, 16 }
 0x142   : > { %5823 = vst [vmem:[#allocation28_spill] sm:$0xff] %v4720_v60  ;;  %v4733_v59 = vshll.u32 %v4716_v21, 16  ;;  %v5763_v16 = vshrl.u32 %v4716_v21, 16 }
 0x143   : > { %5824 = vst [vmem:[#allocation29_spill] sm:$0xff] %v4727_v6  ;;  %v1269_v49 = vpop.f32.mrf.mxu2  ;;  %v1505_v52 = vsel %vm1475_vm4, %v1503_v4, %v1504_v55  ;;  %v1156_v14 = vrot.slane %v4730_v17, 1  ;;  %v1754_v43 = vrot.slane %v4727_v6, 1  ;;  %v1755_v2 = vrot.slane %v4730_v17, 2 }
 0x144   : > { %5825 = vst [vmem:[#allocation30_spill] sm:$0xff] %v4730_v17  ;;  %v1380_v54 = vadd.f32 %v1379_v15, %v1269_v49  ;;  %v1382_v3 = vpop.f32.mrf.mxu3  ;;  %3913 = vmatmul.msk.bf16.gmra.mxu0 %vm529_vm1, %v1505_v52  ;;  %v1759_v56 = vrot.slane %v5763_v16, 1  ;;  %v1760_v25 = vrot.slane %v4733_v59, 2  ;;  %v1161_v7 = vrot.slane %v4733_v59, 1  ;;  %v4125_v15 = vld [vmem:[%s5739_s4] ss:$0 sm:$0xff] }
 0x145   : > { %5826 = vst [vmem:[#allocation31_spill] sm:$0xff] %v4733_v59  ;;  %v1157_v53 = vor.u32 %v1156_v14, %v4727_v6  ;;  %v1756_v8 = vor.u32 %v1755_v2, %v1754_v43  ;;  %v749_v39 = vadd.f32 %v4125_v15, %v4568_v57  ;;  %v751_v49 = vadd.f32 %v4125_v15, %v4607_v48 }
 0x146   : > { %v4746_v4 = vadd.f32 %v1576_v58, %v1380_v54  ;;  %v1761_v55 = vor.u32 %v1760_v25, %v1759_v56  ;;  %v881_v16 = vpack.c.b16 %v865_v44, %v864_v35  ;;  %v4757_v14 = vsel %vm4355_vm3, 0, %v971_v20 }
 0x147   : > { %v1162_v52 = vsel %vm1042_vm5, %v1157_v53, %v1161_v7  ;;  %5828 = vst [vmem:[#allocation33_spill] sm:$0xff] %v4757_v14  ;;  %v4762_v2 = vsel %vm4355_vm3, %v971_v20, 0  ;;  %v782_v57 = vmax.f32 %v749_v39, 0.0  ;;  %v783_v48 = vmax.f32 %v751_v49, 0.0 }
 0x148   : > { %5827 = vst [vmem:[#allocation32_spill] sm:$0xff] %v4746_v4  ;;  %3884 = vmatmul.msk.bf16.gmra.mxu2 %vm529_vm1, %v1162_v52  ;;  %v1762_v43 = vsel %vm1672_vm6, %v1756_v8, %v1761_v55  ;;  %v4766_v35 = vshll.u32 %v4757_v14, 16  ;;  %v973_v44 = vshrl.u32 %v881_v16, 16  ;;  %v976_v56 = vshll.u32 %v881_v16, 16 }
 0x149   : > { %v1581_v58 = vpop.f32.mrf.mxu0  ;;  %5829 = vst [vmem:[#allocation34_spill] sm:$0xff] %v4762_v2  ;;  %v4769_v7 = vshrl.u32 %v4757_v14, 16  ;;  %v4772_v8 = vshll.u32 %v4762_v2, 16  ;;  %v1506_v39 = vrot.slane %v4757_v14, 1  ;;  %v1507_v49 = vrot.slane %v4762_v2, 1 }
 0x14a   : > { %3928 = vmatmul.msk.bf16.gmra.mxu1 %vm529_vm1, %v1762_v43  ;;  %5830 = vst [vmem:[#allocation35_spill] sm:$0xff] %v4766_v35  ;;  %v810_v52 = vpack.c.bf16 %v782_v57, %v782_v57  ;;  %v811_v43 = vpack.c.bf16 %v783_v48, %v783_v48  ;;  %v1168_v16 = vrot.slane %v4766_v35, 1  ;;  %v1764_v20 = vrot.slane %v4766_v35, 2 }
 0x14b   : > { %v1272_v54 = vpop.f32.mrf.mxu2  ;;  %5831 = vst [vmem:[#allocation36_spill] sm:$0xff] %v4769_v7  ;;  %v1763_v60 = vrot.slane %v4769_v7, 1  ;;  %v1508_v57 = vsel %vm1475_vm4, %v1506_v39, %v1507_v49  ;;  %v754_v39 = vadd.f32 %v4125_v15, %v4629_v31  ;;  %v756_v49 = vadd.f32 %v4125_v15, %v4664_v63 }
 0x14c   : > { %v1383_v25 = vadd.f32 %v1382_v3, %v1272_v54  ;;  %v1384_v53 = vpop.f32.mrf.mxu3  ;;  %5832 = vst [vmem:[#allocation37_spill] sm:$0xff] %v4772_v8  ;;  %v975_v3 = vrot.slane %v973_v44, 6  ;;  %v978_v54 = vrot.slane %v976_v56, 7  ;;  %v866_v48 = vunpack.c.l.b16 %v810_v52 }
 0x14d   : > { %v867_v0 = vunpack.c.l.b16 %v811_v43  ;;  %v1169_v44 = vor.u32 %v1168_v16, %v4769_v7  ;;  %v1173_v56 = vrot.slane %v4772_v8, 1  ;;  %v1765_v35 = vor.u32 %v1764_v20, %v1763_v60 }
 0x14e   : > { %v4775_v55 = vadd.f32 %v1579_v30, %v1383_v25  ;;  %v5834_v30 = vshrl.u32 %v4762_v2, 16  ;;  %v784_v15 = vmax.f32 %v754_v39, 0.0 }
 0x14f   : > { %v1174_v22 = vsel %vm1042_vm5, %v1169_v44, %v1173_v56 }
 0x150   : > { %5833 = vst [vmem:[#allocation38_spill] sm:$0xff] %v4775_v55  ;;  %v1768_v25 = vrot.slane %v5834_v30, 1  ;;  %v1769_v55 = vrot.slane %v4772_v8, 2  ;;  %v882_v30 = vpack.c.b16 %v867_v0, %v866_v48 }
 0x151   : > { %3899 = vmatmul.msk.bf16.gmra.mxu3 %vm529_vm1, %v4757_v14  ;;  %v1584_v4 = vpop.f32.mrf.mxu0  ;;  %v979_v14 = vor.u32 %v978_v54, %v975_v3 }
 0x152   : > { %v1770_v6 = vor.u32 %v1769_v55, %v1768_v25  ;;  %v981_v0 = vshrl.u32 %v882_v30, 16  ;;  %v984_v63 = vshll.u32 %v882_v30, 16 }
 0x153   : > { %v1274_v59 = vpop.f32.mrf.mxu2  ;;  %v4799_v52 = vsel %vm4355_vm3, 0, %v979_v14 }
 0x154   : > { %v1385_v21 = vadd.f32 %v1384_v53, %v1274_v59  ;;  %v1387_v17 = vpop.f32.mrf.mxu3  ;;  %3914 = vmatmul.msk.bf16.gmra.mxu0 %vm529_vm1, %v1508_v57  ;;  %5836 = vst [vmem:[#allocation40_spill] sm:$0xff] %v4799_v52  ;;  %v1771_v53 = vsel %vm1672_vm6, %v1765_v35, %v1770_v6  ;;  %v1178_v31 = vshll.u32 %v4799_v52, 16  ;;  %v1176_v55 = vshrl.u32 %v4799_v52, 16 }
 0x155   : > { %v983_v54 = vrot.slane %v981_v0, 6  ;;  %v986_v25 = vrot.slane %v984_v63, 7  ;;  %v812_v57 = vpack.c.bf16 %v784_v15, %v784_v15 }
 0x156   : > { %v4791_v2 = vadd.f32 %v1581_v58, %v1385_v21  ;;  %v4804_v21 = vsel %vm4355_vm3, %v979_v14, 0  ;;  %v1509_v14 = vrot.slane %v4799_v52, 1  ;;  %v1180_v3 = vrot.slane %v1178_v31, 1 }
 0x157   : > { %5837 = vst [vmem:[#allocation41_spill] sm:$0xff] %v4804_v21  ;;  %v1183_v43 = vshll.u32 %v4804_v21, 16  ;;  %v1775_v6 = vshrl.u32 %v4804_v21, 16  ;;  %v1510_v16 = vrot.slane %v4804_v21, 1  ;;  %v1772_v44 = vrot.slane %v1176_v55, 1 }
 0x158   : > { %5835 = vst [vmem:[#allocation39_spill] sm:$0xff] %v4791_v2  ;;  %3885 = vmatmul.msk.bf16.gmra.mxu2 %vm529_vm1, %v1174_v22  ;;  %v785_v22 = vmax.f32 %v756_v49, 0.0  ;;  %v1773_v56 = vrot.slane %v1178_v31, 2  ;;  %v868_v21 = vunpack.c.l.b16 %v812_v57  ;;  %v2228_v2 = vrot.slane %v1176_v55, 2 }
 0x159   : > { %v1586_v59 = vpop.f32.mrf.mxu0  ;;  %v1777_v30 = vrot.slane %v1775_v6, 1  ;;  %v1778_v39 = vrot.slane %v1183_v43, 2  ;;  %v2229_v8 = vrot.slane %v1178_v31, 3  ;;  %v2231_v7 = vrot.slane %v1775_v6, 2 }
 0x15a   : > { %3929 = vmatmul.msk.bf16.gmra.mxu1 %vm529_vm1, %v1771_v53  ;;  %v813_v48 = vpack.c.bf16 %v785_v22, %v785_v22  ;;  %v1181_v53 = vor.u32 %v1180_v3, %v1176_v55  ;;  %v1774_v15 = vor.u32 %v1773_v56, %v1772_v44 }
 0x15b   : > { %v1277_v60 = vpop.f32.mrf.mxu2  ;;  %v1779_v22 = vor.u32 %v1778_v39, %v1777_v30 }
 0x15c   : > { %v1388_v58 = vadd.f32 %v1387_v17, %v1277_v60  ;;  %v1389_v20 = vpop.f32.mrf.mxu3  ;;  %v1185_v60 = vrot.slane %v1183_v43, 1 }
 0x15e   : > { %v4811_v35 = vadd.f32 %v1584_v4, %v1388_v58  ;;  %v1511_v4 = vsel %vm1475_vm4, %v1509_v14, %v1510_v16  ;;  %v987_v58 = vor.u32 %v986_v25, %v983_v54  ;;  %v1186_v41 = vsel %vm1042_vm5, %v1181_v53, %v1185_v60 }
 0x15f   : > { %v2232_v16 = vrot.slane %v1183_v43, 3  ;;  %v1780_v54 = vsel %vm1672_vm6, %v1774_v15, %v1779_v22 }
 0x160   : > { %5838 = vst [vmem:[#allocation42_spill] sm:$0xff] %v4811_v35  ;;  %v869_v35 = vunpack.c.l.b16 %v813_v48  ;;  %v4825_v14 = vsel %vm4355_vm3, 0, %v987_v58 }
 0x161   : > { %3900 = vmatmul.msk.bf16.gmra.mxu3 %vm529_vm1, %v4799_v52  ;;  %v1589_v17 = vpop.f32.mrf.mxu0  ;;  %v2233_v31 = vor.u32 %v2232_v16, %v2231_v7  ;;  %v4842_v25 = vshrl.u32 %v4825_v14, 16  ;;  %v1512_v44 = vrot.slane %v4825_v14, 1 }
 0x162   : > { %v883_v61 = vpack.c.b16 %v869_v35, %v868_v21  ;;  %v4834_v21 = vshll.u32 %v4825_v14, 16  ;;  %v4836_v35 = vpop.f32.mrf.mxu1 }
 0x163   : > { %v1279_v49 = vpop.f32.mrf.mxu2 }
 0x164   : > { %v1390_v0 = vadd.f32 %v1389_v20, %v1279_v49  ;;  %v1392_v63 = vpop.f32.mrf.mxu3  ;;  %3915 = vmatmul.msk.bf16.gmra.mxu0 %vm529_vm1, %v1511_v4  ;;  %v2230_v20 = vor.u32 %v2229_v8, %v2228_v2  ;;  %v992_v6 = vshll.u32 %v883_v61, 16  ;;  %v1192_v56 = vrot.slane %v4834_v21, 1 }
 0x165   : > { %v1781_v4 = vrot.slane %v4842_v25, 1  ;;  %v1782_v53 = vrot.slane %v4834_v21, 2 }
 0x166   : > { %v4819_v52 = vadd.f32 %v1586_v59, %v1390_v0  ;;  %v4830_v59 = vsel %vm4355_vm3, %v987_v58, 0  ;;  %v4839_v43 = vsel %vm2150_vm9, %v2230_v20, %v2233_v31  ;;  %v994_v39 = vrot.slane %v992_v6, 7 }
 0x167   : > { %v4845_v57 = vshll.u32 %v4830_v59, 16  ;;  %v5786_v7 = vshrl.u32 %v4830_v59, 16 }
 0x168   : > { %3886 = vmatmul.msk.bf16.gmra.mxu2 %vm529_vm1, %v1186_v41  ;;  %v989_v41 = vshrl.u32 %v883_v61, 16  ;;  %v1513_v61 = vrot.slane %v4830_v59, 1 }
 0x169   : > { %v1591_v3 = vpop.f32.mrf.mxu0  ;;  %v1787_v60 = vrot.slane %v4845_v57, 2  ;;  %v1197_v15 = vrot.slane %v4845_v57, 1 }
 0x16a   : > { %3930 = vmatmul.msk.bf16.gmra.mxu1 %vm529_vm1, %v1780_v54  ;;  %v991_v30 = vrot.slane %v989_v41, 6  ;;  %v1514_v0 = vsel %vm1475_vm4, %v1512_v44, %v1513_v61  ;;  %v1783_v54 = vor.u32 %v1782_v53, %v1781_v4 }
 0x16b   : > { %v1282_v55 = vpop.f32.mrf.mxu2 }
 0x16c   : > { %v1393_v2 = vadd.f32 %v1392_v63, %v1282_v55  ;;  %v1394_v8 = vpop.f32.mrf.mxu3  ;;  %v1193_v63 = vor.u32 %v1192_v56, %v4842_v25  ;;  %v995_v22 = vor.u32 %v994_v39, %v991_v30  ;;  %v4864_v55 = vpop.f32.mrf.mxu1  ;;  %v4168_v56 = vmov 65535   ;;  %v3995_v30 = vld [vmem:[%s5742_s7 + $0x8] sm:$0x7] }
 0x16e   : > { %v4848_v48 = vadd.f32 %v1589_v17, %v1393_v2  ;;  %v1786_v17 = vrot.slane %v5786_v7, 1  ;;  %v1198_v6 = vsel %vm1042_vm5, %v1193_v63, %v1197_v15  ;;  %v4872_v2 = vsel %vm4355_vm3, 0, %v995_v22 }
 0x16f   : > { %5840 = vst [vmem:[#allocation44_spill] sm:$0xff] %v4872_v2  ;;  %v4884_v39 = vsel %vm4355_vm3, %v995_v22, 0  ;;  %v4896_v15 = vshrl.u32 %v4872_v2, 16 }
 0x170   : > { %v1788_v31 = vor.u32 %v1787_v60, %v1786_v17  ;;  %5841 = vst [vmem:[#allocation45_spill] sm:$0xff] %v4884_v39  ;;  %v4891_v17 = vshll.u32 %v4872_v2, 16  ;;  %v4899_v50 = vshll.u32 %v4884_v39, 16  ;;  %v5790_v22 = vshrl.u32 %v4884_v39, 16 }
 0x171   : > { %3901 = vmatmul.msk.bf16.gmra.mxu3 %vm529_vm1, %v4825_v14  ;;  %v1594_v49 = vpop.f32.mrf.mxu0 }
 0x172   : > { %v1789_v61 = vsel %vm1672_vm6, %v1783_v54, %v1788_v31  ;;  %5842 = vst [vmem:[#allocation46_spill] sm:$0xff] %v4891_v17  ;;  %v3978_v54 = vld [vmem:[%s5742_s7 + $0x4] sm:$0x7]  ;;  %v1515_v31 = vrot.slane %v4872_v2, 1 }
 0x173   : > { %v1284_v58 = vpop.f32.mrf.mxu2 }
 0x174   : > { %v1395_v20 = vadd.f32 %v1394_v8, %v1284_v58  ;;  %v1397_v16 = vpop.f32.mrf.mxu3  ;;  %3916 = vmatmul.msk.bf16.gmra.mxu0 %vm529_vm1, %v1514_v0  ;;  %v2800_v8 = vld [vmem:[%s5742_s7] sm:$0x7] }
 0x176   : > { %v4866_v41 = vadd.f32 %v1591_v3, %v1395_v20  ;;  %v2869_v3 = vsel %vm554_vm0, 4294967295, %v4168_v56 }
 0x177   : > { %v4888_v4 = vsel %vm2868_vm10, %v2869_v3, 0  ;;  %v1791_v3 = vrot.slane %v4891_v17, 2 }
 0x178   : > { %5839 = vst [vmem:[#allocation43_spill] sm:$0xff] %v4866_v41  ;;  %3887 = vmatmul.msk.bf16.gmra.mxu2 %vm529_vm1, %v1198_v6  ;;  %v2932_v60 = vand.u32 %v4888_v4, %v2800_v8  ;;  %v2994_v58 = vand.u32 %v3995_v30, %v4888_v4  ;;  %v1204_v6 = vrot.slane %v4891_v17, 1  ;;  %v2872_v8 = vand.u32 %v3978_v54, %v4888_v4 }
 0x179   : > { %v1596_v44 = vpop.f32.mrf.mxu0  ;;  %v1795_v30 = vrot.slane %v5790_v22, 1  ;;  %v1209_v54 = vrot.slane %v4899_v50, 1 }
 0x17a   : > { %3931 = vmatmul.msk.bf16.gmra.mxu1 %vm529_vm1, %v1789_v61  ;;  %2941 = vmatpush.bf16.msrb.mxu2 %v2932_v60  ;;  %v4911_v61 = vpop.f32.mrf.mxu1 }
 0x17b   : > { %v1287_v53 = vpop.f32.mrf.mxu2  ;;  %3003 = vmatpush.bf16.msrb.mxu3 %v2994_v58  ;;  %2881 = vmatpush.bf16.msra.mxu1 %v2872_v8 }
 0x17c   : > { %v1398_v0 = vadd.f32 %v1397_v16, %v1287_v53  ;;  %v1399_v63 = vpop.f32.mrf.mxu3  ;;  %v1516_v16 = vrot.slane %v4884_v39, 1  ;;  %v1796_v53 = vrot.slane %v4899_v50, 2 }
 0x17e   : > { %v4902_v20 = vadd.f32 %v1594_v49, %v1398_v0  ;;  %v1790_v49 = vrot.slane %v4896_v15, 1  ;;  %v1517_v58 = vsel %vm1475_vm4, %v1515_v31, %v1516_v16  ;;  %v1205_v0 = vor.u32 %v1204_v6, %v4896_v15 }
 0x17f   : > { %v1797_v41 = vor.u32 %v1796_v53, %v1795_v30 }
 0x180   : > { %5843 = vst [vmem:[#allocation47_spill] sm:$0xff] %v4902_v20  ;;  %v1792_v20 = vor.u32 %v1791_v3, %v1790_v49  ;;  %v1210_v22 = vsel %vm1042_vm5, %v1205_v0, %v1209_v54 }
 0x181   : > { %3902 = vmatmul.msk.bf16.gmra.mxu3 %vm529_vm1, %v4872_v2  ;;  %v1599_v56 = vpop.f32.mrf.mxu0 }
 0x182   : > { %v1798_v39 = vsel %vm1672_vm6, %v1792_v20, %v1797_v41  ;;  %v4929_v31 = vpop.f32.mrf.mxu1 }
 0x183   : > { %v1289_v60 = vpop.f32.mrf.mxu2 }
 0x184   : > { %v1400_v7 = vadd.f32 %v1399_v63, %v1289_v60  ;;  %v1402_v2 = vpop.f32.mrf.mxu3  ;;  %3917 = vmatmul.msk.bf16.gmra.mxu0 %vm529_vm1, %v1517_v58 }
 0x186   : > { %v4924_v17 = vadd.f32 %v1596_v44, %v1400_v7 }
 0x188   : > { %3888 = vmatmul.msk.bf16.gmra.mxu2 %vm529_vm1, %v1210_v22 }
 0x189   : > { %v1601_v8 = vpop.f32.mrf.mxu0 }
 0x18a   : > { %3932 = vmatmul.msk.bf16.gmra.mxu1 %vm529_vm1, %v1798_v39 }
 0x18b   : > { %v1292_v16 = vpop.f32.mrf.mxu2 }
 0x18c   : > { %v1403_v63 = vadd.f32 %v1402_v2, %v1292_v16  ;;  %v1404_v6 = vpop.f32.mrf.mxu3 }
 0x18e   : > { %v4932_v60 = vadd.f32 %v1599_v56, %v1403_v63 }
 0x191   : > { %v1604_v49 = vpop.f32.mrf.mxu0  ;;  %3949 = vmatmul.msk.bf16.vlgmr.msra.gmra.mxu3 %vm529_vm1, %v4379_v33 }
 0x193   : > { %v1294_v7 = vpop.f32.mrf.mxu2 }
 0x194   : > { %v1405_v44 = vadd.f32 %v1404_v6, %v1294_v7  ;;  %v1407_v3 = vpop.f32.mrf.mxu3  ;;  %3964 = vmatmul.msk.bf16.vlgmr.msra.gmra.mxu0 %vm529_vm1, %v4372_v28 }
 0x196   : > { %v4938_v41 = vadd.f32 %v1601_v8, %v1405_v44 }
 0x198   : > { %3934 = vmatmul.msk.bf16.vlgmr.msra.gmra.mxu2 %vm529_vm1, %v4375_v29 }
 0x199   : > { %v1606_v39 = vpop.f32.mrf.mxu0 }
 0x19b   : > { %v1297_v2 = vpop.f32.mrf.mxu2 }
 0x19c   : > { %v1408_v22 = vadd.f32 %v1407_v3, %v1297_v2  ;;  %v1409_v20 = vpop.f32.mrf.mxu3  ;;  %v2413_v2 = vrot.slane %v4442_v27, 3 }
 0x19e   : > { %v4942_v56 = vadd.f32 %v1604_v49, %v1408_v22 }
 0x1a1   : > { %v1609_v30 = vpop.f32.mrf.mxu0  ;;  %3950 = vmatmul.msk.bf16.gmra.mxu3 %vm529_vm1, %v4398_v18 }
 0x1a3   : > { %v1299_v33 = vpop.f32.mrf.mxu2 }
 0x1a4   : > { %v1410_v53 = vadd.f32 %v1409_v20, %v1299_v33  ;;  %v1412_v58 = vpop.f32.mrf.mxu3  ;;  %3965 = vmatmul.msk.bf16.gmra.mxu0 %vm529_vm1, %v4394_v13 }
 0x1a6   : > { %v4948_v28 = vadd.f32 %v1606_v39, %v1410_v53 }
 0x1a8   : > { %3935 = vmatmul.msk.bf16.gmra.mxu2 %vm529_vm1, %v4401_v19 }
 0x1a9   : > { %v1611_v29 = vpop.f32.mrf.mxu0 }
 0x1ab   : > { %v1302_v0 = vpop.f32.mrf.mxu2 }
 0x1ac   : > { %v1413_v54 = vadd.f32 %v1412_v58, %v1302_v0  ;;  %v1414_v8 = vpop.f32.mrf.mxu3  ;;  %v2179_v0 = vrot.slane %v4489_v37, 2 }
 0x1ae   : > { %v4952_v16 = vadd.f32 %v1609_v30, %v1413_v54  ;;  %v1963_v30 = vrot.slane %v4442_v27, 2  ;;  %v5844_v54 = vshrl.u32 %v4477_v26, 16  ;;  %v2183_v27 = vrot.slane %v4495_v40, 3 }
 0x1b1   : > { %v1614_v63 = vpop.f32.mrf.mxu0  ;;  %3951 = vmatmul.msk.bf16.gmra.mxu3 %vm529_vm1, %v4424_v10  ;;  %v2414_v10 = vrot.slane %v4437_v23, 3 }
 0x1b3   : > { %v1304_v18 = vpop.f32.mrf.mxu2  ;;  %v2415_v20 = vsel %vm2403_vm7, %v2413_v2, %v2414_v10  ;;  %v1966_v10 = vrot.slane %v4482_v32, 2 }
 0x1b4   : > { %v1415_v6 = vadd.f32 %v1414_v8, %v1304_v18  ;;  %v1417_v49 = vpop.f32.mrf.mxu3  ;;  %3966 = vmatmul.msk.bf16.gmra.mxu0 %vm529_vm1, %v4420_v5  ;;  %v2182_v8 = vrot.slane %v5844_v54, 2 }
 0x1b6   : > { %v4958_v13 = vadd.f32 %v1611_v29, %v1415_v6 }
 0x1b8   : > { %3936 = vmatmul.msk.bf16.gmra.mxu2 %vm529_vm1, %v4427_v11  ;;  %v1964_v11 = vrot.slane %v4437_v23, 2 }
 0x1b9   : > { %v1616_v19 = vpop.f32.mrf.mxu0 }
 0x1ba   : > { %v1965_v29 = vsel %vm1953_vm8, %v1963_v30, %v1964_v11 }
 0x1bb   : > { %v1307_v7 = vpop.f32.mrf.mxu2 }
 0x1bc   : > { %v1418_v44 = vadd.f32 %v1417_v49, %v1307_v7  ;;  %v1419_v3 = vpop.f32.mrf.mxu3 }
 0x1be   : > { %v4962_v39 = vadd.f32 %v1614_v63, %v1418_v44  ;;  %v2416_v44 = vrot.slane %v4482_v32, 3  ;;  %v5845_v32 = vshrl.u32 %v4525_v36, 16 }
 0x1c1   : > { %v1619_v22 = vpop.f32.mrf.mxu0  ;;  %3952 = vmatmul.msk.bf16.gmra.mxu3 %vm529_vm1, %v4712_v34  ;;  %v2180_v34 = vrot.slane %v4492_v38, 3 }
 0x1c3   : > { %v1309_v5 = vpop.f32.mrf.mxu2  ;;  %v2181_v49 = vor.u32 %v2180_v34, %v2179_v0  ;;  %v2189_v0 = vrot.slane %v5845_v32, 2 }
 0x1c4   : > { %v1420_v33 = vadd.f32 %v1419_v3, %v1309_v5  ;;  %v1422_v53 = vpop.f32.mrf.mxu3  ;;  %3967 = vmatmul.msk.bf16.gmra.mxu0 %vm529_vm1, %v2415_v20  ;;  %v2417_v3 = vrot.slane %v4477_v26, 3  ;;  %v1967_v5 = vrot.slane %v4477_v26, 2  ;;  %v4990_v20 = vpop.f32.mrf.mxu1  ;;  %v2190_v26 = vrot.slane %v4543_v51, 3 }
 0x1c6   : > { %v4972_v58 = vadd.f32 %v1616_v19, %v1420_v33  ;;  %v2184_v19 = vor.u32 %v2183_v27, %v2182_v8  ;;  %v2418_v40 = vsel %vm2403_vm7, %v2416_v44, %v2417_v3  ;;  %v1968_v33 = vsel %vm1953_vm8, %v1966_v10, %v1967_v5 }
 0x1c7   : > { %v1969_v3 = vrot.slane %v4530_v42, 2 }
 0x1c8   : > { %3937 = vmatmul.msk.bf16.gmra.mxu2 %vm529_vm1, %v1965_v29  ;;  %v2185_v37 = vsel %vm2150_vm9, %v2181_v49, %v2184_v19  ;;  %v2187_v29 = vrot.slane %v4540_v46, 3  ;;  %v2419_v49 = vrot.slane %v4530_v42, 3  ;;  %v5846_v42 = vshrl.u32 %v4573_v62, 16 }
 0x1c9   : > { %v1621_v23 = vpop.f32.mrf.mxu0 }
 0x1cb   : > { %v1312_v63 = vpop.f32.mrf.mxu2 }
 0x1cc   : > { %v1423_v18 = vadd.f32 %v1422_v53, %v1312_v63  ;;  %v1424_v6 = vpop.f32.mrf.mxu3  ;;  %v2186_v53 = vrot.slane %v4537_v45, 2  ;;  %v2420_v45 = vrot.slane %v4525_v36, 3 }
 0x1ce   : > { %v4981_v7 = vadd.f32 %v1619_v22, %v1423_v18  ;;  %v2188_v63 = vor.u32 %v2187_v29, %v2186_v53  ;;  %v5002_v18 = vpop.f32.mrf.mxu1  ;;  %v2421_v44 = vsel %vm2403_vm7, %v2419_v49, %v2420_v45  ;;  %v1972_v49 = vrot.slane %v4578_v1, 2 }
 0x1cf   : > { %v1973_v45 = vrot.slane %v4573_v62, 2 }
 0x1d1   : > { %v1624_v38 = vpop.f32.mrf.mxu0  ;;  %3953 = vmatmul.msk.bf16.gmra.mxu3 %vm529_vm1, %v2185_v37  ;;  %v1970_v37 = vrot.slane %v4525_v36, 2  ;;  %v2197_v36 = vrot.slane %v4591_v24, 3 }
 0x1d3   : > { %v1314_v2 = vpop.f32.mrf.mxu2  ;;  %v1971_v10 = vsel %vm1953_vm8, %v1969_v3, %v1970_v37  ;;  %v2200_v3 = vrot.slane %v4636_v47, 2  ;;  %v5848_v37 = vld [vmem:[#allocation18_spill] sm:$0xff] }
 0x1d4   : > { %v1425_v22 = vadd.f32 %v1424_v6, %v1314_v2  ;;  %v1427_v30 = vpop.f32.mrf.mxu3  ;;  %3968 = vmatmul.msk.bf16.gmra.mxu0 %vm529_vm1, %v2418_v40 }
 0x1d6   : > { %v4993_v11 = vadd.f32 %v1621_v23, %v1425_v22  ;;  %v2191_v23 = vor.u32 %v2190_v26, %v2189_v0  ;;  %v5017_v5 = vpop.f32.mrf.mxu1  ;;  %v2193_v22 = vrot.slane %v4585_v9, 2 }
 0x1d8   : > { %3938 = vmatmul.msk.bf16.gmra.mxu2 %vm529_vm1, %v1968_v33  ;;  %v2192_v46 = vsel %vm2150_vm9, %v2188_v63, %v2191_v23  ;;  %v2196_v33 = vrot.slane %v5846_v42, 2  ;;  %v4004_v42 = vld [vmem:[%s5742_s7 + $0xc] sm:$0x7] }
 0x1d9   : > { %v1626_v34 = vpop.f32.mrf.mxu0 }
 0x1db   : > { %v1317_v54 = vpop.f32.mrf.mxu2 }
 0x1dc   : > { %v1428_v8 = vadd.f32 %v1427_v30, %v1317_v54  ;;  %v1429_v27 = vpop.f32.mrf.mxu3  ;;  %v2194_v30 = vrot.slane %v4588_v12, 3 }
 0x1de   : > { %v5004_v6 = vadd.f32 %v1624_v38, %v1428_v8  ;;  %v2195_v26 = vor.u32 %v2194_v30, %v2193_v22  ;;  %v2422_v8 = vrot.slane %v4578_v1, 3  ;;  %v5031_v63 = vpop.f32.mrf.mxu1  ;;  %v5851_v1 = vld [vmem:[#allocation19_spill] sm:$0xff] }
 0x1df   : > { %v2204_v30 = vrot.slane %v5851_v1, 3 }
 0x1e1   : > { %v1629_v19 = vpop.f32.mrf.mxu0  ;;  %3954 = vmatmul.msk.bf16.gmra.mxu3 %vm529_vm1, %v2192_v46 }
 0x1e3   : > { %v1319_v51 = vpop.f32.mrf.mxu2 }
 0x1e4   : > { %v1430_v2 = vadd.f32 %v1429_v27, %v1319_v51  ;;  %v1432_v40 = vpop.f32.mrf.mxu3  ;;  %3969 = vmatmul.msk.bf16.gmra.mxu0 %vm529_vm1, %v2421_v44  ;;  %v2423_v27 = vrot.slane %v4573_v62, 3  ;;  %v1974_v44 = vsel %vm1953_vm8, %v1972_v49, %v1973_v45 }
 0x1e6   : > { %v5014_v38 = vadd.f32 %v1626_v34, %v1430_v2  ;;  %v2198_v34 = vor.u32 %v2197_v36, %v2196_v33  ;;  %v2424_v23 = vsel %vm2403_vm7, %v2422_v8, %v2423_v27  ;;  %v2201_v2 = vrot.slane %v5848_v37, 3 }
 0x1e7   : > { %v3072_v33 = vand.u32 %v4004_v42, %v4888_v4 }
 0x1e8   : > { %3939 = vmatmul.msk.bf16.gmra.mxu2 %vm529_vm1, %v1971_v10  ;;  %v2199_v9 = vsel %vm2150_vm9, %v2195_v26, %v2198_v34  ;;  %v2202_v47 = vor.u32 %v2201_v2, %v2200_v3  ;;  %v5853_v34 = vld [vmem:[#allocation17_spill] sm:$0xff]  ;;  %v5855_v2 = vld [vmem:[#allocation23_spill] sm:$0xff] }
 0x1e9   : > { %v1631_v53 = vpop.f32.mrf.mxu0  ;;  %3081 = vmatpush.bf16.msrb.mxu0 %v3072_v33  ;;  %v2425_v8 = vrot.slane %v5853_v34, 3  ;;  %v1975_v45 = vrot.slane %v5853_v34, 2 }
 0x1eb   : > { %v1322_v29 = vpop.f32.mrf.mxu2 }
 0x1ec   : > { %v1433_v32 = vadd.f32 %v1432_v40, %v1322_v29  ;;  %v1434_v0 = vpop.f32.mrf.mxu3  ;;  %v5849_v40 = vld [vmem:[#allocation16_spill] sm:$0xff] }
 0x1ed   : > { %v5850_v10 = vshrl.u32 %v5849_v40, 16  ;;  %v2426_v27 = vrot.slane %v5849_v40, 3 }
 0x1ee   : > { %v5025_v54 = vadd.f32 %v1629_v19, %v1433_v32 }
 0x1ef   : > { %v2203_v22 = vrot.slane %v5850_v10, 2  ;;  %v2427_v49 = vsel %vm2403_vm7, %v2425_v8, %v2426_v27  ;;  %v2207_v10 = vrot.slane %v5855_v2, 2  ;;  %v5861_v27 = vld [vmem:[#allocation22_spill] sm:$0xff] }
 0x1f1   : > { %v1634_v12 = vpop.f32.mrf.mxu0  ;;  %3955 = vmatmul.msk.bf16.gmra.mxu3 %vm529_vm1, %v2199_v9 }
 0x1f3   : > { %v1324_v24 = vpop.f32.mrf.mxu2 }
 0x1f4   : > { %v1435_v46 = vadd.f32 %v1434_v0, %v1324_v24  ;;  %v1437_v19 = vpop.f32.mrf.mxu3  ;;  %3970 = vmatmul.msk.bf16.gmra.mxu0 %vm529_vm1, %v2424_v23  ;;  %v2205_v0 = vor.u32 %v2204_v30, %v2203_v22  ;;  %v5856_v22 = vld [vmem:[#allocation24_spill] sm:$0xff]  ;;  %v5857_v30 = vld [vmem:[#allocation21_spill] sm:$0xff] }
 0x1f5   : > { %v2208_v1 = vrot.slane %v5856_v22, 3  ;;  %v5858_v42 = vshrl.u32 %v5857_v30, 16  ;;  %v1979_v2 = vrot.slane %v5857_v30, 2 }
 0x1f6   : > { %v5037_v51 = vadd.f32 %v1631_v53, %v1435_v46  ;;  %v5050_v53 = vpop.f32.mrf.mxu1  ;;  %v2206_v9 = vsel %vm2150_vm9, %v2202_v47, %v2205_v0  ;;  %v1976_v46 = vrot.slane %v5849_v40, 2  ;;  %v5859_v40 = vld [vmem:[#allocation25_spill] sm:$0xff] }
 0x1f7   : > { %v2210_v33 = vrot.slane %v5858_v42, 2  ;;  %v2209_v34 = vor.u32 %v2208_v1, %v2207_v10  ;;  %v5863_v42 = vld [vmem:[#allocation29_spill] sm:$0xff] }
 0x1f8   : > { %5847 = vst [vmem:[#allocation48_spill] sm:$0xff] %v5037_v51  ;;  %3940 = vmatmul.msk.bf16.gmra.mxu2 %vm529_vm1, %v1974_v44  ;;  %v1977_v37 = vsel %vm1953_vm8, %v1975_v45, %v1976_v46 }
 0x1f9   : > { %v1636_v62 = vpop.f32.mrf.mxu0 }
 0x1fb   : > { %v1327_v36 = vpop.f32.mrf.mxu2 }
 0x1fc   : > { %v1438_v29 = vadd.f32 %v1437_v19, %v1327_v36  ;;  %v1439_v32 = vpop.f32.mrf.mxu3  ;;  %v2211_v36 = vrot.slane %v5859_v40, 3  ;;  %v5864_v40 = vld [vmem:[#allocation30_spill] sm:$0xff] }
 0x1fe   : > { %v5052_v26 = vadd.f32 %v1634_v12, %v1438_v29  ;;  %v5062_v12 = vpop.f32.mrf.mxu1 }
 0x200   : > { %5852 = vst [vmem:[#allocation18_spill] sm:$0xff] %v5052_v26 }
 0x201   : > { %v1639_v24 = vpop.f32.mrf.mxu0  ;;  %3956 = vmatmul.msk.bf16.gmra.mxu3 %vm529_vm1, %v2206_v9  ;;  %v2428_v9 = vrot.slane %v5861_v27, 3 }
 0x203   : > { %v1329_v23 = vpop.f32.mrf.mxu2 }
 0x204   : > { %v1440_v19 = vadd.f32 %v1439_v32, %v1329_v23  ;;  %v1442_v44 = vpop.f32.mrf.mxu3  ;;  %3971 = vmatmul.msk.bf16.gmra.mxu0 %vm529_vm1, %v2427_v49  ;;  %v2429_v23 = vrot.slane %v5857_v30, 3 }
 0x206   : > { %v5064_v3 = vadd.f32 %v1636_v62, %v1440_v19  ;;  %v2212_v62 = vor.u32 %v2211_v36, %v2210_v33  ;;  %v5077_v49 = vpop.f32.mrf.mxu1  ;;  %v2214_v33 = vrot.slane %v5863_v42, 2  ;;  %v2215_v36 = vrot.slane %v5864_v40, 3 }
 0x208   : > { %5854 = vst [vmem:[#allocation16_spill] sm:$0xff] %v5064_v3  ;;  %3941 = vmatmul.msk.bf16.gmra.mxu2 %vm529_vm1, %v1977_v37  ;;  %v2213_v45 = vsel %vm2150_vm9, %v2209_v34, %v2212_v62  ;;  %v2430_v37 = vsel %vm2403_vm7, %v2428_v9, %v2429_v23  ;;  %v5867_v62 = vld [vmem:[#allocation31_spill] sm:$0xff]  ;;  %v5868_v9 = vld [vmem:[#allocation26_spill] sm:$0xff]  ;;  %v5879_v3 = vld [vmem:[#allocation33_spill] sm:$0xff] }
 0x209   : > { %v1641_v29 = vpop.f32.mrf.mxu0  ;;  %v2434_v26 = vrot.slane %v5879_v3, 3 }
 0x20b   : > { %v1332_v32 = vpop.f32.mrf.mxu2 }
 0x20c   : > { %v1443_v47 = vadd.f32 %v1442_v44, %v1332_v32  ;;  %v1444_v0 = vpop.f32.mrf.mxu3  ;;  %v1978_v44 = vrot.slane %v5861_v27, 2  ;;  %v5865_v32 = vld [vmem:[#allocation27_spill] sm:$0xff]  ;;  %v2218_v27 = vrot.slane %v5867_v62, 3 }
 0x20d   : > { %v2432_v40 = vrot.slane %v5865_v32, 3 }
 0x20e   : > { %v5073_v8 = vadd.f32 %v1639_v24, %v1443_v47  ;;  %v1980_v1 = vsel %vm1953_vm8, %v1978_v44, %v1979_v2  ;;  %v5866_v47 = vshrl.u32 %v5865_v32, 16 }
 0x210   : > { %5860 = vst [vmem:[#allocation19_spill] sm:$0xff] %v5073_v8  ;;  %v2217_v34 = vrot.slane %v5866_v47, 2 }
 0x211   : > { %3957 = vmatmul.msk.bf16.gmra.mxu3 %vm529_vm1, %v2213_v45  ;;  %v2502_v46 = vpop.f32.mrf.mxu0 }
 0x212   : > { %v2219_v44 = vor.u32 %v2218_v27, %v2217_v34 }
 0x213   : > { %v1334_v19 = vpop.f32.mrf.mxu2 }
 0x214   : > { %v1445_v24 = vadd.f32 %v1444_v0, %v1334_v19  ;;  %v2305_v10 = vpop.f32.mrf.mxu3  ;;  %3972 = vmatmul.msk.bf16.gmra.mxu0 %vm529_vm1, %v2430_v37  ;;  %v5094_v0 = vpop.f32.mrf.mxu1  ;;  %v2216_v37 = vor.u32 %v2215_v36, %v2214_v33  ;;  %v5870_v36 = vld [vmem:[#allocation32_spill] sm:$0xff] }
 0x216   : > { %v5085_v22 = vadd.f32 %v1641_v29, %v1445_v24  ;;  %v1925_v29 = vadd.f32 %v4836_v35, %v5868_v9  ;;  %v5101_v24 = vld [vmem:[%s5741_s6] ss:$0 sm:$0xff]  ;;  %v2220_v62 = vsel %vm2150_vm9, %v2216_v37, %v2219_v44  ;;  %v5117_v37 = vstv %s4271_s13 }
 0x217   : > { %vm2702_vm11 = vcmp.ge.s32.totalorder %v5117_v37, 0  ;;  %vm2716_vm12 = vcmp.lt.s32.totalorder %v5117_v37, 16 }
 0x218   : > { %5862 = vst [vmem:[#allocation17_spill] sm:$0xff] %v5085_v22  ;;  %3942 = vmatmul.msk.bf16.gmra.mxu2 %vm529_vm1, %v1980_v1  ;;  %v5869_v1 = vld [vmem:[#allocation28_spill] sm:$0xff]  ;;  %vm5131_vm13 = vmand %vm2702_vm11, %vm2716_vm12 }
 0x219   : > { %v2504_v30 = vpop.f32.mrf.mxu0  ;;  %v2431_v42 = vrot.slane %v5869_v1, 3  ;;  %v1981_v9 = vrot.slane %v5869_v1, 2 }
 0x21b   : > { %v2052_v23 = vpop.f32.mrf.mxu2  ;;  %v2433_v27 = vsel %vm2403_vm7, %v2431_v42, %v2432_v40  ;;  %v5873_v40 = vld [vmem:[#allocation34_spill] sm:$0xff] }
 0x21c   : > { %v2122_v45 = vadd.f32 %v2052_v23, %v1925_v29  ;;  %v2307_v19 = vpop.f32.mrf.mxu3  ;;  %v1982_v29 = vrot.slane %v5865_v32, 2  ;;  %v5113_v23 = vpop.f32.mrf.mxu1  ;;  %v5874_v1 = vshrl.u32 %v5873_v40, 16 }
 0x21e   : > { %v2375_v2 = vadd.f32 %v2305_v10, %v2122_v45  ;;  %v1926_v10 = vadd.f32 %v4864_v55, %v5870_v36  ;;  %v5871_v55 = vld [vmem:[#allocation36_spill] sm:$0xff]  ;;  %v5872_v36 = vld [vmem:[#allocation35_spill] sm:$0xff]  ;;  %v2224_v22 = vrot.slane %v5874_v1, 2 }
 0x21f   : > { %v2222_v42 = vrot.slane %v5872_v36, 3 }
 0x220   : > { %v2572_v47 = vadd.f32 %v2502_v46, %v2375_v2 }
 0x221   : > { %3958 = vmatmul.msk.bf16.gmra.mxu3 %vm529_vm1, %v2220_v62  ;;  %v2507_v35 = vpop.f32.mrf.mxu0  ;;  %v2221_v62 = vrot.slane %v5871_v55, 2 }
 0x222   : > { %v2604_v33 = vadd.f32 %v5101_v24, %v2572_v47  ;;  %v1983_v47 = vsel %vm1953_vm8, %v1981_v9, %v1982_v29  ;;  %v5876_v9 = vld [vmem:[#allocation38_spill] sm:$0xff] }
 0x223   : > { %v2054_v34 = vpop.f32.mrf.mxu2  ;;  %v1927_v29 = vadd.f32 %v4911_v61, %v5876_v9  ;;  %v2435_v61 = vrot.slane %v5873_v40, 3 }
 0x224   : > { %v2123_v46 = vadd.f32 %v2054_v34, %v1926_v10  ;;  %v2310_v45 = vpop.f32.mrf.mxu3  ;;  %3973 = vmatmul.msk.bf16.gmra.mxu0 %vm529_vm1, %v2433_v27  ;;  %v2632_v44 = vmax.f32 %v2604_v33, 0.0  ;;  %v5875_v10 = vld [vmem:[#allocation37_spill] sm:$0xff] }
 0x225   : > { %v2225_v34 = vrot.slane %v5875_v10, 3 }
 0x226   : > { %v2376_v2 = vadd.f32 %v2307_v19, %v2123_v46  ;;  %v2660_v19 = vpack.c.bf16 %v2632_v44, %v2632_v44 }
 0x228   : > { %v2573_v32 = vadd.f32 %v2504_v30, %v2376_v2  ;;  %3943 = vmatmul.msk.bf16.gmra.mxu2 %vm529_vm1, %v1983_v47  ;;  %v2223_v30 = vor.u32 %v2222_v42, %v2221_v62  ;;  %v2226_v2 = vor.u32 %v2225_v34, %v2224_v22  ;;  %v5135_v47 = vpop.f32.mrf.mxu1  ;;  %v2772_v44 = vsel %vm5131_vm13, %v2660_v19, 0 }
 0x229   : > { %v2509_v33 = vpop.f32.mrf.mxu0 }
 0x22a   : > { %v2605_v27 = vadd.f32 %v5101_v24, %v2573_v32 }
 0x22b   : > { %v2057_v55 = vpop.f32.mrf.mxu2 }
 0x22c   : > { %v2633_v36 = vmax.f32 %v2605_v27, 0.0  ;;  %v2124_v1 = vadd.f32 %v2057_v55, %v1927_v29  ;;  %v2312_v8 = vpop.f32.mrf.mxu3  ;;  %v2227_v27 = vsel %vm2150_vm9, %v2223_v30, %v2226_v2  ;;  %v5144_v29 = vunpack.c.l.b16 %v2772_v44 }
 0x22d   : > { %v1984_v55 = vrot.slane %v5879_v3, 2 }
 0x22e   : > { %v2661_v10 = vpack.c.bf16 %v2633_v36, %v2633_v36  ;;  %v2377_v32 = vadd.f32 %v2310_v45, %v2124_v1  ;;  %v5880_v45 = vld [vmem:[#allocation39_spill] sm:$0xff]  ;;  %v1985_v36 = vrot.slane %v5873_v40, 2  ;;  %v2689_v1 = vadd.s32 1, %v5117_v37 }
 0x22f   : > { %v1928_v34 = vadd.f32 %v4929_v31, %v5880_v45 }
 0x230   : > { %v2773_v9 = vsel %vm5131_vm13, %v2661_v10, 0  ;;  %v2574_v51 = vadd.f32 %v2507_v35, %v2377_v32  ;;  %v2436_v35 = vsel %vm2403_vm7, %v2434_v26, %v2435_v61  ;;  %v1986_v31 = vsel %vm1953_vm8, %v1984_v55, %v1985_v36  ;;  %v5160_v10 = vpop.f32.mrf.mxu1  ;;  %v5881_v61 = vld [vmem:[#allocation42_spill] sm:$0xff]  ;;  %v5882_v55 = vld [vmem:[#allocation40_spill] sm:$0xff] }
 0x231   : > { %v5146_v22 = vunpack.c.l.b16 %v2773_v9  ;;  %3959 = vmatmul.msk.bf16.gmra.mxu3 %vm529_vm1, %v2227_v27  ;;  %v2512_v62 = vpop.f32.mrf.mxu0  ;;  %vm2703_vm14 = vcmp.ge.s32.totalorder %v2689_v1, 0  ;;  %vm2717_vm15 = vcmp.lt.s32.totalorder %v2689_v1, 16  ;;  %v1929_v9 = vadd.f32 %v4990_v20, %v5881_v61 }
 0x232   : > { %v2606_v42 = vadd.f32 %v5101_v24, %v2574_v51  ;;  %vm2731_vm0 = vmand %vm2703_vm14, %vm2717_vm15  ;;  %v2437_v36 = vrot.slane %v5882_v55, 3 }
 0x233   : > { %v2927_v19 = vpack.c.b16 %v5146_v22, %v5144_v29  ;;  %v2059_v46 = vpop.f32.mrf.mxu2 }
 0x234   : > { %v2125_v30 = vadd.f32 %v2059_v46, %v1928_v34  ;;  %v2315_v2 = vpop.f32.mrf.mxu3  ;;  %3974 = vmatmul.msk.bf16.gmra.mxu0 %vm529_vm1, %v2436_v35  ;;  %v2634_v51 = vmax.f32 %v2606_v42, 0.0 }
 0x236   : > { %v2378_v44 = vadd.f32 %v2312_v8, %v2125_v30  ;;  %v2662_v3 = vpack.c.bf16 %v2634_v51, %v2634_v51 }
 0x238   : > { %v2575_v32 = vadd.f32 %v2509_v33, %v2378_v44  ;;  %3944 = vmatmul.msk.bf16.gmra.mxu2 %vm529_vm1, %v1986_v31  ;;  %v2774_v34 = vsel %vm2731_vm0, %v2662_v3, 0  ;;  %v5883_v33 = vld [vmem:[#allocation41_spill] sm:$0xff]  ;;  %v1930_v3 = vadd.f32 %v5002_v18, %v4819_v52 }
 0x239   : > { %v2514_v26 = vpop.f32.mrf.mxu0  ;;  %v2438_v1 = vrot.slane %v5883_v33, 3  ;;  %v2819_v51 = vunpack.c.l.b16 %v2774_v34 }
 0x23a   : > { %v2607_v40 = vadd.f32 %v5101_v24, %v2575_v32  ;;  %v5170_v32 = vpop.f32.mrf.mxu1 }
 0x23b   : > { %v2062_v27 = vpop.f32.mrf.mxu2 }
 0x23c   : > { %v2635_v42 = vmax.f32 %v2607_v40, 0.0  ;;  %v2126_v8 = vadd.f32 %v2062_v27, %v1929_v9  ;;  %v2317_v45 = vpop.f32.mrf.mxu3  ;;  %v2439_v9 = vsel %vm2403_vm7, %v2437_v36, %v2438_v1  ;;  %v1988_v27 = vrot.slane %v5883_v33, 2 }
 0x23d   : > { %v2239_v1 = vrot.slane %v4845_v57, 3 }
 0x23e   : > { %v2663_v46 = vpack.c.bf16 %v2635_v42, %v2635_v42  ;;  %v2379_v35 = vadd.f32 %v2315_v2, %v2126_v8 }
 0x240   : > { %v2775_v30 = vsel %vm2731_vm0, %v2663_v46, 0  ;;  %v2576_v44 = vadd.f32 %v2512_v62, %v2379_v35  ;;  %v1987_v62 = vrot.slane %v5882_v55, 2  ;;  %v2235_v46 = vrot.slane %v4842_v25, 2 }
 0x241   : > { %v2820_v31 = vunpack.c.l.b16 %v2775_v30  ;;  %3960 = vmatmul.msk.bf16.gmra.mxu3 %vm529_vm1, %v4839_v43  ;;  %v2517_v20 = vpop.f32.mrf.mxu0  ;;  %v2690_v43 = vadd.s32 2, %v5117_v37  ;;  %v2236_v35 = vrot.slane %v4834_v21, 3  ;;  %v5884_v55 = vshrl.u32 %v4830_v59, 16 }
 0x242   : > { %v2608_v40 = vadd.f32 %v5101_v24, %v2576_v44  ;;  %v1989_v34 = vsel %vm1953_vm8, %v1987_v62, %v1988_v27 }
 0x243   : > { %v5175_v2 = vpack.c.b16 %v2820_v31, %v2819_v51  ;;  %v2064_v61 = vpop.f32.mrf.mxu2  ;;  %v2238_v36 = vrot.slane %v5884_v55, 2  ;;  %vm2704_vm3 = vcmp.ge.s32.totalorder %v2690_v43, 0  ;;  %vm2718_vm4 = vcmp.lt.s32.totalorder %v2690_v43, 16  ;;  %v5198_v31 = vpop.f32.mrf.mxu1  ;;  %v5887_v55 = vld [vmem:[#allocation43_spill] sm:$0xff] }
 0x244   : > { %v2127_v42 = vadd.f32 %v2064_v61, %v1930_v3  ;;  %v2320_v8 = vpop.f32.mrf.mxu3  ;;  %3975 = vmatmul.msk.bf16.gmra.mxu0 %vm529_vm1, %v2439_v9  ;;  %v2636_v52 = vmax.f32 %v2608_v40, 0.0  ;;  %v1931_v51 = vadd.f32 %v5017_v5, %v4848_v48  ;;  %vm5194_vm5 = vmand %vm2704_vm3, %vm2718_vm4  ;;  %v2237_v61 = vor.u32 %v2236_v35, %v2235_v46 }
 0x245   : > { %3979 = vmatmul.msk.bf16.vlgmr.msra.gmra.mxu1 %vm2843_vm2, %v5175_v2  ;;  %v2240_v9 = vor.u32 %v2239_v1, %v2238_v36  ;;  %v2440_v43 = vrot.slane %v4825_v14, 3  ;;  %v2441_v48 = vrot.slane %v4830_v59, 3 }
 0x246   : > { %v2380_v18 = vadd.f32 %v2317_v45, %v2127_v42  ;;  %v2664_v44 = vpack.c.bf16 %v2636_v52, %v2636_v52 }
 0x247   : > { %v2241_v42 = vsel %vm2150_vm9, %v2237_v61, %v2240_v9  ;;  %v2242_v61 = vrot.slane %v4896_v15, 2 }
 0x248   : > { %v2577_v33 = vadd.f32 %v2514_v26, %v2380_v18  ;;  %3945 = vmatmul.msk.bf16.gmra.mxu2 %vm529_vm1, %v1989_v34  ;;  %v2776_v57 = vsel %vm5194_vm5, %v2664_v44, 0  ;;  %v1991_v44 = vrot.slane %v4830_v59, 2  ;;  %v5889_v59 = vld [vmem:[#allocation45_spill] sm:$0xff] }
 0x249   : > { %v2519_v30 = vpop.f32.mrf.mxu0  ;;  %v2821_v34 = vunpack.c.l.b16 %v2776_v57  ;;  %v5890_v57 = vshrl.u32 %v5889_v59, 16 }
 0x24a   : > { %v2609_v45 = vadd.f32 %v5101_v24, %v2577_v33  ;;  %v2442_v33 = vsel %vm2403_vm7, %v2440_v43, %v2441_v48  ;;  %v2246_v43 = vrot.slane %v4899_v50, 3 }
 0x24b   : > { %v2067_v21 = vpop.f32.mrf.mxu2 }
 0x24c   : > { %v2637_v40 = vmax.f32 %v2609_v45, 0.0  ;;  %v2128_v26 = vadd.f32 %v2067_v21, %v1931_v51  ;;  %v2322_v3 = vpop.f32.mrf.mxu3  ;;  %v2691_v45 = vadd.s32 3, %v5117_v37  ;;  %v5220_v21 = vpop.f32.mrf.mxu1 }
 0x24e   : > { %v2665_v62 = vpack.c.bf16 %v2637_v40, %v2637_v40  ;;  %v2381_v27 = vadd.f32 %v2320_v8, %v2128_v26  ;;  %v1932_v8 = vadd.f32 %v5031_v63, %v5887_v55  ;;  %vm2705_vm6 = vcmp.ge.s32.totalorder %v2691_v45, 0 }
 0x24f   : > { %vm2719_vm11 = vcmp.lt.s32.totalorder %v2691_v45, 16  ;;  %v2444_v45 = vrot.slane %v5889_v59, 3 }
 0x250   : > { %v2578_v5 = vadd.f32 %v2517_v20, %v2381_v27  ;;  %v2777_v52 = vsel %vm5194_vm5, %v2665_v62, 0  ;;  %v1990_v20 = vrot.slane %v4825_v14, 2  ;;  %v5888_v14 = vld [vmem:[#allocation46_spill] sm:$0xff]  ;;  %v2245_v62 = vrot.slane %v5890_v57, 2  ;;  %vm5232_vm12 = vmand %vm2705_vm6, %vm2719_vm11 }
 0x251   : > { %3961 = vmatmul.msk.bf16.gmra.mxu3 %vm529_vm1, %v2241_v42  ;;  %v2522_v18 = vpop.f32.mrf.mxu0  ;;  %v2822_v46 = vunpack.c.l.b16 %v2777_v52  ;;  %v2243_v9 = vrot.slane %v5888_v14, 3  ;;  %v5891_v42 = vld [vmem:[#allocation47_spill] sm:$0xff] }
 0x252   : > { %v2610_v35 = vadd.f32 %v5101_v24, %v2578_v5  ;;  %v1992_v26 = vsel %vm1953_vm8, %v1990_v20, %v1991_v44  ;;  %v1933_v52 = vadd.f32 %v5050_v53, %v5891_v42  ;;  %v5894_v20 = vld [vmem:[#allocation44_spill] sm:$0xff]  ;;  %v2692_v42 = vadd.s32 4, %v5117_v37 }
 0x253   : > { %v2069_v36 = vpop.f32.mrf.mxu2  ;;  %v5212_v1 = vpack.c.b16 %v2822_v46, %v2821_v34  ;;  %v2443_v44 = vrot.slane %v5894_v20, 3 }
 0x254   : > { %v2129_v51 = vadd.f32 %v2069_v36, %v1932_v8  ;;  %v2325_v25 = vpop.f32.mrf.mxu3  ;;  %3976 = vmatmul.msk.bf16.gmra.mxu0 %vm529_vm1, %v2442_v33  ;;  %v2638_v63 = vmax.f32 %v2610_v35, 0.0  ;;  %v2247_v8 = vor.u32 %v2246_v43, %v2245_v62  ;;  %v5240_v53 = vpop.f32.mrf.mxu1  ;;  %v1994_v43 = vrot.slane %v5889_v59, 2 }
 0x255   : > { %3980 = vmatmul.msk.bf16.gmra.mxu1 %vm2843_vm2, %v5212_v1  ;;  %v2445_v62 = vsel %vm2403_vm7, %v2443_v44, %v2444_v45  ;;  %vm2706_vm7 = vcmp.ge.s32.totalorder %v2692_v42, 0 }
 0x256   : > { %v2382_v40 = vadd.f32 %v2322_v3, %v2129_v51  ;;  %v2666_v5 = vpack.c.bf16 %v2638_v63, %v2638_v63 }
 0x258   : > { %v2579_v27 = vadd.f32 %v2519_v30, %v2382_v40  ;;  %3946 = vmatmul.msk.bf16.gmra.mxu2 %vm529_vm1, %v1992_v26  ;;  %v2244_v30 = vor.u32 %v2243_v9, %v2242_v61  ;;  %v2778_v50 = vsel %vm5232_vm12, %v2666_v5, 0  ;;  %v4022_v5 = vld [vmem:[%s5742_s7 + $0x14] sm:$0x7] }
 0x259   : > { %v2524_v48 = vpop.f32.mrf.mxu0  ;;  %v2823_v61 = vunpack.c.l.b16 %v2778_v50 }
 0x25a   : > { %v2611_v3 = vadd.f32 %v5101_v24, %v2579_v27  ;;  %v2248_v63 = vsel %vm2150_vm9, %v2244_v30, %v2247_v8  ;;  %vm2720_vm9 = vcmp.lt.s32.totalorder %v2692_v42, 16  ;;  %v4013_v8 = vld [vmem:[%s5742_s7 + $0x10] sm:$0x7] }
 0x25b   : > { %v2072_v34 = vpop.f32.mrf.mxu2 }
 0x25c   : > { %v2639_v46 = vmax.f32 %v2611_v3, 0.0  ;;  %v2130_v35 = vadd.f32 %v2072_v34, %v1933_v52  ;;  %v2327_v55 = vpop.f32.mrf.mxu3  ;;  %v4031_v3 = vld [vmem:[%s5742_s7 + $0x18] sm:$0x7]  ;;  %v3228_v52 = vand.u32 %v4022_v5, %v4888_v4  ;;  %v5271_v50 = vpop.f32.mrf.mxu1  ;;  %v2693_v5 = vadd.s32 5, %v5117_v37 }
 0x25d   : > { %v3306_v15 = vand.u32 %v4031_v3, %v4888_v4 }
 0x25e   : > { %v2667_v36 = vpack.c.bf16 %v2639_v46, %v2639_v46  ;;  %v2383_v33 = vadd.f32 %v2325_v25, %v2130_v35  ;;  %v1934_v25 = vadd.f32 %v5062_v12, %v4924_v17  ;;  %3237 = vmatpush.bf16.msra.mxu2 %v3228_v52  ;;  %vm2721_vm13 = vcmp.lt.s32.totalorder %v2693_v5, 16 }
 0x25f   : > { %3315 = vmatpush.bf16.msra.mxu3 %v3306_v15  ;;  %v1937_v15 = vadd.f32 %v5113_v23, %v4942_v56  ;;  %v1938_v23 = vadd.f32 %v5135_v47, %v4948_v28 }
 0x260   : > { %v2580_v51 = vadd.f32 %v2522_v18, %v2383_v33  ;;  %v2779_v40 = vsel %vm5232_vm12, %v2667_v36, 0  ;;  %v1993_v18 = vrot.slane %v5894_v20, 2  ;;  %v3150_v20 = vand.u32 %v4013_v8, %v4888_v4 }
 0x261   : > { %3962 = vmatmul.msk.bf16.gmra.mxu3 %vm529_vm1, %v2248_v63  ;;  %v2527_v26 = vpop.f32.mrf.mxu0  ;;  %v2824_v14 = vunpack.c.l.b16 %v2779_v40  ;;  %v1936_v4 = vadd.f32 %v5094_v0, %v4938_v41 }
 0x262   : > { %v2612_v9 = vadd.f32 %v5101_v24, %v2580_v51  ;;  %v1995_v46 = vsel %vm1953_vm8, %v1993_v18, %v1994_v43  ;;  %vm2734_vm8 = vmand %vm2706_vm7, %vm2720_vm9  ;;  %3159 = vmatpush.bf16.msrb.mxu1 %v3150_v20 }
 0x263   : > { %v2074_v57 = vpop.f32.mrf.mxu2  ;;  %v5250_v27 = vpack.c.b16 %v2824_v14, %v2823_v61 }
 0x264   : > { %v2131_v17 = vadd.f32 %v2074_v57, %v1934_v25  ;;  %v2330_v12 = vpop.f32.mrf.mxu3  ;;  %3977 = vmatmul.msk.bf16.gmra.mxu0 %vm529_vm1, %v2445_v62  ;;  %v2640_v59 = vmax.f32 %v2612_v9, 0.0  ;;  %v5284_v43 = vpop.f32.mrf.mxu1 }
 0x265   : > { %3981 = vmatmul.msk.bf16.gmra.mxu1 %vm2843_vm2, %v5250_v27 }
 0x266   : > { %v2384_v34 = vadd.f32 %v2327_v55, %v2131_v17  ;;  %v2668_v36 = vpack.c.bf16 %v2640_v59, %v2640_v59  ;;  %v1935_v55 = vadd.f32 %v5077_v49, %v4932_v60 }
 0x268   : > { %v2581_v35 = vadd.f32 %v2524_v48, %v2384_v34  ;;  %3947 = vmatmul.msk.bf16.gmra.mxu2 %vm529_vm1, %v1995_v46  ;;  %v2780_v63 = vsel %vm2734_vm8, %v2668_v36, 0  ;;  %vm2707_vm1 = vcmp.ge.s32.totalorder %v2693_v5, 0 }
 0x269   : > { %v2529_v30 = vpop.f32.mrf.mxu0  ;;  %v2825_v25 = vunpack.c.l.b16 %v2780_v63  ;;  %vm2735_vm14 = vmand %vm2707_vm1, %vm2721_vm13 }
 0x26a   : > { %v2613_v33 = vadd.f32 %v5101_v24, %v2581_v35 }
 0x26b   : > { %v2077_v44 = vpop.f32.mrf.mxu2 }
 0x26c   : > { %v2641_v48 = vmax.f32 %v2613_v33, 0.0  ;;  %v2132_v45 = vadd.f32 %v2077_v44, %v1935_v55  ;;  %v2332_v51 = vpop.f32.mrf.mxu3  ;;  %v5298_v8 = vpop.f32.mrf.mxu1 }
 0x26e   : > { %v2669_v40 = vpack.c.bf16 %v2641_v48, %v2641_v48  ;;  %v2385_v61 = vadd.f32 %v2330_v12, %v2132_v45  ;;  %v2694_v45 = vadd.s32 6, %v5117_v37 }
 0x270   : > { %v2781_v14 = vsel %vm2734_vm8, %v2669_v40, 0  ;;  %v2582_v9 = vadd.f32 %v2527_v26, %v2385_v61  ;;  %vm2708_vm15 = vcmp.ge.s32.totalorder %v2694_v45, 0  ;;  %vm2722_vm0 = vcmp.lt.s32.totalorder %v2694_v45, 16 }
 0x271   : > { %v2826_v57 = vunpack.c.l.b16 %v2781_v14  ;;  %v2532_v62 = vpop.f32.mrf.mxu0  ;;  %3996 = vmatmul.msk.bf16.vlgmr.msrb.gmra.mxu3 %vm2843_vm2, %v5212_v1  ;;  %vm2736_vm3 = vmand %vm2708_vm15, %vm2722_vm0 }
 0x272   : > { %v2614_v60 = vadd.f32 %v5101_v24, %v2582_v9 }
 0x273   : > { %v2079_v49 = vpop.f32.mrf.mxu2  ;;  %v5282_v18 = vpack.c.b16 %v2826_v57, %v2825_v25  ;;  %v1939_v25 = vadd.f32 %v5160_v10, %v4952_v16  ;;  %v1940_v10 = vadd.f32 %v5170_v32, %v4958_v13 }
 0x274   : > { %v2133_v3 = vadd.f32 %v2079_v49, %v1936_v4  ;;  %v2335_v26 = vpop.f32.mrf.mxu3  ;;  %4005 = vmatmul.msk.bf16.vlgmr.msrb.gmra.mxu0 %vm2843_vm2, %v5250_v27  ;;  %v2642_v42 = vmax.f32 %v2614_v60, 0.0  ;;  %v5312_v14 = vpop.f32.mrf.mxu1 }
 0x275   : > { %3982 = vmatmul.msk.bf16.gmra.mxu1 %vm2843_vm2, %v5282_v18 }
 0x276   : > { %v2386_v17 = vadd.f32 %v2332_v51, %v2133_v3  ;;  %v2670_v12 = vpack.c.bf16 %v2642_v42, %v2642_v42 }
 0x278   : > { %v2583_v41 = vadd.f32 %v2529_v30, %v2386_v17  ;;  %3987 = vmatmul.msk.bf16.vlgmr.msrb.gmra.mxu2 %vm2843_vm2, %v2927_v19  ;;  %v2782_v30 = vsel %vm2735_vm14, %v2670_v12, 0 }
 0x279   : > { %v2534_v0 = vpop.f32.mrf.mxu0  ;;  %v2827_v19 = vunpack.c.l.b16 %v2782_v30 }
 0x27a   : > { %v2615_v52 = vadd.f32 %v5101_v24, %v2583_v41 }
 0x27b   : > { %v2082_v59 = vpop.f32.mrf.mxu2 }
 0x27c   : > { %v2643_v34 = vmax.f32 %v2615_v52, 0.0  ;;  %v2134_v46 = vadd.f32 %v2082_v59, %v1937_v15  ;;  %v2337_v35 = vpop.f32.mrf.mxu3  ;;  %v2695_v15 = vadd.s32 7, %v5117_v37 }
 0x27e   : > { %v2671_v36 = vpack.c.bf16 %v2643_v34, %v2643_v34  ;;  %v2387_v33 = vadd.f32 %v2335_v26, %v2134_v46  ;;  %vm2709_vm4 = vcmp.ge.s32.totalorder %v2695_v15, 0  ;;  %vm2723_vm5 = vcmp.lt.s32.totalorder %v2695_v15, 16 }
 0x27f   : > { %vm2737_vm6 = vmand %vm2709_vm4, %vm2723_vm5 }
 0x280   : > { %v2783_v29 = vsel %vm2735_vm14, %v2671_v36, 0  ;;  %v2584_v22 = vadd.f32 %v2532_v62, %v2387_v33  ;;  %v1941_v33 = vadd.f32 %v5198_v31, %v4962_v39  ;;  %v1942_v31 = vadd.f32 %v5220_v21, %v4972_v58 }
 0x281   : > { %v2828_v55 = vunpack.c.l.b16 %v2783_v29  ;;  %v2537_v20 = vpop.f32.mrf.mxu0  ;;  %3997 = vmatmul.msk.bf16.gmra.mxu3 %vm2843_vm2, %v5250_v27 }
 0x282   : > { %v2616_v56 = vadd.f32 %v5101_v24, %v2584_v22 }
 0x283   : > { %v5305_v44 = vpack.c.b16 %v2828_v55, %v2827_v19  ;;  %v2084_v48 = vpop.f32.mrf.mxu2 }
 0x284   : > { %v2135_v51 = vadd.f32 %v2084_v48, %v1938_v23  ;;  %v2340_v63 = vpop.f32.mrf.mxu3  ;;  %4006 = vmatmul.msk.bf16.gmra.mxu0 %vm2843_vm2, %v5282_v18  ;;  %v2644_v40 = vmax.f32 %v2616_v56, 0.0 }
 0x285   : > { %3983 = vmatmul.msk.bf16.gmra.mxu1 %vm2843_vm2, %v5305_v44 }
 0x286   : > { %v2388_v61 = vadd.f32 %v2337_v35, %v2135_v51  ;;  %v2672_v47 = vpack.c.bf16 %v2644_v40, %v2644_v40 }
 0x288   : > { %v2585_v28 = vadd.f32 %v2534_v0, %v2388_v61  ;;  %3988 = vmatmul.msk.bf16.gmra.mxu2 %vm2843_vm2, %v5175_v2  ;;  %v2784_v5 = vsel %vm2736_vm3, %v2672_v47, 0  ;;  %v5321_v2 = vpop.f32.mrf.mxu1  ;;  %v2696_v47 = vadd.s32 8, %v5117_v37 }
 0x289   : > { %v2539_v57 = vpop.f32.mrf.mxu0  ;;  %v2829_v41 = vunpack.c.l.b16 %v2784_v5  ;;  %v1943_v5 = vadd.f32 %v5240_v53, %v4981_v7  ;;  %v1944_v7 = vadd.f32 %v5271_v50, %v4993_v11 }
 0x28a   : > { %v2617_v9 = vadd.f32 %v5101_v24, %v2585_v28  ;;  %vm2710_vm11 = vcmp.ge.s32.totalorder %v2696_v47, 0  ;;  %vm2724_vm12 = vcmp.lt.s32.totalorder %v2696_v47, 16 }
 0x28b   : > { %v2087_v62 = vpop.f32.mrf.mxu2  ;;  %vm2738_vm7 = vmand %vm2710_vm11, %vm2724_vm12 }
 0x28c   : > { %v2645_v60 = vmax.f32 %v2617_v9, 0.0  ;;  %v2136_v4 = vadd.f32 %v2087_v62, %v1939_v25  ;;  %v2342_v49 = vpop.f32.mrf.mxu3 }
 0x28e   : > { %v2673_v3 = vpack.c.bf16 %v2645_v60, %v2645_v60  ;;  %v2389_v26 = vadd.f32 %v2340_v63, %v2136_v4 }
 0x290   : > { %v2785_v42 = vsel %vm2736_vm3, %v2673_v3, 0  ;;  %v2586_v17 = vadd.f32 %v2537_v20, %v2389_v26  ;;  %v5338_v22 = vpop.f32.mrf.mxu1 }
 0x291   : > { %v2830_v0 = vunpack.c.l.b16 %v2785_v42  ;;  %3998 = vmatmul.msk.bf16.gmra.mxu3 %vm2843_vm2, %v5282_v18  ;;  %v2542_v46 = vpop.f32.mrf.mxu0 }
 0x292   : > { %v2618_v16 = vadd.f32 %v5101_v24, %v2586_v17 }
 0x293   : > { %v5326_v12 = vpack.c.b16 %v2830_v0, %v2829_v41  ;;  %v2089_v52 = vpop.f32.mrf.mxu2 }
 0x294   : > { %v2137_v59 = vadd.f32 %v2089_v52, %v1940_v10  ;;  %v2345_v34 = vpop.f32.mrf.mxu3  ;;  %4007 = vmatmul.msk.bf16.gmra.mxu0 %vm2843_vm2, %v5305_v44  ;;  %v2646_v35 = vmax.f32 %v2618_v16, 0.0 }
 0x295   : > { %3984 = vmatmul.msk.bf16.gmra.mxu1 %vm2843_vm2, %v5326_v12 }
 0x296   : > { %v2390_v30 = vadd.f32 %v2342_v49, %v2137_v59  ;;  %v2674_v13 = vpack.c.bf16 %v2646_v35, %v2646_v35 }
 0x298   : > { %v2587_v36 = vadd.f32 %v2539_v57, %v2390_v30  ;;  %3989 = vmatmul.msk.bf16.gmra.mxu2 %vm2843_vm2, %v5212_v1  ;;  %v2786_v56 = vsel %vm2737_vm6, %v2674_v13, 0  ;;  %v5352_v57 = vpop.f32.mrf.mxu1  ;;  %v2697_v30 = vadd.s32 9, %v5117_v37 }
 0x299   : > { %v2544_v45 = vpop.f32.mrf.mxu0  ;;  %v2831_v1 = vunpack.c.l.b16 %v2786_v56 }
 0x29a   : > { %v2619_v32 = vadd.f32 %v5101_v24, %v2587_v36  ;;  %vm2711_vm9 = vcmp.ge.s32.totalorder %v2697_v30, 0  ;;  %vm2725_vm8 = vcmp.lt.s32.totalorder %v2697_v30, 16 }
 0x29b   : > { %v2092_v29 = vpop.f32.mrf.mxu2  ;;  %vm2739_vm1 = vmand %vm2711_vm9, %vm2725_vm8  ;;  %vm3427_vm9 = vcmask 48128  }
 0x29c   : > { %v2647_v19 = vmax.f32 %v2619_v32, 0.0  ;;  %v2138_v55 = vadd.f32 %v2092_v29, %v1941_v33  ;;  %v2347_v20 = vpop.f32.mrf.mxu3 }
 0x29e   : > { %v2675_v23 = vpack.c.bf16 %v2647_v19, %v2647_v19  ;;  %v2391_v48 = vadd.f32 %v2345_v34, %v2138_v55  ;;  %v1945_v55 = vadd.f32 %v5284_v43, %v5004_v6  ;;  %v1946_v6 = vadd.f32 %v5298_v8, %v5014_v38 }
 0x2a0   : > { %v2787_v51 = vsel %vm2737_vm6, %v2675_v23, 0  ;;  %v2588_v63 = vadd.f32 %v2542_v46, %v2391_v48  ;;  %v5359_v10 = vpop.f32.mrf.mxu1 }
 0x2a1   : > { %v2832_v40 = vunpack.c.l.b16 %v2787_v51  ;;  %3999 = vmatmul.msk.bf16.gmra.mxu3 %vm2843_vm2, %v5305_v44  ;;  %v2547_v21 = vpop.f32.mrf.mxu0 }
 0x2a2   : > { %v2620_v39 = vadd.f32 %v5101_v24, %v2588_v63 }
 0x2a3   : > { %v5345_v61 = vpack.c.b16 %v2832_v40, %v2831_v1  ;;  %v2094_v28 = vpop.f32.mrf.mxu2 }
 0x2a4   : > { %v2139_v9 = vadd.f32 %v2094_v28, %v1942_v31  ;;  %v2350_v25 = vpop.f32.mrf.mxu3  ;;  %4008 = vmatmul.msk.bf16.gmra.mxu0 %vm2843_vm2, %v5326_v12  ;;  %v2648_v62 = vmax.f32 %v2620_v39, 0.0 }
 0x2a5   : > { %3985 = vmatmul.msk.bf16.gmra.mxu1 %vm2843_vm2, %v5345_v61 }
 0x2a6   : > { %v2392_v60 = vadd.f32 %v2347_v20, %v2139_v9  ;;  %v2676_v4 = vpack.c.bf16 %v2648_v62, %v2648_v62  ;;  %v2698_v62 = vadd.s32 10, %v5117_v37 }
 0x2a8   : > { %v2589_v58 = vadd.f32 %v2544_v45, %v2392_v60  ;;  %3990 = vmatmul.msk.bf16.gmra.mxu2 %vm2843_vm2, %v5250_v27  ;;  %v2788_v41 = vsel %vm2738_vm7, %v2676_v4, 0  ;;  %v5375_v11 = vpop.f32.mrf.mxu1  ;;  %vm2712_vm13 = vcmp.ge.s32.totalorder %v2698_v62, 0  ;;  %vm2726_vm14 = vcmp.lt.s32.totalorder %v2698_v62, 16  ;;  %v5899_v62 = vld [vmem:[#allocation17_spill] sm:$0xff] }
 0x2a9   : > { %v2833_v27 = vunpack.c.l.b16 %v2788_v41  ;;  %v2549_v46 = vpop.f32.mrf.mxu0  ;;  %vm2740_vm15 = vmand %vm2712_vm13, %vm2726_vm14 }
 0x2aa   : > { %v2621_v49 = vadd.f32 %v5101_v24, %v2589_v58 }
 0x2ab   : > { %v2097_v3 = vpop.f32.mrf.mxu2 }
 0x2ac   : > { %v2649_v26 = vmax.f32 %v2621_v49, 0.0  ;;  %v2140_v42 = vadd.f32 %v2097_v3, %v1943_v5  ;;  %v2352_v17 = vpop.f32.mrf.mxu3 }
 0x2ae   : > { %v2677_v0 = vpack.c.bf16 %v2649_v26, %v2649_v26  ;;  %v2393_v16 = vadd.f32 %v2350_v25, %v2140_v42  ;;  %v1947_v26 = vadd.f32 %v5312_v14, %v5025_v54 }
 0x2b0   : > { %v2789_v52 = vsel %vm2738_vm7, %v2677_v0, 0  ;;  %v2590_v15 = vadd.f32 %v2547_v21, %v2393_v16 }
 0x2b1   : > { %v2834_v59 = vunpack.c.l.b16 %v2789_v52  ;;  %4000 = vmatmul.msk.bf16.gmra.mxu3 %vm2843_vm2, %v5326_v12  ;;  %v2552_v45 = vpop.f32.mrf.mxu0 }
 0x2b2   : > { %v2622_v34 = vadd.f32 %v5101_v24, %v2590_v15 }
 0x2b3   : > { %v5366_v53 = vpack.c.b16 %v2834_v59, %v2833_v27  ;;  %v2099_v35 = vpop.f32.mrf.mxu2 }
 0x2b4   : > { %v2141_v36 = vadd.f32 %v2099_v35, %v1944_v7  ;;  %v2355_v13 = vpop.f32.mrf.mxu3  ;;  %4009 = vmatmul.msk.bf16.gmra.mxu0 %vm2843_vm2, %v5345_v61  ;;  %v2650_v32 = vmax.f32 %v2622_v34, 0.0  ;;  %v5895_v7 = vld [vmem:[#allocation48_spill] sm:$0xff] }
 0x2b5   : > { %3986 = vmatmul.msk.bf16.gmra.mxu1 %vm2843_vm2, %v5366_v53 }
 0x2b6   : > { %v2394_v33 = vadd.f32 %v2352_v17, %v2141_v36  ;;  %v2678_v50 = vpack.c.bf16 %v2650_v32, %v2650_v32  ;;  %v5896_v32 = vld [vmem:[#allocation18_spill] sm:$0xff] }
 0x2b8   : > { %v2591_v29 = vadd.f32 %v2549_v46, %v2394_v33  ;;  %3991 = vmatmul.msk.bf16.gmra.mxu2 %vm2843_vm2, %v5282_v18  ;;  %v2790_v51 = vsel %vm2739_vm1, %v2678_v50, 0  ;;  %v1948_v46 = vadd.f32 %v5321_v2, %v5895_v7  ;;  %v1949_v2 = vadd.f32 %v5338_v22, %v5896_v32 }
 0x2b9   : > { %v2987_v31 = vunpack.c.l.b16 %v2790_v51  ;;  %v2554_v49 = vpop.f32.mrf.mxu0 }
 0x2ba   : > { %v2623_v19 = vadd.f32 %v5101_v24, %v2591_v29 }
 0x2bb   : > { %v2102_v20 = vpop.f32.mrf.mxu2 }
 0x2bc   : > { %v2651_v56 = vmax.f32 %v2623_v19, 0.0  ;;  %v2142_v23 = vadd.f32 %v2102_v20, %v1945_v55  ;;  %v2357_v48 = vpop.f32.mrf.mxu3  ;;  %v5897_v20 = vld [vmem:[#allocation16_spill] sm:$0xff] }
 0x2be   : > { %v2679_v63 = vpack.c.bf16 %v2651_v56, %v2651_v56  ;;  %v2395_v1 = vadd.f32 %v2355_v13, %v2142_v23  ;;  %v1950_v56 = vadd.f32 %v5352_v57, %v5897_v20 }
 0x2c0   : > { %v2791_v40 = vsel %vm2739_vm1, %v2679_v63, 0  ;;  %v2592_v39 = vadd.f32 %v2552_v45, %v2395_v1  ;;  %v5898_v63 = vld [vmem:[#allocation19_spill] sm:$0xff] }
 0x2c1   : > { %v2988_v28 = vunpack.c.l.b16 %v2791_v40  ;;  %4001 = vmatmul.msk.bf16.gmra.mxu3 %vm2843_vm2, %v5345_v61  ;;  %v1951_v1 = vadd.f32 %v5359_v10, %v5898_v63 }
 0x2c2   : > { %v2624_v47 = vadd.f32 %v5101_v24, %v2592_v39  ;;  %v5383_v9 = vpop.f32.mrf.mxu1 }
 0x2c3   : > { %v2104_v43 = vpop.f32.mrf.mxu2  ;;  %v5387_v25 = vpack.c.b16 %v2988_v28, %v2987_v31  ;;  %v3426_v28 = vld [vmem:[%s5745_s10] sm:$0x7] }
 0x2c4   : > { %v2143_v60 = vadd.f32 %v2104_v43, %v1946_v6  ;;  %v2360_v58 = vpop.f32.mrf.mxu3  ;;  %4010 = vmatmul.msk.bf16.gmra.mxu0 %vm2843_vm2, %v5366_v53  ;;  %v2652_v21 = vmax.f32 %v2624_v47, 0.0  ;;  %v3417_v47 = vld [vmem:[%s5744_s9] sm:$0x7]  ;;  %v3453_v6 = vsel %vm2868_vm10, %v3426_v28, 0 }
 0x2c5   : > { %4014 = vmatmul.msk.bf16.vlgmr.msrb.gmra.mxu1 %vm2843_vm2, %v5282_v18  ;;  %v3529_v43 = vsel %vm2868_vm10, %v3417_v47, 0  ;;  %3462 = vmatpush.bf16.msra.mxu0 %v3453_v6 }
 0x2c6   : > { %v2396_v4 = vadd.f32 %v2357_v48, %v2143_v60  ;;  %v2680_v38 = vpack.c.bf16 %v2652_v21, %v2652_v21  ;;  %3538 = vmatpush.bf16.msra.mxu1 %v3529_v43  ;;  %v1952_v60 = vadd.f32 %v5375_v11, %v5899_v62 }
 0x2c8   : > { %v2593_v5 = vadd.f32 %v2554_v49, %v2396_v4  ;;  %3992 = vmatmul.msk.bf16.gmra.mxu2 %vm2843_vm2, %v5305_v44  ;;  %v2792_v0 = vsel %vm2740_vm15, %v2680_v38, 0  ;;  %v2557_v38 = vpop.f32.mrf.mxu0 }
 0x2c9   : > { %v3065_v27 = vunpack.c.l.b16 %v2792_v0 }
 0x2ca   : > { %v2625_v8 = vadd.f32 %v5101_v24, %v2593_v5  ;;  %v5397_v3 = vpop.f32.mrf.mxu1 }
 0x2cb   : > { %v2107_v42 = vpop.f32.mrf.mxu2 }
 0x2cc   : > { %v2653_v18 = vmax.f32 %v2625_v8, 0.0  ;;  %v2144_v17 = vadd.f32 %v2107_v42, %v1947_v26  ;;  %v2362_v41 = vpop.f32.mrf.mxu3 }
 0x2ce   : > { %v2681_v16 = vpack.c.bf16 %v2653_v18, %v2653_v18  ;;  %v2397_v52 = vadd.f32 %v2360_v58, %v2144_v17 }
 0x2d0   : > { %v2793_v15 = vsel %vm2740_vm15, %v2681_v16, 0 }
 0x2d1   : > { %4002 = vmatmul.msk.bf16.gmra.mxu3 %vm2843_vm2, %v5366_v53  ;;  %v3066_v59 = vunpack.c.l.b16 %v2793_v15 }
 0x2d2   : > { %v5403_v34 = vpop.f32.mrf.mxu1 }
 0x2d3   : > { %v2109_v54 = vpop.f32.mrf.mxu2  ;;  %v5407_v14 = vpack.c.b16 %v3066_v59, %v3065_v27  ;;  %v2699_v59 = vadd.s32 11, %v5117_v37 }
 0x2d4   : > { %v2145_v35 = vadd.f32 %v2109_v54, %v1948_v46  ;;  %v2365_v30 = vpop.f32.mrf.mxu3  ;;  %4011 = vmatmul.msk.bf16.gmra.mxu0 %vm2843_vm2, %v5387_v25 }
 0x2d5   : > { %4015 = vmatmul.msk.bf16.gmra.mxu1 %vm2843_vm2, %v5305_v44  ;;  %vm2713_vm10 = vcmp.ge.s32.totalorder %v2699_v59, 0  ;;  %vm2727_vm0 = vcmp.lt.s32.totalorder %v2699_v59, 16 }
 0x2d6   : > { %v2398_v36 = vadd.f32 %v2362_v41, %v2145_v35  ;;  %v2594_v41 = vadd.f32 %v2557_v38, %v2397_v52  ;;  %vm2741_vm3 = vmand %vm2713_vm10, %vm2727_vm0 }
 0x2d8   : > { %3993 = vmatmul.msk.bf16.gmra.mxu2 %vm2843_vm2, %v5326_v12 }
 0x2da   : > { %v5415_v13 = vpop.f32.mrf.mxu1 }
 0x2db   : > { %v2112_v33 = vpop.f32.mrf.mxu2 }
 0x2dc   : > { %v2146_v29 = vadd.f32 %v2112_v33, %v1949_v2  ;;  %v2367_v50 = vpop.f32.mrf.mxu3 }
 0x2de   : > { %v5419_v19 = vadd.f32 %v2365_v30, %v2146_v29 }
 0x2e1   : > { %4003 = vmatmul.msk.bf16.gmra.mxu3 %vm2843_vm2, %v5387_v25 }
 0x2e2   : > { %v5423_v55 = vpop.f32.mrf.mxu1 }
 0x2e3   : > { %v2114_v23 = vpop.f32.mrf.mxu2 }
 0x2e4   : > { %v2147_v48 = vadd.f32 %v2114_v23, %v1950_v56  ;;  %v2370_v45 = vpop.f32.mrf.mxu3  ;;  %4012 = vmatmul.msk.bf16.gmra.mxu0 %vm2843_vm2, %v5407_v14 }
 0x2e5   : > { %4016 = vmatmul.msk.bf16.gmra.mxu1 %vm2843_vm2, %v5326_v12 }
 0x2e6   : > { %v5431_v22 = vadd.f32 %v2367_v50, %v2147_v48 }
 0x2e8   : > { %3994 = vmatmul.msk.bf16.gmra.mxu2 %vm2843_vm2, %v5345_v61 }
 0x2ea   : > { %v5435_v51 = vpop.f32.mrf.mxu1 }
 0x2eb   : > { %v2117_v57 = vpop.f32.mrf.mxu2 }
 0x2ec   : > { %v2148_v40 = vadd.f32 %v2117_v57, %v1951_v1  ;;  %v2372_v39 = vpop.f32.mrf.mxu3 }
 0x2ee   : > { %v5439_v31 = vadd.f32 %v2370_v45, %v2148_v40 }
 0x2f1   : > { %4032 = vmatmul.msk.bf16.vlgmr.msra.gmra.mxu3 %vm2843_vm2, %v5326_v12 }
 0x2f2   : > { %v5451_v10 = vpop.f32.mrf.mxu1 }
 0x2f3   : > { %v2119_v58 = vpop.f32.mrf.mxu2 }
 0x2f4   : > { %v2149_v21 = vadd.f32 %v2119_v58, %v1952_v60  ;;  %v3005_v4 = vpop.f32.mrf.mxu3 }
 0x2f5   : > { %4017 = vmatmul.msk.bf16.gmra.mxu1 %vm2843_vm2, %v5345_v61 }
 0x2f6   : > { %v5457_v49 = vadd.f32 %v2372_v39, %v2149_v21 }
 0x2f8   : > { %4023 = vmatmul.msk.bf16.vlgmr.msra.gmra.mxu2 %vm2843_vm2, %v5305_v44  ;;  %v2559_v44 = vpop.f32.mrf.mxu0 }
 0x2f9   : > { %v2595_v15 = vadd.f32 %v2559_v44, %v2398_v36 }
 0x2fa   : > { %v5461_v5 = vpop.f32.mrf.mxu1 }
 0x2fb   : > { %v2943_v8 = vpop.f32.mrf.mxu2  ;;  %v2627_v7 = vadd.f32 %v5101_v24, %v2595_v15 }
 0x2fc   : > { %v2944_v26 = vadd.f32 %v2943_v8, %v5383_v9  ;;  %v3007_v42 = vpop.f32.mrf.mxu3  ;;  %v2626_v9 = vadd.f32 %v5101_v24, %v2594_v41 }
 0x2fd   : > { %v2655_v30 = vmax.f32 %v2627_v7, 0.0 }
 0x2fe   : > { %v5464_v18 = vadd.f32 %v3005_v4, %v2944_v26  ;;  %v2654_v46 = vmax.f32 %v2626_v9, 0.0 }
 0x2ff   : > { %v2683_v2 = vpack.c.bf16 %v2655_v30, %v2655_v30 }
 0x300   : > { %v2682_v32 = vpack.c.bf16 %v2654_v46, %v2654_v46 }
 0x301   : > { %4033 = vmatmul.msk.bf16.gmra.mxu3 %vm2843_vm2, %v5345_v61  ;;  %v2795_v56 = vsel %vm2741_vm3, %v2683_v2, 0 }
 0x302   : > { %v5468_v11 = vpop.f32.mrf.mxu1  ;;  %v2794_v29 = vsel %vm2741_vm3, %v2682_v32, 0  ;;  %v3144_v48 = vunpack.c.l.b16 %v2795_v56 }
 0x303   : > { %v2945_v17 = vpop.f32.mrf.mxu2  ;;  %v3143_v23 = vunpack.c.l.b16 %v2794_v29  ;;  %v5901_v29 = vld [vmem:[#allocation7_spill] sm:$0xff] }
 0x304   : > { %v2946_v0 = vadd.f32 %v2945_v17, %v5397_v3  ;;  %v3010_v16 = vpop.f32.mrf.mxu3 }
 0x305   : > { %4018 = vmatmul.msk.bf16.gmra.mxu1 %vm2843_vm2, %v5366_v53  ;;  %v5496_v45 = vpack.c.b16 %v3144_v48, %v3143_v23 }
 0x306   : > { %v5473_v27 = vadd.f32 %v3007_v42, %v2946_v0 }
 0x308   : > { %4024 = vmatmul.msk.bf16.gmra.mxu2 %vm2843_vm2, %v5326_v12  ;;  %v2562_v12 = vpop.f32.mrf.mxu0 }
 0x309   : > { %v2596_v28 = vadd.f32 %v2562_v12, %v5419_v19 }
 0x30a   : > { %v5480_v52 = vpop.f32.mrf.mxu1 }
 0x30b   : > { %v2948_v3 = vpop.f32.mrf.mxu2 }
 0x30c   : > { %v2949_v54 = vadd.f32 %v2948_v3, %v5403_v34  ;;  %v3012_v35 = vpop.f32.mrf.mxu3 }
 0x30e   : > { %v5483_v36 = vadd.f32 %v3010_v16, %v2949_v54 }
 0x310   : > { %v2564_v57 = vpop.f32.mrf.mxu0 }
 0x311   : > { %4034 = vmatmul.msk.bf16.gmra.mxu3 %vm2843_vm2, %v5366_v53  ;;  %v2597_v47 = vadd.f32 %v2564_v57, %v5431_v22 }
 0x312   : > { %v5487_v24 = vpop.f32.mrf.mxu1 }
 0x313   : > { %v2950_v33 = vpop.f32.mrf.mxu2 }
 0x314   : > { %v2951_v50 = vadd.f32 %v2950_v33, %v5415_v13  ;;  %v3015_v34 = vpop.f32.mrf.mxu3 }
 0x315   : > { %4019 = vmatmul.msk.bf16.gmra.mxu1 %vm2843_vm2, %v5387_v25 }
 0x316   : > { %v5492_v20 = vadd.f32 %v3012_v35, %v2951_v50 }
 0x318   : > { %4025 = vmatmul.msk.bf16.gmra.mxu2 %vm2843_vm2, %v5345_v61  ;;  %v4126_v61 = vld [vmem:[%s5741_s6] ss:$0 sm:$0xff]  ;;  %v2567_v19 = vpop.f32.mrf.mxu0 }
 0x319   : > { %v2628_v6 = vadd.f32 %v4126_v61, %v2596_v28  ;;  %v2629_v58 = vadd.f32 %v4126_v61, %v2597_v47  ;;  %v2598_v16 = vadd.f32 %v2567_v19, %v5439_v31  ;;  %v2701_v31 = vadd.s32 13, %v5117_v37  ;;  %v5902_v19 = vld [vmem:[#allocation8_spill] sm:$0xff] }
 0x31a   : > { %v5498_v63 = vpop.f32.mrf.mxu1 }
 0x31b   : > { %v2953_v1 = vpop.f32.mrf.mxu2  ;;  %v2656_v4 = vmax.f32 %v2628_v6, 0.0  ;;  %v2657_v38 = vmax.f32 %v2629_v58, 0.0  ;;  %v2630_v3 = vadd.f32 %v4126_v61, %v2598_v16  ;;  %vm2715_vm11 = vcmp.ge.s32.totalorder %v2701_v31, 0 }
 0x31c   : > { %v2954_v13 = vadd.f32 %v2953_v1, %v5423_v55  ;;  %v3017_v40 = vpop.f32.mrf.mxu3  ;;  %v2700_v55 = vadd.s32 12, %v5117_v37  ;;  %vm2729_vm12 = vcmp.lt.s32.totalorder %v2701_v31, 16  ;;  %v5900_v37 = vld [vmem:[#allocation5_spill] sm:$0xff] }
 0x31d   : > { %v2685_v17 = vpack.c.bf16 %v2657_v38, %v2657_v38  ;;  %v2658_v32 = vmax.f32 %v2630_v3, 0.0  ;;  %vm2743_vm7 = vmand %vm2715_vm11, %vm2729_vm12  ;;  %v5903_v38 = vld [vmem:[#allocation10_spill] sm:$0xff]  ;;  %v5904_v3 = vld [vmem:[#allocation11_spill] sm:$0xff] }
 0x31e   : > { %v5501_v39 = vadd.f32 %v3015_v34, %v2954_v13  ;;  %vm2714_vm4 = vcmp.ge.s32.totalorder %v2700_v55, 0  ;;  %vm2728_vm5 = vcmp.lt.s32.totalorder %v2700_v55, 16 }
 0x31f   : > { %vm2742_vm6 = vmand %vm2714_vm4, %vm2728_vm5  ;;  %v2686_v34 = vpack.c.bf16 %v2658_v32, %v2658_v32 }
 0x320   : > { %v2569_v15 = vpop.f32.mrf.mxu0  ;;  %v2797_v9 = vsel %vm2742_vm6, %v2685_v17, 0 }
 0x321   : > { %4035 = vmatmul.msk.bf16.gmra.mxu3 %vm2843_vm2, %v5387_v25  ;;  %v3222_v7 = vunpack.c.l.b16 %v2797_v9 }
 0x322   : > { %v5512_v21 = vpop.f32.mrf.mxu1 }
 0x323   : > { %v2955_v43 = vpop.f32.mrf.mxu2 }
 0x324   : > { %v2956_v62 = vadd.f32 %v2955_v43, %v5435_v51  ;;  %v3020_v60 = vpop.f32.mrf.mxu3  ;;  %v2684_v51 = vpack.c.bf16 %v2656_v4, %v2656_v4 }
 0x325   : > { %4020 = vmatmul.msk.bf16.gmra.mxu1 %vm2843_vm2, %v5407_v14 }
 0x326   : > { %v5516_v22 = vadd.f32 %v3017_v40, %v2956_v62  ;;  %v2796_v0 = vsel %vm2742_vm6, %v2684_v51, 0  ;;  %v2798_v40 = vsel %vm2743_vm7, %v2686_v34, 0 }
 0x327   : > { %v3221_v59 = vunpack.c.l.b16 %v2796_v0  ;;  %v3299_v47 = vunpack.c.l.b16 %v2798_v40 }
 0x328   : > { %4026 = vmatmul.msk.bf16.gmra.mxu2 %vm2843_vm2, %v5366_v53  ;;  %v2599_v53 = vadd.f32 %v2569_v15, %v5457_v49 }
 0x329   : > { %v5530_v35 = vpack.c.b16 %v3222_v7, %v3221_v59 }
 0x32a   : > { %v5524_v44 = vpop.f32.mrf.mxu1  ;;  %v2631_v30 = vadd.f32 %v4126_v61, %v2599_v53 }
 0x32b   : > { %v2958_v8 = vpop.f32.mrf.mxu2 }
 0x32c   : > { %v2959_v26 = vadd.f32 %v2958_v8, %v5451_v10  ;;  %v3022_v42 = vpop.f32.mrf.mxu3  ;;  %v2659_v12 = vmax.f32 %v2631_v30, 0.0 }
 0x32e   : > { %v5521_v41 = vadd.f32 %v3020_v60, %v2959_v26  ;;  %v2687_v48 = vpack.c.bf16 %v2659_v12, %v2659_v12 }
 0x330   : > { %v2799_v28 = vsel %vm2743_vm7, %v2687_v48, 0  ;;  %v5907_v48 = vld [vmem:[#allocation20_spill] sm:$0xff] }
 0x331   : > { %4036 = vmatmul.msk.bf16.gmra.mxu3 %vm2843_vm2, %v5407_v14  ;;  %v3300_v61 = vunpack.c.l.b16 %v2799_v28 }
 0x332   : > { %v5539_v2 = vpop.f32.mrf.mxu1 }
 0x333   : > { %v2960_v10 = vpop.f32.mrf.mxu2  ;;  %v3301_v55 = vpack.c.b16 %v3300_v61, %v3299_v47 }
 0x334   : > { %v2961_v46 = vadd.f32 %v2960_v10, %v5461_v5  ;;  %v3025_v54 = vpop.f32.mrf.mxu3  ;;  %v5544_v5 = vld [vmem:[%s5737_s2] ss:$0 sm:$0xff] }
 0x335   : > { %4021 = vmatmul.msk.bf16.gmra.mxu1 %vm2843_vm2, %v5496_v45  ;;  %v568_v33 = vadd.f32 %v5544_v5, %v5900_v37  ;;  %v570_v50 = vadd.f32 %v5544_v5, %v5901_v29  ;;  %v573_v4 = vadd.f32 %v5544_v5, %v5902_v19  ;;  %v575_v51 = vadd.f32 %v5544_v5, %v5903_v38 }
 0x336   : > { %v5535_v49 = vadd.f32 %v3022_v42, %v2961_v46  ;;  %v578_v10 = vadd.f32 %v5544_v5, %v5904_v3  ;;  %v5905_v46 = vld [vmem:[#allocation13_spill] sm:$0xff] }
 0x337   : > { %v607_v57 = vmax.f32 %v568_v33, 0.0  ;;  %v608_v13 = vmax.f32 %v570_v50, 0.0  ;;  %v609_v0 = vmax.f32 %v573_v4, 0.0  ;;  %v610_v16 = vmax.f32 %v575_v51, 0.0 }
 0x338   : > { %4027 = vmatmul.msk.bf16.gmra.mxu2 %vm2843_vm2, %v5387_v25  ;;  %v611_v12 = vmax.f32 %v578_v10, 0.0  ;;  %v5908_v10 = vld [vmem:[#allocation6_spill] sm:$0xff] }
 0x339   : > { %v3409_v6 = vpack.c.bf16 %v608_v13, %v607_v57  ;;  %v3410_v15 = vpack.c.bf16 %v610_v16, %v609_v0  ;;  %v585_v57 = vadd.f32 %v5544_v5, %v5907_v48 }
 0x33a   : > { %v2920_v43 = vpop.f32.mrf.mxu1 }
 0x33b   : > { %v2963_v56 = vpop.f32.mrf.mxu2 }
 0x33c   : > { %v2964_v25 = vadd.f32 %v2963_v56, %v5468_v11  ;;  %v3027_v23 = vpop.f32.mrf.mxu3 }
 0x33e   : > { %v5551_v1 = vadd.f32 %v3025_v54, %v2964_v25  ;;  %v580_v54 = vadd.f32 %v5544_v5, %v5905_v46 }
 0x340   : > { %v612_v37 = vmax.f32 %v580_v54, 0.0 }
 0x341   : > { %4037 = vmatmul.msk.bf16.gmra.mxu3 %vm2843_vm2, %v5496_v45 }
 0x342   : > { %v3411_v29 = vpack.c.bf16 %v612_v37, %v611_v12 }
 0x343   : > { %v2965_v62 = vpop.f32.mrf.mxu2 }
 0x344   : > { %v2966_v60 = vadd.f32 %v2965_v62, %v5480_v52  ;;  %v3030_v11 = vpop.f32.mrf.mxu3  ;;  %v3161_v52 = vpop.f32.mrf.mxu1  ;;  %v614_v62 = vmax.f32 %v585_v57, 0.0 }
 0x345   : > { %4048 = vmatmul.msk.bf16.vlgmr.msra.gmra.mxu1 %vm3427_vm9, %v3409_v6 }
 0x346   : > { %v5557_v58 = vadd.f32 %v3027_v23, %v2966_v60 }
 0x348   : > { %4028 = vmatmul.msk.bf16.gmra.mxu2 %vm2843_vm2, %v5407_v14 }
 0x34b   : > { %v2968_v8 = vpop.f32.mrf.mxu2 }
 0x34c   : > { %v2969_v26 = vadd.f32 %v2968_v8, %v5487_v24  ;;  %v3032_v42 = vpop.f32.mrf.mxu3  ;;  %v3163_v7 = vpop.f32.mrf.mxu1 }
 0x34d   : > { %v3083_v24 = vpop.f32.mrf.mxu0 }
 0x34e   : > { %v5566_v17 = vadd.f32 %v3030_v11, %v2969_v26  ;;  %v3123_v38 = vadd.f32 %v3083_v24, %v5464_v18 }
 0x351   : > { %4038 = vmatmul.msk.bf16.gmra.mxu3 %vm2843_vm2, %v5530_v35 }
 0x353   : > { %v2970_v14 = vpop.f32.mrf.mxu2 }
 0x354   : > { %v2971_v53 = vadd.f32 %v2970_v14, %v5498_v63  ;;  %v3035_v9 = vpop.f32.mrf.mxu3  ;;  %v3166_v33 = vpop.f32.mrf.mxu1 }
 0x355   : > { %4049 = vmatmul.msk.bf16.gmra.mxu1 %vm3427_vm9, %v3410_v15 }
 0x356   : > { %v5572_v59 = vadd.f32 %v3032_v42, %v2971_v53 }
 0x358   : > { %4029 = vmatmul.msk.bf16.gmra.mxu2 %vm2843_vm2, %v5496_v45  ;;  %v3085_v45 = vpop.f32.mrf.mxu0 }
 0x359   : > { %v3124_v0 = vadd.f32 %v3085_v45, %v5473_v27 }
 0x35b   : > { %v2973_v31 = vpop.f32.mrf.mxu2  ;;  %v3202_v15 = vadd.f32 %v3163_v7, %v3124_v0  ;;  %v5910_v0 = vld [vmem:[#allocation12_spill] sm:$0xff] }
 0x35c   : > { %v2974_v30 = vadd.f32 %v2973_v31, %v5512_v21  ;;  %v3037_v63 = vpop.f32.mrf.mxu3  ;;  %v5906_v21 = vld [vmem:[#allocation15_spill] sm:$0xff]  ;;  %v3168_v13 = vpop.f32.mrf.mxu1 }
 0x35d   : > { %v583_v23 = vadd.f32 %v5544_v5, %v5906_v21 }
 0x35e   : > { %v5581_v32 = vadd.f32 %v3035_v9, %v2974_v30 }
 0x35f   : > { %v613_v6 = vmax.f32 %v583_v23, 0.0 }
 0x361   : > { %4039 = vmatmul.msk.bf16.gmra.mxu3 %vm2843_vm2, %v3301_v55  ;;  %v3412_v60 = vpack.c.bf16 %v614_v62, %v613_v6 }
 0x363   : > { %v2975_v50 = vpop.f32.mrf.mxu2 }
 0x364   : > { %v2976_v34 = vadd.f32 %v2975_v50, %v5524_v44  ;;  %v3040_v56 = vpop.f32.mrf.mxu3  ;;  %v3088_v44 = vpop.f32.mrf.mxu0 }
 0x365   : > { %4050 = vmatmul.msk.bf16.gmra.mxu1 %vm3427_vm9, %v3411_v29  ;;  %v3171_v19 = vpop.f32.mrf.mxu1  ;;  %v3125_v7 = vadd.f32 %v3088_v44, %v5483_v36  ;;  %v5909_v36 = vld [vmem:[#allocation9_spill] sm:$0xff] }
 0x366   : > { %v5586_v25 = vadd.f32 %v3037_v63, %v2976_v34 }
 0x367   : > { %v3203_v63 = vadd.f32 %v3166_v33, %v3125_v7 }
 0x368   : > { %4030 = vmatmul.msk.bf16.gmra.mxu2 %vm2843_vm2, %v5530_v35  ;;  %vm3664_vm2 = vcmask 27648  }
 0x36b   : > { %v2978_v40 = vpop.f32.mrf.mxu2 }
 0x36c   : > { %v2979_v28 = vadd.f32 %v2978_v40, %v5539_v2  ;;  %v3042_v47 = vpop.f32.mrf.mxu3  ;;  %v3090_v5 = vpop.f32.mrf.mxu0  ;;  %v3201_v2 = vadd.f32 %v3161_v52, %v3123_v38 }
 0x36d   : > { %v3173_v42 = vpop.f32.mrf.mxu1  ;;  %v3126_v45 = vadd.f32 %v3090_v5, %v5492_v20 }
 0x36e   : > { %v5595_v61 = vadd.f32 %v3040_v56, %v2979_v28 }
 0x36f   : > { %v3204_v50 = vadd.f32 %v3168_v13, %v3126_v45 }
 0x373   : > { %v2980_v11 = vpop.f32.mrf.mxu2 }
 0x374   : > { %v2981_v55 = vadd.f32 %v2980_v11, %v2920_v43  ;;  %v3317_v35 = vpop.f32.mrf.mxu3  ;;  %v3093_v16 = vpop.f32.mrf.mxu0  ;;  %v5605_v43 = vld [vmem:[%s5743_s8] ss:$0 sm:$0xff] }
 0x375   : > { %4051 = vmatmul.msk.bf16.gmra.mxu1 %vm3427_vm9, %v3412_v60  ;;  %v3176_v27 = vpop.f32.mrf.mxu1 }
 0x376   : > { %v5598_v4 = vadd.f32 %v3042_v47, %v2981_v55  ;;  %v3127_v47 = vadd.f32 %v3093_v16, %v5501_v39 }
 0x378   : > { %v3205_v13 = vadd.f32 %v3171_v19, %v3127_v47 }
 0x37b   : > { %v3239_v51 = vpop.f32.mrf.mxu2 }
 0x37c   : > { %v3319_v8 = vpop.f32.mrf.mxu3  ;;  %v3279_v26 = vadd.f32 %v3239_v51, %v3201_v2  ;;  %v3095_v31 = vpop.f32.mrf.mxu0 }
 0x37d   : > { %v3178_v56 = vpop.f32.mrf.mxu1  ;;  %v3128_v5 = vadd.f32 %v3095_v31, %v5516_v22 }
 0x37e   : > { %v3357_v14 = vadd.f32 %v3317_v35, %v3279_v26 }
 0x37f   : > { %v3206_v38 = vadd.f32 %v3173_v42, %v3128_v5 }
 0x380   : > { %v3377_v18 = vadd.f32 %v5605_v43, %v3357_v14 }
 0x382   : > { %v3393_v46 = vmax.f32 %v3377_v18, 0.0 }
 0x383   : > { %v3241_v53 = vpop.f32.mrf.mxu2 }
 0x384   : > { %v3280_v9 = vadd.f32 %v3241_v53, %v3202_v15  ;;  %v3322_v3 = vpop.f32.mrf.mxu3  ;;  %v3098_v57 = vpop.f32.mrf.mxu0 }
 0x385   : > { %4052 = vmatmul.msk.bf16.gmra.mxu1 %vm3427_vm9, %v5908_v10  ;;  %v3181_v11 = vpop.f32.mrf.mxu1  ;;  %v3129_v53 = vadd.f32 %v3098_v57, %v5521_v41 }
 0x386   : > { %v3358_v52 = vadd.f32 %v3319_v8, %v3280_v9 }
 0x387   : > { %v3207_v42 = vadd.f32 %v3176_v27, %v3129_v53 }
 0x388   : > { %v3378_v24 = vadd.f32 %v5605_v43, %v3358_v52 }
 0x38a   : > { %v3394_v54 = vmax.f32 %v3378_v24, 0.0 }
 0x38b   : > { %v3244_v30 = vpop.f32.mrf.mxu2 }
 0x38c   : > { %v3418_v12 = vpack.c.bf16 %v3394_v54, %v3393_v46  ;;  %v3324_v37 = vpop.f32.mrf.mxu3  ;;  %v3281_v29 = vadd.f32 %v3244_v30, %v3203_v63  ;;  %v3100_v35 = vpop.f32.mrf.mxu0 }
 0x38d   : > { %v3183_v16 = vpop.f32.mrf.mxu1  ;;  %v3130_v24 = vadd.f32 %v3100_v35, %v5535_v49 }
 0x38e   : > { %4040 = vmatmul.msk.bf16.vlgmr.msra.gmra.mxu0 %vm3427_vm9, %v3418_v12  ;;  %v3359_v34 = vadd.f32 %v3322_v3, %v3281_v29 }
 0x38f   : > { %v3208_v46 = vadd.f32 %v3178_v56, %v3130_v24 }
 0x390   : > { %v3379_v40 = vadd.f32 %v5605_v43, %v3359_v34 }
 0x392   : > { %v3395_v44 = vmax.f32 %v3379_v40, 0.0 }
 0x393   : > { %v3246_v21 = vpop.f32.mrf.mxu2 }
 0x394   : > { %v3282_v23 = vadd.f32 %v3246_v21, %v3204_v50  ;;  %v3327_v48 = vpop.f32.mrf.mxu3  ;;  %v3103_v14 = vpop.f32.mrf.mxu0 }
 0x395   : > { %4053 = vmatmul.msk.bf16.gmra.mxu1 %vm3427_vm9, %v5909_v36  ;;  %v3186_v7 = vpop.f32.mrf.mxu1  ;;  %v3131_v45 = vadd.f32 %v3103_v14, %v5551_v1 }
 0x396   : > { %v3360_v33 = vadd.f32 %v3324_v37, %v3282_v23  ;;  %v5911_v37 = vld [vmem:[#allocation14_spill] sm:$0xff] }
 0x397   : > { %v3209_v56 = vadd.f32 %v3181_v11, %v3131_v45 }
 0x398   : > { %v3380_v28 = vadd.f32 %v5605_v43, %v3360_v33 }
 0x39a   : > { %v3396_v6 = vmax.f32 %v3380_v28, 0.0 }
 0x39b   : > { %v3249_v20 = vpop.f32.mrf.mxu2 }
 0x39c   : > { %v3419_v62 = vpack.c.bf16 %v3396_v6, %v3395_v44  ;;  %v3329_v60 = vpop.f32.mrf.mxu3  ;;  %v3283_v55 = vadd.f32 %v3249_v20, %v3205_v13  ;;  %v3105_v31 = vpop.f32.mrf.mxu0 }
 0x39d   : > { %v3188_v49 = vpop.f32.mrf.mxu1  ;;  %v3132_v40 = vadd.f32 %v3105_v31, %v5557_v58 }
 0x39e   : > { %4041 = vmatmul.msk.bf16.gmra.mxu0 %vm3427_vm9, %v3419_v62  ;;  %v3361_v51 = vadd.f32 %v3327_v48, %v3283_v55 }
 0x39f   : > { %v3210_v33 = vadd.f32 %v3183_v16, %v3132_v40 }
 0x3a0   : > { %v3381_v39 = vadd.f32 %v5605_v43, %v3361_v51 }
 0x3a2   : > { %v3397_v9 = vmax.f32 %v3381_v39, 0.0 }
 0x3a3   : > { %v3251_v2 = vpop.f32.mrf.mxu2 }
 0x3a4   : > { %v3284_v8 = vadd.f32 %v3251_v2, %v3206_v38  ;;  %v3332_v26 = vpop.f32.mrf.mxu3  ;;  %v3108_v57 = vpop.f32.mrf.mxu0 }
 0x3a5   : > { %4054 = vmatmul.msk.bf16.gmra.mxu1 %vm3427_vm9, %v5910_v0  ;;  %v3191_v20 = vpop.f32.mrf.mxu1  ;;  %v3133_v11 = vadd.f32 %v3108_v57, %v5566_v17 }
 0x3a6   : > { %v3362_v19 = vadd.f32 %v3329_v60, %v3284_v8 }
 0x3a7   : > { %v3211_v38 = vadd.f32 %v3186_v7, %v3133_v11 }
 0x3a8   : > { %v3382_v15 = vadd.f32 %v5605_v43, %v3362_v19 }
 0x3aa   : > { %v3398_v3 = vmax.f32 %v3382_v15, 0.0 }
 0x3ab   : > { %v3254_v22 = vpop.f32.mrf.mxu2 }
 0x3ac   : > { %v3420_v10 = vpack.c.bf16 %v3398_v3, %v3397_v9  ;;  %v3334_v18 = vpop.f32.mrf.mxu3  ;;  %v3285_v52 = vadd.f32 %v3254_v22, %v3207_v42  ;;  %v3110_v62 = vpop.f32.mrf.mxu0 }
 0x3ad   : > { %v3193_v8 = vpop.f32.mrf.mxu1 }
 0x3ae   : > { %4042 = vmatmul.msk.bf16.gmra.mxu0 %vm3427_vm9, %v3420_v10  ;;  %v3363_v54 = vadd.f32 %v3332_v26, %v3285_v52  ;;  %v3134_v26 = vadd.f32 %v3110_v62, %v5572_v59 }
 0x3b0   : > { %v3383_v41 = vadd.f32 %v5605_v43, %v3363_v54  ;;  %v3212_v39 = vadd.f32 %v3188_v49, %v3134_v26 }
 0x3b2   : > { %v3399_v50 = vmax.f32 %v3383_v41, 0.0 }
 0x3b3   : > { %v3256_v30 = vpop.f32.mrf.mxu2 }
 0x3b4   : > { %v3286_v63 = vadd.f32 %v3256_v30, %v3208_v46  ;;  %v3337_v12 = vpop.f32.mrf.mxu3  ;;  %v3113_v0 = vpop.f32.mrf.mxu0 }
 0x3b5   : > { %4055 = vmatmul.msk.bf16.gmra.mxu1 %vm3427_vm9, %v5911_v37  ;;  %v3196_v3 = vpop.f32.mrf.mxu1  ;;  %v3135_v22 = vadd.f32 %v3113_v0, %v5581_v32 }
 0x3b6   : > { %v3364_v27 = vadd.f32 %v3334_v18, %v3286_v63 }
 0x3b7   : > { %v3213_v24 = vadd.f32 %v3191_v20, %v3135_v22 }
 0x3b8   : > { %v3384_v29 = vadd.f32 %v5605_v43, %v3364_v27 }
 0x3ba   : > { %v3400_v34 = vmax.f32 %v3384_v29, 0.0 }
 0x3bb   : > { %v3259_v21 = vpop.f32.mrf.mxu2 }
 0x3bc   : > { %v3421_v23 = vpack.c.bf16 %v3400_v34, %v3399_v50  ;;  %v3339_v48 = vpop.f32.mrf.mxu3  ;;  %v3287_v36 = vadd.f32 %v3259_v21, %v3209_v56  ;;  %v3115_v18 = vpop.f32.mrf.mxu0 }
 0x3bd   : > { %v3136_v46 = vadd.f32 %v3115_v18, %v5586_v25  ;;  %v3198_v63 = vpop.f32.mrf.mxu1 }
 0x3be   : > { %4043 = vmatmul.msk.bf16.gmra.mxu0 %vm3427_vm9, %v3421_v23  ;;  %v3365_v28 = vadd.f32 %v3337_v12, %v3287_v36 }
 0x3bf   : > { %v3214_v31 = vadd.f32 %v3193_v8, %v3136_v46 }
 0x3c0   : > { %v3385_v1 = vadd.f32 %v5605_v43, %v3365_v28 }
 0x3c2   : > { %v3401_v55 = vmax.f32 %v3385_v1, 0.0 }
 0x3c3   : > { %v3261_v47 = vpop.f32.mrf.mxu2 }
 0x3c4   : > { %v3288_v44 = vadd.f32 %v3261_v47, %v3210_v33  ;;  %v3342_v6 = vpop.f32.mrf.mxu3  ;;  %v3118_v41 = vpop.f32.mrf.mxu0 }
 0x3c5   : > { %v3137_v45 = vadd.f32 %v3118_v41, %v5595_v61  ;;  %v3540_v23 = vpop.f32.mrf.mxu1 }
 0x3c6   : > { %v3366_v13 = vadd.f32 %v3339_v48, %v3288_v44 }
 0x3c7   : > { %v3215_v56 = vadd.f32 %v3196_v3, %v3137_v45 }
 0x3c8   : > { %v3386_v60 = vadd.f32 %v5605_v43, %v3366_v13 }
 0x3ca   : > { %v3402_v35 = vmax.f32 %v3386_v60, 0.0 }
 0x3cb   : > { %v3264_v5 = vpop.f32.mrf.mxu2 }
 0x3cc   : > { %v3422_v51 = vpack.c.bf16 %v3402_v35, %v3401_v55  ;;  %v3344_v58 = vpop.f32.mrf.mxu3  ;;  %v3289_v2 = vadd.f32 %v3264_v5, %v3211_v38  ;;  %v3120_v57 = vpop.f32.mrf.mxu0  ;;  %v456_v55 = vld [vmem:[%s4286_s15] sm:$0xff]  }
 0x3cd   : > { %v3138_v36 = vadd.f32 %v3120_v57, %v5598_v4  ;;  %v3542_v20 = vpop.f32.mrf.mxu1  ;;  %v5657_v4 = vld [vmem:[%s5746_s11] ss:$0 sm:$0xff]  ;;  %v462_v57 = vld [vmem:[%s4286_s15 + $0x18] sm:$0xff]  }
 0x3ce   : > { %4044 = vmatmul.msk.bf16.gmra.mxu0 %vm3427_vm9, %v3422_v51  ;;  %v3367_v19 = vadd.f32 %v3342_v6, %v3289_v2  ;;  %v3600_v51 = vunpack.c.l.bf16 %v456_v55 }
 0x3cf   : > { %v3216_v40 = vadd.f32 %v3198_v63, %v3138_v36  ;;  %v460_v63 = vld [vmem:[%s4286_s15 + $0x10] sm:$0xff]  }
 0x3d0   : > { %v3387_v14 = vadd.f32 %v5605_v43, %v3367_v19 }
 0x3d2   : > { %v3403_v42 = vmax.f32 %v3387_v14, 0.0  ;;  %v458_v14 = vld [vmem:[%s4286_s15 + $0x8] sm:$0xff]  }
 0x3d3   : > { %v3266_v16 = vpop.f32.mrf.mxu2  ;;  %v3602_v22 = vunpack.c.l.bf16 %v458_v14  ;;  %v3603_v46 = vunpack.c.h.bf16 %v458_v14 }
 0x3d4   : > { %v3290_v15 = vadd.f32 %v3266_v16, %v3212_v39  ;;  %v3347_v53 = vpop.f32.mrf.mxu3  ;;  %v3601_v39 = vunpack.c.h.bf16 %v456_v55 }
 0x3d5   : > { %v3545_v11 = vpop.f32.mrf.mxu1 }
 0x3d6   : > { %v3368_v17 = vadd.f32 %v3344_v58, %v3290_v15 }
 0x3d8   : > { %v3388_v9 = vadd.f32 %v5605_v43, %v3368_v17 }
 0x3da   : > { %v3404_v10 = vmax.f32 %v3388_v9, 0.0 }
 0x3db   : > { %v3269_v52 = vpop.f32.mrf.mxu2 }
 0x3dc   : > { %v3423_v59 = vpack.c.bf16 %v3404_v10, %v3403_v42  ;;  %v3291_v7 = vadd.f32 %v3269_v52, %v3213_v24  ;;  %v3349_v54 = vpop.f32.mrf.mxu3 }
 0x3dd   : > { %v3547_v35 = vpop.f32.mrf.mxu1 }
 0x3de   : > { %4045 = vmatmul.msk.bf16.gmra.mxu0 %vm3427_vm9, %v3423_v59  ;;  %v3369_v30 = vadd.f32 %v3347_v53, %v3291_v7 }
 0x3e0   : > { %v3389_v32 = vadd.f32 %v5605_v43, %v3369_v30 }
 0x3e2   : > { %v3405_v50 = vmax.f32 %v3389_v32, 0.0 }
 0x3e3   : > { %v3271_v12 = vpop.f32.mrf.mxu2 }
 0x3e4   : > { %v3292_v37 = vadd.f32 %v3271_v12, %v3214_v31  ;;  %v3352_v49 = vpop.f32.mrf.mxu3 }
 0x3e5   : > { %v3550_v19 = vpop.f32.mrf.mxu1 }
 0x3e6   : > { %v3370_v27 = vadd.f32 %v3349_v54, %v3292_v37 }
 0x3e8   : > { %v3390_v29 = vadd.f32 %v5605_v43, %v3370_v27  ;;  %v3604_v27 = vunpack.c.l.bf16 %v460_v63 }
 0x3ea   : > { %v3406_v34 = vmax.f32 %v3390_v29, 0.0 }
 0x3eb   : > { %v3274_v21 = vpop.f32.mrf.mxu2 }
 0x3ec   : > { %v3424_v25 = vpack.c.bf16 %v3406_v34, %v3405_v50  ;;  %v3293_v48 = vadd.f32 %v3274_v21, %v3215_v56  ;;  %v3354_v44 = vpop.f32.mrf.mxu3 }
 0x3ed   : > { %v3552_v10 = vpop.f32.mrf.mxu1 }
 0x3ee   : > { %4046 = vmatmul.msk.bf16.gmra.mxu0 %vm3427_vm9, %v3424_v25  ;;  %v3371_v33 = vadd.f32 %v3352_v49, %v3293_v48  ;;  %v3605_v25 = vunpack.c.h.bf16 %v460_v63 }
 0x3f0   : > { %v3391_v61 = vadd.f32 %v5605_v43, %v3371_v33 }
 0x3f2   : > { %v3407_v13 = vmax.f32 %v3391_v61, 0.0 }
 0x3f3   : > { %v3276_v28 = vpop.f32.mrf.mxu2 }
 0x3f4   : > { %v3294_v47 = vadd.f32 %v3276_v28, %v3216_v40 }
 0x3f5   : > { %v3555_v30 = vpop.f32.mrf.mxu1 }
 0x3f6   : > { %v3372_v6 = vadd.f32 %v3354_v44, %v3294_v47  ;;  %v3606_v47 = vunpack.c.l.bf16 %v462_v57 }
 0x3f8   : > { %v3392_v1 = vadd.f32 %v5605_v43, %v3372_v6 }
 0x3fa   : > { %v3408_v62 = vmax.f32 %v3392_v1, 0.0 }
 0x3fc   : > { %v3425_v60 = vpack.c.bf16 %v3408_v62, %v3407_v13 }
 0x3fd   : > { %v3557_v34 = vpop.f32.mrf.mxu1 }
 0x3fe   : > { %4047 = vmatmul.msk.bf16.gmra.mxu0 %vm3427_vm9, %v3425_v60  ;;  %v3607_v60 = vunpack.c.h.bf16 %v462_v57 }
 0x405   : > { %v3560_v44 = vpop.f32.mrf.mxu1 }
 0x40b   : > { %v3464_v5 = vpop.f32.mrf.mxu0 }
 0x40c   : > { %v3541_v38 = vadd.f32 %v3540_v23, %v3464_v5  ;;  %v464_v5 = vld [vmem:[%s4286_s15 + $0x20] sm:$0xff]  }
 0x40d   : > { %v3562_v55 = vpop.f32.mrf.mxu1  ;;  %v3609_v14 = vunpack.c.h.bf16 %v464_v5 }
 0x40e   : > { %v3584_v58 = vadd.f32 %v5657_v4, %v3541_v38 }
 0x410   : > { %v3616_v43 = vadd.f32 %v3600_v51, %v3584_v58 }
 0x412   : > { %v3632_v2 = vmax.f32 %v3616_v43, 0.0 }
 0x413   : > { %v3466_v8 = vpop.f32.mrf.mxu0 }
 0x414   : > { %v3648_v26 = vpack.c.bf16 %v3632_v2, %v3632_v2  ;;  %v3543_v0 = vadd.f32 %v3542_v20, %v3466_v8  ;;  %v3608_v2 = vunpack.c.l.bf16 %v464_v5 }
 0x416   : > { %3665 = vst.msk [vmem:[%s5664_s20] sm:$0xf] %vm3664_vm2, %v3648_v26  ;;  %v3585_v16 = vadd.f32 %v5657_v4, %v3543_v0  ;;  %v3565_v0 = vpop.f32.mrf.mxu1 }
 0x418   : > { %v3617_v15 = vadd.f32 %v3601_v39, %v3585_v16 }
 0x41a   : > { %v3633_v17 = vmax.f32 %v3617_v15, 0.0 }
 0x41b   : > { %v3469_v53 = vpop.f32.mrf.mxu0 }
 0x41c   : > { %v3649_v9 = vpack.c.bf16 %v3633_v17, %v3633_v17  ;;  %v3546_v3 = vadd.f32 %v3545_v11, %v3469_v53 }
 0x41e   : > { %3666 = vst.msk [vmem:[%s5664_s20 + $0x4] sm:$0xf] %vm3664_vm2, %v3649_v9  ;;  %v3586_v42 = vadd.f32 %v5657_v4, %v3546_v3  ;;  %v466_v9 = vld [vmem:[%s4286_s15 + $0x28] sm:$0xff]  }
 0x420   : > { %v3618_v18 = vadd.f32 %v3602_v22, %v3586_v42  ;;  %v3567_v22 = vpop.f32.mrf.mxu1 }
 0x422   : > { %v3634_v52 = vmax.f32 %v3618_v18, 0.0 }
 0x423   : > { %v3471_v24 = vpop.f32.mrf.mxu0 }
 0x424   : > { %v3650_v59 = vpack.c.bf16 %v3634_v52, %v3634_v52  ;;  %v3548_v7 = vadd.f32 %v3547_v35, %v3471_v24  ;;  %v3610_v52 = vunpack.c.l.bf16 %v466_v9 }
 0x426   : > { %3667 = vst.msk [vmem:[%s5664_s20 + $0x8] sm:$0xf] %vm3664_vm2, %v3650_v59  ;;  %v3587_v54 = vadd.f32 %v5657_v4, %v3548_v7 }
 0x428   : > { %v3619_v31 = vadd.f32 %v3603_v46, %v3587_v54  ;;  %v3570_v63 = vpop.f32.mrf.mxu1 }
 0x42a   : > { %v3635_v12 = vmax.f32 %v3619_v31, 0.0 }
 0x42b   : > { %v3474_v37 = vpop.f32.mrf.mxu0 }
 0x42c   : > { %v3651_v41 = vpack.c.bf16 %v3635_v12, %v3635_v12  ;;  %v3551_v32 = vadd.f32 %v3550_v19, %v3474_v37 }
 0x42e   : > { %3668 = vst.msk [vmem:[%s5664_s20 + $0xc] sm:$0xf] %vm3664_vm2, %v3651_v41  ;;  %v3588_v29 = vadd.f32 %v5657_v4, %v3551_v32  ;;  %v468_v41 = vld [vmem:[%s4286_s15 + $0x30] sm:$0xff]  }
 0x42f   : > { %v3613_v57 = vunpack.c.h.bf16 %v468_v41 }
 0x430   : > { %v3620_v45 = vadd.f32 %v3604_v27, %v3588_v29 }
 0x432   : > { %v3636_v50 = vmax.f32 %v3620_v45, 0.0 }
 0x433   : > { %v3476_v49 = vpop.f32.mrf.mxu0 }
 0x434   : > { %v3652_v21 = vpack.c.bf16 %v3636_v50, %v3636_v50  ;;  %v3553_v56 = vadd.f32 %v3552_v10, %v3476_v49  ;;  %v3612_v50 = vunpack.c.l.bf16 %v468_v41  ;;  %v3572_v49 = vpop.f32.mrf.mxu1 }
 0x436   : > { %3669 = vst.msk [vmem:[%s5664_s20 + $0x10] sm:$0xf] %vm3664_vm2, %v3652_v21  ;;  %v3589_v23 = vadd.f32 %v5657_v4, %v3553_v56 }
 0x438   : > { %v3621_v48 = vadd.f32 %v3605_v25, %v3589_v23 }
 0x43a   : > { %v3637_v36 = vmax.f32 %v3621_v48, 0.0 }
 0x43b   : > { %v3479_v40 = vpop.f32.mrf.mxu0 }
 0x43c   : > { %v3653_v33 = vpack.c.bf16 %v3637_v36, %v3637_v36  ;;  %v3556_v28 = vadd.f32 %v3555_v30, %v3479_v40  ;;  %v3611_v30 = vunpack.c.h.bf16 %v466_v9 }
 0x43e   : > { %3670 = vst.msk [vmem:[%s5664_s20 + $0x14] sm:$0xf] %vm3664_vm2, %v3653_v33  ;;  %v3590_v61 = vadd.f32 %v5657_v4, %v3556_v28  ;;  %v3575_v33 = vpop.f32.mrf.mxu1  ;;  %v470_v28 = vld [vmem:[%s4286_s15 + $0x38] sm:$0xff]  }
 0x43f   : > { %v3615_v5 = vunpack.c.h.bf16 %v470_v28 }
 0x440   : > { %v3622_v6 = vadd.f32 %v3606_v47, %v3590_v61 }
 0x442   : > { %v3638_v20 = vmax.f32 %v3622_v6, 0.0 }
 0x443   : > { %v3481_v1 = vpop.f32.mrf.mxu0 }
 0x444   : > { %v3654_v13 = vpack.c.bf16 %v3638_v20, %v3638_v20  ;;  %v3558_v62 = vadd.f32 %v3557_v34, %v3481_v1  ;;  %v3614_v20 = vunpack.c.l.bf16 %v470_v28 }
 0x446   : > { %3671 = vst.msk [vmem:[%s5664_s20 + $0x18] sm:$0xf] %vm3664_vm2, %v3654_v13  ;;  %v3591_v11 = vadd.f32 %v5657_v4, %v3558_v62 }
 0x448   : > { %v3623_v35 = vadd.f32 %v3607_v60, %v3591_v11  ;;  %v3577_v60 = vpop.f32.mrf.mxu1 }
 0x44a   : > { %v3639_v38 = vmax.f32 %v3623_v35, 0.0 }
 0x44b   : > { %v3484_v51 = vpop.f32.mrf.mxu0 }
 0x44c   : > { %v3655_v58 = vpack.c.bf16 %v3639_v38, %v3639_v38  ;;  %v3561_v43 = vadd.f32 %v3560_v44, %v3484_v51 }
 0x44e   : > { %3672 = vst.msk [vmem:[%s5664_s20 + $0x1c] sm:$0xf] %vm3664_vm2, %v3655_v58  ;;  %v3592_v8 = vadd.f32 %v5657_v4, %v3561_v43 }
 0x450   : > { %v3624_v26 = vadd.f32 %v3608_v2, %v3592_v8 }
 0x452   : > { %v3640_v39 = vmax.f32 %v3624_v26, 0.0 }
 0x453   : > { %v3486_v19 = vpop.f32.mrf.mxu0 }
 0x454   : > { %v3656_v16 = vpack.c.bf16 %v3640_v39, %v3640_v39  ;;  %v3563_v15 = vadd.f32 %v3562_v55, %v3486_v19 }
 0x456   : > { %3673 = vst.msk [vmem:[%s5664_s20 + $0x20] sm:$0xf] %vm3664_vm2, %v3656_v16  ;;  %v3593_v17 = vadd.f32 %v5657_v4, %v3563_v15 }
 0x458   : > { %v3625_v53 = vadd.f32 %v3609_v14, %v3593_v17 }
 0x45a   : > { %v3641_v3 = vmax.f32 %v3625_v53, 0.0 }
 0x45b   : > { %v3489_v42 = vpop.f32.mrf.mxu0 }
 0x45c   : > { %v3657_v10 = vpack.c.bf16 %v3641_v3, %v3641_v3  ;;  %v3566_v18 = vadd.f32 %v3565_v0, %v3489_v42 }
 0x45e   : > { %3674 = vst.msk [vmem:[%s5664_s20 + $0x24] sm:$0xf] %vm3664_vm2, %v3657_v10  ;;  %v3594_v24 = vadd.f32 %v5657_v4, %v3566_v18 }
 0x460   : > { %v3626_v59 = vadd.f32 %v3610_v52, %v3594_v24 }
 0x462   : > { %v3642_v7 = vmax.f32 %v3626_v59, 0.0 }
 0x463   : > { %v3491_v46 = vpop.f32.mrf.mxu0 }
 0x464   : > { %v3658_v54 = vpack.c.bf16 %v3642_v7, %v3642_v7  ;;  %v3568_v31 = vadd.f32 %v3567_v22, %v3491_v46 }
 0x466   : > { %3675 = vst.msk [vmem:[%s5664_s20 + $0x28] sm:$0xf] %vm3664_vm2, %v3658_v54  ;;  %v3595_v12 = vadd.f32 %v5657_v4, %v3568_v31 }
 0x468   : > { %v3627_v37 = vadd.f32 %v3611_v30, %v3595_v12 }
 0x46a   : > { %v3643_v32 = vmax.f32 %v3627_v37, 0.0 }
 0x46b   : > { %v3494_v27 = vpop.f32.mrf.mxu0 }
 0x46c   : > { %v3659_v29 = vpack.c.bf16 %v3643_v32, %v3643_v32  ;;  %v3571_v45 = vadd.f32 %v3570_v63, %v3494_v27 }
 0x46e   : > { %3676 = vst.msk [vmem:[%s5664_s20 + $0x2c] sm:$0xf] %vm3664_vm2, %v3659_v29  ;;  %v3596_v34 = vadd.f32 %v5657_v4, %v3571_v45 }
 0x470   : > { %v3628_v21 = vadd.f32 %v3612_v50, %v3596_v34 }
 0x472   : > { %v3644_v56 = vmax.f32 %v3628_v21, 0.0 }
 0x473   : > { %v3496_v25 = vpop.f32.mrf.mxu0 }
 0x474   : > { %v3660_v23 = vpack.c.bf16 %v3644_v56, %v3644_v56  ;;  %v3573_v48 = vadd.f32 %v3572_v49, %v3496_v25 }
 0x476   : > { %3677 = vst.msk [vmem:[%s5664_s20 + $0x30] sm:$0xf] %vm3664_vm2, %v3660_v23  ;;  %v3597_v36 = vadd.f32 %v5657_v4, %v3573_v48 }
 0x478   : > { %v3629_v40 = vadd.f32 %v3613_v57, %v3597_v36 }
 0x47a   : > { %v3645_v47 = vmax.f32 %v3629_v40, 0.0 }
 0x47b   : > { %v3499_v44 = vpop.f32.mrf.mxu0 }
 0x47c   : > { %v3661_v61 = vpack.c.bf16 %v3645_v47, %v3645_v47  ;;  %v3576_v6 = vadd.f32 %v3575_v33, %v3499_v44 }
 0x47e   : > { %3678 = vst.msk [vmem:[%s5664_s20 + $0x34] sm:$0xf] %vm3664_vm2, %v3661_v61  ;;  %v3598_v1 = vadd.f32 %v5657_v4, %v3576_v6 }
 0x480   : > { %v3630_v13 = vadd.f32 %v3614_v20, %v3598_v1 }
 0x482   : > { %v3646_v62 = vmax.f32 %v3630_v13, 0.0 }
 0x483   : > { %v3501_v11 = vpop.f32.mrf.mxu0 }
 0x484   : > { %v3662_v55 = vpack.c.bf16 %v3646_v62, %v3646_v62  ;;  %v3578_v35 = vadd.f32 %v3577_v60, %v3501_v11 }
 0x486   : > { %3679 = vst.msk [vmem:[%s5664_s20 + $0x38] sm:$0xf] %vm3664_vm2, %v3662_v55  ;;  %v3599_v38 = vadd.f32 %v5657_v4, %v3578_v35 }
 0x488   : > { %v3631_v51 = vadd.f32 %v3615_v5, %v3599_v38 }
 0x48a   : > { %v3647_v58 = vmax.f32 %v3631_v51, 0.0 }
 0x48c   : > { %v3663_v43 = vpack.c.bf16 %v3647_v58, %v3647_v58 }
 0x48e   : > { %3680 = vst.msk [vmem:[%s5664_s20 + $0x3c] sm:$0xf] %vm3664_vm2, %v3663_v43 }
 0x48f PF: > { %s22_s25 = sadd.s32 1, %s4166_s25   ;;  %s5912_s22 = sld [smem:[#allocation2_spill]] }
 0x490   : > { %p19_p9 = scmp.ge.s32.totalorder %s22_s25, 6   ;;  %s5913_s29 = sld [smem:[#allocation3_spill]] }
 0x491   : > { %s5914_s24 = sld [smem:[#allocation4_spill]]  ;;  %s5915_s21 = smov %s4158_s23 }
 0x492   :  { %21 = sbr.rel (!%p19_p9) target bundleno = 3 (0x3), region = 113 }
 0x496   : > { %s5916_s23 = smov %s5913_s29 }

</bundles_post_ra>
